<compile_context>
chip_gen: v7x
topology: tpu7x:2x2x1
jax: 0.10.0
libtpu: 0.0.40
codegen_flags: <defaults>
</compile_context>

<pallas_src>
import functools

import numpy as np
import jax
import jax.numpy as jnp
from jax.experimental import pallas as pl
from jax.experimental.pallas import tpu as pltpu


_VMEM_LIMIT = 32 * 1024 * 1024       # fits v7x's 64 MiB physical / 32 MiB scoped VMEM
_USE_BF16_MATMUL = True              # set False on v5e (casts cost VALU, MXU gain unrealized)


def _mm(x):
    """Cast a matmul operand to the MXU-native dtype (accumulation stays f32)."""
    return x.astype(jnp.bfloat16) if _USE_BF16_MATMUL else x


# ----------------------------- helpers (in-kernel) -----------------------------

def _erf(x):
    # Abramowitz & Stegun 7.1.26 polynomial, |err| < 1.5e-7 (~ f32 ulp).
    # Reproduces torch.nn.GELU()'s exact-erf variant inside the kernel.
    p = 0.3275911
    a1, a2, a3, a4, a5 = (0.254829592, -0.284496736, 1.421413741,
                          -1.453152027, 1.061405429)
    ax = jnp.abs(x)
    t = 1.0 / (1.0 + p * ax)
    poly = ((((a5 * t + a4) * t + a3) * t + a2) * t + a1) * t
    y = 1.0 - poly * jnp.exp(-ax * ax)
    return jnp.where(x >= 0, y, -y)


def _gelu_exact(x):
    return 0.5 * x * (1.0 + _erf(x * 0.7071067811865476))


def _layernorm_f32(x, w, b, eps):
    mean = jnp.mean(x, axis=-1, keepdims=True)
    var = jnp.mean(jnp.square(x - mean), axis=-1, keepdims=True)
    return (x - mean) * jax.lax.rsqrt(var + eps) * w + b


# ----------------------------- Pallas kernels -----------------------------

def _swin_block_kernel(x_ref, ln1w_ref, ln1b_ref, qkvw_ref, qkvb_ref,
                       projw_ref, projb_ref, relb_ref, mask_ref,
                       ln2w_ref, ln2b_ref, w1_ref, b1_ref, w2_ref, b2_ref,
                       o_ref, *, num_heads, head_dim, nw, n, scale, eps):
    """Fully fused Swin block for one image (all `nw` windows per grid step):
    LN1 -> W-MSA (qkv, per-head attn + rel-bias + shift-mask, softmax, AV,
    head-sliced proj accumulation) -> residual -> LN2 -> MLP -> residual."""
    c = num_heads * head_dim
    x = x_ref[0].astype(jnp.float32)                       # (nw*n, c) residual stream

    # ---- LN1 + window attention + residual ----------------------------------
    xn = _layernorm_f32(x, ln1w_ref[...], ln1b_ref[...], eps)
    qkv = jnp.dot(_mm(xn), qkvw_ref[...],
                  preferred_element_type=jnp.float32) + qkvb_ref[...]   # (nw*n, 3c)
    qkv = qkv.reshape(nw, n, 3 * c)
    mask = mask_ref[...]                                   # (nw, n, n)

    y = jnp.zeros((nw * n, c), jnp.float32)
    for head in range(num_heads):                          # static, tiny loop
        q = qkv[:, :, head * head_dim:(head + 1) * head_dim] * scale
        k = qkv[:, :, c + head * head_dim:c + (head + 1) * head_dim]
        v = qkv[:, :, 2 * c + head * head_dim:2 * c + (head + 1) * head_dim]
        attn = jnp.einsum('wnd,wmd->wnm', _mm(q), _mm(k),
                          preferred_element_type=jnp.float32)           # (nw, n, n)
        attn = attn + relb_ref[head] + mask                # rel-pos bias + shift mask
        attn = attn - jnp.max(attn, axis=-1, keepdims=True)
        attn = jnp.exp(attn)
        attn = attn * pl.reciprocal(jnp.sum(attn, axis=-1, keepdims=True),
                                    approx=True)
        oh = jnp.einsum('wnm,wmd->wnd', _mm(attn), _mm(v),
                        preferred_element_type=jnp.float32)             # (nw, n, hd)
        # Accumulate this head through its slice of the projection matrix
        # (replaces the lane-axis concat of head fragments).
        y = y + jnp.dot(_mm(oh.reshape(nw * n, head_dim)), projw_ref[head],
                        preferred_element_type=jnp.float32)
    x = x + y + projb_ref[...]

    # ---- LN2 + MLP + residual (per-token -> commutes with reverse / roll) ---
    xn2 = _layernorm_f32(x, ln2w_ref[...], ln2b_ref[...], eps)
    hmid = jnp.dot(_mm(xn2), w1_ref[...],
                   preferred_element_type=jnp.float32) + b1_ref[...]
    hmid = _gelu_exact(hmid)                               # f32 vector math
    y2 = jnp.dot(_mm(hmid), w2_ref[...],
                 preferred_element_type=jnp.float32) + b2_ref[...]

    # TODO(synk): c=32 (<128 lanes) -> masked stores; lane-dense packing would
    # need a minor-dim-changing in-kernel reshape, skipped for robustness.
    o_ref[0] = (x + y2).astype(o_ref.dtype)


def swin_block_call(xw, p, mask, num_heads, eps=1e-5):
    b, m, c = xw.shape                 # m = nw*n (window-partitioned tokens)
    nw, n, _ = mask.shape
    hd = c // num_heads
    hid = p["fc1_w"].shape[1]
    kernel = functools.partial(_swin_block_kernel, num_heads=num_heads,
                               head_dim=hd, nw=nw, n=n, scale=hd ** -0.5, eps=eps)
    return pl.pallas_call(
        kernel,
        out_shape=jax.ShapeDtypeStruct((b, m, c), xw.dtype),
        grid=(b,),
        in_specs=[
            pl.BlockSpec((1, m, c), lambda i: (i, 0, 0)),
            pl.BlockSpec((1, c), lambda i: (0, 0)),
            pl.BlockSpec((1, c), lambda i: (0, 0)),
            pl.BlockSpec((c, 3 * c), lambda i: (0, 0)),
            pl.BlockSpec((1, 3 * c), lambda i: (0, 0)),
            pl.BlockSpec((num_heads, hd, c), lambda i: (0, 0, 0)),
            pl.BlockSpec((1, c), lambda i: (0, 0)),
            pl.BlockSpec((num_heads, n, n), lambda i: (0, 0, 0)),
            pl.BlockSpec((nw, n, n), lambda i: (0, 0, 0)),
            pl.BlockSpec((1, c), lambda i: (0, 0)),
            pl.BlockSpec((1, c), lambda i: (0, 0)),
            pl.BlockSpec((c, hid), lambda i: (0, 0)),
            pl.BlockSpec((1, hid), lambda i: (0, 0)),
            pl.BlockSpec((hid, c), lambda i: (0, 0)),
            pl.BlockSpec((1, c), lambda i: (0, 0)),
        ],
        out_specs=pl.BlockSpec((1, m, c), lambda i: (i, 0, 0)),
        compiler_params=pltpu.CompilerParams(
            dimension_semantics=("parallel",),
            vmem_limit_bytes=_VMEM_LIMIT),
    )(xw,
      p["norm1_w"].reshape(1, c), p["norm1_b"].reshape(1, c),
      p["qkv_w"], p["qkv_b"].reshape(1, 3 * c),
      p["proj_w"].reshape(num_heads, hd, c), p["proj_b"].reshape(1, c),
      p["rel_bias"], mask,
      p["norm2_w"].reshape(1, c), p["norm2_b"].reshape(1, c),
      p["fc1_w"], p["fc1_b"].reshape(1, hid),
      p["fc2_w"], p["fc2_b"].reshape(1, c))


def _conv3x3_kernel(xcol_ref, res_ref, w_ref, b_ref, o_ref, *, h, w, c):
    """3x3 conv (padding=1, cross-correlation) as 3 accumulating K=3c matmuls:
    the 3 dx taps are pre-packed along channels in the wrapper, each dy band is
    a sublane-aligned row-range slice.  RSTB residual add fused."""
    xcol = xcol_ref[0]                                     # ((h+2)*w, 3c)
    acc = jnp.zeros((h * w, c), jnp.float32)
    for dy in range(3):
        band = xcol[dy * w:dy * w + h * w, :]              # rows (y+dy)*w + x
        acc = acc + jnp.dot(_mm(band), w_ref[dy],
                            preferred_element_type=jnp.float32)
    y = acc + b_ref[...] + res_ref[0].astype(jnp.float32)
    o_ref[0] = y.astype(o_ref.dtype)


def conv3x3_block(x_tokens, res_tokens, b, h, w, c, conv_w, conv_b):
    x = x_tokens.reshape(b, h, w, c)
    xp = jnp.pad(x, ((0, 0), (1, 1), (1, 1), (0, 0)))      # (b, h+2, w+2, c)
    # Pack the 3 dx taps along channels (wrapper-side, ~3x activation bytes):
    # xcol[b, y, x, dx*c + ci] = xp[b, y, x+dx, ci]
    xcol = jnp.concatenate([xp[:, :, dx:dx + w, :] for dx in range(3)], axis=-1)
    xcol = xcol.reshape(b, (h + 2) * w, 3 * c)             # lane-dense-ish 2D slab
    wr = conv_w.reshape(3, 3 * c, c)                       # [dy, dx*c+ci, co]
    return pl.pallas_call(
        functools.partial(_conv3x3_kernel, h=h, w=w, c=c),
        out_shape=jax.ShapeDtypeStruct((b, h * w, c), x_tokens.dtype),
        grid=(b,),
        in_specs=[
            pl.BlockSpec((1, (h + 2) * w, 3 * c), lambda i: (i, 0, 0)),
            pl.BlockSpec((1, h * w, c), lambda i: (i, 0, 0)),
            pl.BlockSpec((3, 3 * c, c), lambda i: (0, 0, 0)),
            pl.BlockSpec((1, c), lambda i: (0, 0)),
        ],
        out_specs=pl.BlockSpec((1, h * w, c), lambda i: (i, 0, 0)),
        compiler_params=pltpu.CompilerParams(
            dimension_semantics=("parallel",),
            vmem_limit_bytes=_VMEM_LIMIT),
    )(xcol, res_tokens, wr, conv_b.reshape(1, c))


# ------------------------------- JAX glue ---------------------------------

def window_partition(x, ws):
    b, h, w, c = x.shape
    x = x.reshape(b, h // ws, ws, w // ws, ws, c)
    return x.transpose(0, 1, 3, 2, 4, 5).reshape(-1, ws * ws, c)


def window_reverse(windows, ws, h, w):
    b = windows.shape[0] // ((h // ws) * (w // ws))
    x = windows.reshape(b, h // ws, w // ws, ws, ws, -1)
    return x.transpose(0, 1, 3, 2, 4, 5).reshape(b, h, w, -1)


def _relative_position_index(ws):
    coords = np.stack(np.meshgrid(np.arange(ws), np.arange(ws), indexing="ij"))
    cf = coords.reshape(2, -1)
    rc = (cf[:, :, None] - cf[:, None, :]).transpose(1, 2, 0).astype(np.int64)
    rc[:, :, 0] += ws - 1
    rc[:, :, 1] += ws - 1
    rc[:, :, 0] *= 2 * ws - 1
    return rc.sum(-1)                                               # (N, N)


def _calc_attn_mask(h, w, ws, shift):
    img_mask = np.zeros((1, h, w, 1), np.float32)
    cnt = 0
    for hs in (slice(0, -ws), slice(-ws, -shift), slice(-shift, None)):
        for wsl in (slice(0, -ws), slice(-ws, -shift), slice(-shift, None)):
            img_mask[:, hs, wsl, :] = cnt
            cnt += 1
    mw = img_mask.reshape(1, h // ws, ws, w // ws, ws, 1)
    mw = mw.transpose(0, 1, 3, 2, 4, 5).reshape(-1, ws * ws)
    am = mw[:, None, :] - mw[:, :, None]
    return np.where(am != 0, -100.0, 0.0).astype(np.float32)        # (nw, N, N)


def swin_block(x, x_size, p, ws, shift, num_heads, mask):
    h, w = x_size
    b, L, c = x.shape
    n = ws * ws
    nw = (h // ws) * (w // ws)

    xr = x.reshape(b, h, w, c)
    if shift > 0:
        xr = jnp.roll(xr, shift=(-shift, -shift), axis=(1, 2))
    xw = window_partition(xr, ws).reshape(b, nw * n, c)     # pre-flattened rows
    yw = swin_block_call(xw, p, mask, num_heads)            # fused LN1+attn+res+LN2+MLP+res
    ys = window_reverse(yw.reshape(b * nw, n, c), ws, h, w)
    if shift > 0:
        ys = jnp.roll(ys, shift=(shift, shift), axis=(1, 2))
    return ys.reshape(b, L, c)


def swin_layers_forward(x_nchw, params, *, window_size, num_heads):
    b, c, h, w = x_nchw.shape
    assert h % window_size == 0 and w % window_size == 0
    x = x_nchw.reshape(b, c, h * w).transpose(0, 2, 1)               # (b, h*w, c)

    n = window_size * window_size
    nw = (h // window_size) * (w // window_size)
    shift = window_size // 2
    shift_mask = jnp.asarray(_calc_attn_mask(h, w, window_size, shift))  # (nw,n,n)
    zero_mask = jnp.zeros((nw, n, n), jnp.float32)

    for rstb in params:                                              # 4 RSTBs
        res = x
        for j, blk in enumerate(rstb["blocks"]):                     # blk_depth blocks
            s = 0 if j % 2 == 0 else shift
            mask = shift_mask if s > 0 else zero_mask
            x = swin_block(x, (h, w), blk, window_size, s, num_heads, mask)
        x = conv3x3_block(x, res, b, h, w, c, rstb["conv_w"], rstb["conv_b"])
    return x.transpose(0, 2, 1).reshape(b, c, h, w)


# --------------------------- deterministic init ----------------------------

def init_params(key, embed_dim, depth, num_heads, window_size, num_rstb=4, mlp_ratio=4):
    c = embed_dim
    hidden = mlp_ratio * c
    n = window_size * window_size
    bf16 = jnp.bfloat16  # MXU-native operands; accumulation stays f32 in-kernel
    rel_idx = _relative_position_index(window_size).reshape(-1)
    params = []
    for _ in range(num_rstb):
        blocks = []
        for _ in range(depth):
            key, *ks = jax.random.split(key, 10)
            rpb_table = 0.02 * jax.random.normal(
                ks[4], ((2 * window_size - 1) ** 2, num_heads), jnp.float32)
            # rel-pos bias gathered ONCE at init (parameter-only): (heads, n, n)
            rel_bias = rpb_table[rel_idx].reshape(n, n, num_heads).transpose(2, 0, 1)
            blocks.append({
                "norm1_w": jnp.ones((c,), jnp.float32),
                "norm1_b": jnp.zeros((c,), jnp.float32),
                "qkv_w": (0.02 * jax.random.normal(ks[0], (c, 3 * c), jnp.float32)).astype(bf16),
                "qkv_b": 0.02 * jax.random.normal(ks[1], (3 * c,), jnp.float32),
                "proj_w": (0.02 * jax.random.normal(ks[2], (c, c), jnp.float32)).astype(bf16),
                "proj_b": 0.02 * jax.random.normal(ks[3], (c,), jnp.float32),
                "rel_bias": rel_bias,
                "norm2_w": jnp.ones((c,), jnp.float32),
                "norm2_b": jnp.zeros((c,), jnp.float32),
                "fc1_w": (0.02 * jax.random.normal(ks[5], (c, hidden), jnp.float32)).astype(bf16),
                "fc1_b": 0.02 * jax.random.normal(ks[6], (hidden,), jnp.float32),
                "fc2_w": (0.02 * jax.random.normal(ks[7], (hidden, c), jnp.float32)).astype(bf16),
                "fc2_b": 0.02 * jax.random.normal(ks[8], (c,), jnp.float32),
            })
        key, k1, k2 = jax.random.split(key, 3)
        params.append({
            "blocks": blocks,
            "conv_w": (0.02 * jax.random.normal(k1, (3, 3, c, c), jnp.float32)).astype(bf16),
            "conv_b": 0.02 * jax.random.normal(k2, (c,), jnp.float32),
        })
    return params


# --------------------------------- main ------------------------------------

if __name__ == "__main__":
    # Small config consistent with SwinLayers(input_resolution=(8,8), embed_dim=32,
    # blk_depth=2, num_heads=2, window_size=4); 4 RSTB blocks as in the module.
    B, C, H, W = 2, 32, 8, 8
    WINDOW, HEADS, DEPTH = 4, 2, 2

    key = jax.random.PRNGKey(0)
    kx, kp = jax.random.split(key)
    x = jax.random.normal(kx, (B, C, H, W), jnp.float32)
    params = init_params(kp, C, DEPTH, HEADS, WINDOW)

    fwd = jax.jit(functools.partial(swin_layers_forward,
                                    window_size=WINDOW, num_heads=HEADS))
    y = fwd(x, params)
    jax.block_until_ready(y)
    assert y.shape == (B, C, H, W) and y.dtype == jnp.float32
    print("KERNEL_OK")
</pallas_src>

<mosaic_0001>
module attributes {stable_mosaic.version = 11 : i64} {
  func.func @_swin_block_kernel(%arg0: i32, %arg1: memref<1x64x32xf32, #tpu.memory_space<vmem>>, %arg2: memref<1x32xf32, #tpu.memory_space<vmem>>, %arg3: memref<1x32xf32, #tpu.memory_space<vmem>>, %arg4: memref<32x96xbf16, #tpu.memory_space<vmem>>, %arg5: memref<1x96xf32, #tpu.memory_space<vmem>>, %arg6: memref<2x16x32xbf16, #tpu.memory_space<vmem>>, %arg7: memref<1x32xf32, #tpu.memory_space<vmem>>, %arg8: memref<2x16x16xf32, #tpu.memory_space<vmem>>, %arg9: memref<4x16x16xf32, #tpu.memory_space<vmem>>, %arg10: memref<1x32xf32, #tpu.memory_space<vmem>>, %arg11: memref<1x32xf32, #tpu.memory_space<vmem>>, %arg12: memref<32x128xbf16, #tpu.memory_space<vmem>>, %arg13: memref<1x128xf32, #tpu.memory_space<vmem>>, %arg14: memref<128x32xbf16, #tpu.memory_space<vmem>>, %arg15: memref<1x32xf32, #tpu.memory_space<vmem>>, %arg16: memref<1x64x32xf32, #tpu.memory_space<vmem>>) attributes {dimension_semantics = [#tpu.dimension_semantics<parallel>], iteration_bounds = array<i64: 2>, scalar_prefetch = 0 : i64, scratch_operands = 0 : i64, tpu.core_type = #tpu.core_type<tc>, window_params = [{transform_indices = @transform_0, window_bounds = array<i64: 1, 64, 32>}, {pipeline_mode = #tpu.pipeline_mode<synchronous>, transform_indices = @transform_1, window_bounds = array<i64: 1, 32>}, {pipeline_mode = #tpu.pipeline_mode<synchronous>, transform_indices = @transform_2, window_bounds = array<i64: 1, 32>}, {pipeline_mode = #tpu.pipeline_mode<synchronous>, transform_indices = @transform_3, window_bounds = array<i64: 32, 96>}, {pipeline_mode = #tpu.pipeline_mode<synchronous>, transform_indices = @transform_4, window_bounds = array<i64: 1, 96>}, {pipeline_mode = #tpu.pipeline_mode<synchronous>, transform_indices = @transform_5, window_bounds = array<i64: 2, 16, 32>}, {pipeline_mode = #tpu.pipeline_mode<synchronous>, transform_indices = @transform_6, window_bounds = array<i64: 1, 32>}, {pipeline_mode = #tpu.pipeline_mode<synchronous>, transform_indices = @transform_7, window_bounds = array<i64: 2, 16, 16>}, {pipeline_mode = #tpu.pipeline_mode<synchronous>, transform_indices = @transform_8, window_bounds = array<i64: 4, 16, 16>}, {pipeline_mode = #tpu.pipeline_mode<synchronous>, transform_indices = @transform_9, window_bounds = array<i64: 1, 32>}, {pipeline_mode = #tpu.pipeline_mode<synchronous>, transform_indices = @transform_10, window_bounds = array<i64: 1, 32>}, {pipeline_mode = #tpu.pipeline_mode<synchronous>, transform_indices = @transform_11, window_bounds = array<i64: 32, 128>}, {pipeline_mode = #tpu.pipeline_mode<synchronous>, transform_indices = @transform_12, window_bounds = array<i64: 1, 128>}, {pipeline_mode = #tpu.pipeline_mode<synchronous>, transform_indices = @transform_13, window_bounds = array<i64: 128, 32>}, {pipeline_mode = #tpu.pipeline_mode<synchronous>, transform_indices = @transform_14, window_bounds = array<i64: 1, 32>}, {transform_indices = @transform_15, window_bounds = array<i64: 1, 64, 32>}]} {
    %c0 = arith.constant 0 : index
    %c0_0 = arith.constant 0 : index
    %c0_1 = arith.constant 0 : index
    %0 = vector.load %arg1[%c0, %c0_0, %c0_1] : memref<1x64x32xf32, #tpu.memory_space<vmem>>, vector<1x64x32xf32>
    %1 = vector.shape_cast %0 : vector<1x64x32xf32> to vector<64x32xf32>
    %c0_2 = arith.constant 0 : index
    %c0_3 = arith.constant 0 : index
    %2 = vector.load %arg2[%c0_2, %c0_3] : memref<1x32xf32, #tpu.memory_space<vmem>>, vector<1x32xf32>
    %c0_4 = arith.constant 0 : index
    %c0_5 = arith.constant 0 : index
    %3 = vector.load %arg3[%c0_4, %c0_5] : memref<1x32xf32, #tpu.memory_space<vmem>>, vector<1x32xf32>
    %cst = arith.constant dense<0.000000e+00> : vector<64xf32>
    %4 = vector.multi_reduction <add>, %1, %cst [1] : vector<64x32xf32> to vector<64xf32>
    %5 = vector.shape_cast %4 : vector<64xf32> to vector<64x1xf32>
    %cst_6 = arith.constant 3.200000e+01 : f32
    %6 = vector.broadcast %cst_6 : f32 to vector<64x1xf32>
    %7 = arith.divf %5, %6 : vector<64x1xf32>
    %8 = vector.broadcast %7 : vector<64x1xf32> to vector<64x32xf32>
    %9 = arith.subf %1, %8 : vector<64x32xf32>
    %10 = arith.mulf %9, %9 : vector<64x32xf32>
    %cst_7 = arith.constant dense<0.000000e+00> : vector<64xf32>
    %11 = vector.multi_reduction <add>, %10, %cst_7 [1] : vector<64x32xf32> to vector<64xf32>
    %12 = vector.shape_cast %11 : vector<64xf32> to vector<64x1xf32>
    %cst_8 = arith.constant 3.200000e+01 : f32
    %13 = vector.broadcast %cst_8 : f32 to vector<64x1xf32>
    %14 = arith.divf %12, %13 : vector<64x1xf32>
    %15 = vector.broadcast %7 : vector<64x1xf32> to vector<64x32xf32>
    %16 = arith.subf %1, %15 : vector<64x32xf32>
    %cst_9 = arith.constant 9.99999974E-6 : f32
    %17 = vector.broadcast %cst_9 : f32 to vector<64x1xf32>
    %18 = arith.addf %14, %17 : vector<64x1xf32>
    %19 = math.rsqrt %18 : vector<64x1xf32>
    %20 = vector.broadcast %19 : vector<64x1xf32> to vector<64x32xf32>
    %21 = arith.mulf %16, %20 : vector<64x32xf32>
    %22 = vector.broadcast %2 : vector<1x32xf32> to vector<64x32xf32>
    %23 = arith.mulf %21, %22 : vector<64x32xf32>
    %24 = vector.broadcast %3 : vector<1x32xf32> to vector<64x32xf32>
    %25 = arith.addf %23, %24 : vector<64x32xf32>
    %26 = arith.truncf %25 : vector<64x32xf32> to vector<64x32xbf16>
    %c0_10 = arith.constant 0 : index
    %c0_11 = arith.constant 0 : index
    %27 = vector.load %arg4[%c0_10, %c0_11] : memref<32x96xbf16, #tpu.memory_space<vmem>>, vector<32x96xbf16>
    %cst_12 = arith.constant dense<0.000000e+00> : vector<64x96xf32>
    %28 = tpu.matmul %26, %27, %cst_12 {dimension_numbers = #tpu.dot_dimension_numbers<[1], [0], [0], [1], [0, 0, 1, 1], [], []>} : vector<64x32xbf16>, vector<32x96xbf16>, vector<64x96xf32> -> vector<64x96xf32>
    %c0_13 = arith.constant 0 : index
    %c0_14 = arith.constant 0 : index
    %29 = vector.load %arg5[%c0_13, %c0_14] : memref<1x96xf32, #tpu.memory_space<vmem>>, vector<1x96xf32>
    %30 = vector.broadcast %29 : vector<1x96xf32> to vector<64x96xf32>
    %31 = arith.addf %28, %30 : vector<64x96xf32>
    %32 = vector.shape_cast %31 : vector<64x96xf32> to vector<4x16x96xf32>
    %c0_15 = arith.constant 0 : index
    %c0_16 = arith.constant 0 : index
    %c0_17 = arith.constant 0 : index
    %33 = vector.load %arg9[%c0_15, %c0_16, %c0_17] : memref<4x16x16xf32, #tpu.memory_space<vmem>>, vector<4x16x16xf32>
    %cst_18 = arith.constant 0.000000e+00 : f32
    %34 = vector.broadcast %cst_18 : f32 to vector<64x32xf32>
    %35 = vector.extract_strided_slice %32 {offsets = [0, 0, 0], sizes = [4, 16, 16], strides = [1, 1, 1]} : vector<4x16x96xf32> to vector<4x16x16xf32>
    %cst_19 = arith.constant 2.500000e-01 : f32
    %36 = vector.broadcast %cst_19 : f32 to vector<4x16x16xf32>
    %37 = arith.mulf %35, %36 : vector<4x16x16xf32>
    %38 = vector.extract_strided_slice %32 {offsets = [0, 0, 32], sizes = [4, 16, 16], strides = [1, 1, 1]} : vector<4x16x96xf32> to vector<4x16x16xf32>
    %39 = vector.extract_strided_slice %32 {offsets = [0, 0, 64], sizes = [4, 16, 16], strides = [1, 1, 1]} : vector<4x16x96xf32> to vector<4x16x16xf32>
    %40 = arith.truncf %37 : vector<4x16x16xf32> to vector<4x16x16xbf16>
    %41 = arith.truncf %38 : vector<4x16x16xf32> to vector<4x16x16xbf16>
    "tpu.trace_start"() <{level = 10 : i32, message = "wnd,wmd->wnm"}> : () -> ()
    %cst_20 = arith.constant dense<0.000000e+00> : vector<4x16x16xf32>
    %42 = tpu.matmul %40, %41, %cst_20 {dimension_numbers = #tpu.dot_dimension_numbers<[2], [2], [1], [1], [0, 0, 0, 1, 1, 1], [0], [0]>} : vector<4x16x16xbf16>, vector<4x16x16xbf16>, vector<4x16x16xf32> -> vector<4x16x16xf32>
    "tpu.trace_stop"() : () -> ()
    %c0_21 = arith.constant 0 : index
    %c0_22 = arith.constant 0 : index
    %c0_23 = arith.constant 0 : index
    %43 = vector.load %arg8[%c0_21, %c0_22, %c0_23] : memref<2x16x16xf32, #tpu.memory_space<vmem>>, vector<1x16x16xf32>
    %44 = vector.shape_cast %43 : vector<1x16x16xf32> to vector<16x16xf32>
    %45 = vector.shape_cast %44 : vector<16x16xf32> to vector<1x16x16xf32>
    %46 = vector.broadcast %45 : vector<1x16x16xf32> to vector<4x16x16xf32>
    %47 = arith.addf %42, %46 : vector<4x16x16xf32>
    %48 = arith.addf %47, %33 : vector<4x16x16xf32>
    %cst_24 = arith.constant dense<0xFF800000> : vector<4x16xf32>
    %49 = vector.multi_reduction <maximumf>, %48, %cst_24 [2] : vector<4x16x16xf32> to vector<4x16xf32>
    %50 = vector.shape_cast %49 : vector<4x16xf32> to vector<4x16x1xf32>
    %51 = vector.broadcast %50 : vector<4x16x1xf32> to vector<4x16x16xf32>
    %52 = arith.subf %48, %51 : vector<4x16x16xf32>
    %53 = math.exp %52 : vector<4x16x16xf32>
    %cst_25 = arith.constant dense<0.000000e+00> : vector<4x16xf32>
    %54 = vector.multi_reduction <add>, %53, %cst_25 [2] : vector<4x16x16xf32> to vector<4x16xf32>
    %55 = vector.shape_cast %54 : vector<4x16xf32> to vector<4x16x1xf32>
    %56 = tpu.reciprocal %55 {approx = true} : vector<4x16x1xf32> -> vector<4x16x1xf32>
    %57 = vector.broadcast %56 : vector<4x16x1xf32> to vector<4x16x16xf32>
    %58 = arith.mulf %53, %57 : vector<4x16x16xf32>
    %59 = arith.truncf %58 : vector<4x16x16xf32> to vector<4x16x16xbf16>
    %60 = arith.truncf %39 : vector<4x16x16xf32> to vector<4x16x16xbf16>
    "tpu.trace_start"() <{level = 10 : i32, message = "wnm,wmd->wnd"}> : () -> ()
    %cst_26 = arith.constant dense<0.000000e+00> : vector<4x16x16xf32>
    %61 = tpu.matmul %59, %60, %cst_26 {dimension_numbers = #tpu.dot_dimension_numbers<[2], [1], [1], [2], [0, 0, 0, 1, 1, 2], [0], [0]>} : vector<4x16x16xbf16>, vector<4x16x16xbf16>, vector<4x16x16xf32> -> vector<4x16x16xf32>
    "tpu.trace_stop"() : () -> ()
    %62 = vector.shape_cast %61 : vector<4x16x16xf32> to vector<64x16xf32>
    %63 = arith.truncf %62 : vector<64x16xf32> to vector<64x16xbf16>
    %c0_27 = arith.constant 0 : index
    %c0_28 = arith.constant 0 : index
    %c0_29 = arith.constant 0 : index
    %64 = vector.load %arg6[%c0_27, %c0_28, %c0_29] : memref<2x16x32xbf16, #tpu.memory_space<vmem>>, vector<1x16x32xbf16>
    %65 = vector.shape_cast %64 : vector<1x16x32xbf16> to vector<16x32xbf16>
    %cst_30 = arith.constant dense<0.000000e+00> : vector<64x32xf32>
    %66 = tpu.matmul %63, %65, %cst_30 {dimension_numbers = #tpu.dot_dimension_numbers<[1], [0], [0], [1], [0, 0, 1, 1], [], []>} : vector<64x16xbf16>, vector<16x32xbf16>, vector<64x32xf32> -> vector<64x32xf32>
    %67 = arith.addf %34, %66 : vector<64x32xf32>
    %68 = vector.extract_strided_slice %32 {offsets = [0, 0, 16], sizes = [4, 16, 16], strides = [1, 1, 1]} : vector<4x16x96xf32> to vector<4x16x16xf32>
    %cst_31 = arith.constant 2.500000e-01 : f32
    %69 = vector.broadcast %cst_31 : f32 to vector<4x16x16xf32>
    %70 = arith.mulf %68, %69 : vector<4x16x16xf32>
    %71 = vector.extract_strided_slice %32 {offsets = [0, 0, 48], sizes = [4, 16, 16], strides = [1, 1, 1]} : vector<4x16x96xf32> to vector<4x16x16xf32>
    %72 = vector.extract_strided_slice %32 {offsets = [0, 0, 80], sizes = [4, 16, 16], strides = [1, 1, 1]} : vector<4x16x96xf32> to vector<4x16x16xf32>
    %73 = arith.truncf %70 : vector<4x16x16xf32> to vector<4x16x16xbf16>
    %74 = arith.truncf %71 : vector<4x16x16xf32> to vector<4x16x16xbf16>
    "tpu.trace_start"() <{level = 10 : i32, message = "wnd,wmd->wnm"}> : () -> ()
    %cst_32 = arith.constant dense<0.000000e+00> : vector<4x16x16xf32>
    %75 = tpu.matmul %73, %74, %cst_32 {dimension_numbers = #tpu.dot_dimension_numbers<[2], [2], [1], [1], [0, 0, 0, 1, 1, 1], [0], [0]>} : vector<4x16x16xbf16>, vector<4x16x16xbf16>, vector<4x16x16xf32> -> vector<4x16x16xf32>
    "tpu.trace_stop"() : () -> ()
    %c1 = arith.constant 1 : index
    %c0_33 = arith.constant 0 : index
    %c0_34 = arith.constant 0 : index
    %76 = vector.load %arg8[%c1, %c0_33, %c0_34] : memref<2x16x16xf32, #tpu.memory_space<vmem>>, vector<1x16x16xf32>
    %77 = vector.shape_cast %76 : vector<1x16x16xf32> to vector<16x16xf32>
    %78 = vector.shape_cast %77 : vector<16x16xf32> to vector<1x16x16xf32>
    %79 = vector.broadcast %78 : vector<1x16x16xf32> to vector<4x16x16xf32>
    %80 = arith.addf %75, %79 : vector<4x16x16xf32>
    %81 = arith.addf %80, %33 : vector<4x16x16xf32>
    %cst_35 = arith.constant dense<0xFF800000> : vector<4x16xf32>
    %82 = vector.multi_reduction <maximumf>, %81, %cst_35 [2] : vector<4x16x16xf32> to vector<4x16xf32>
    %83 = vector.shape_cast %82 : vector<4x16xf32> to vector<4x16x1xf32>
    %84 = vector.broadcast %83 : vector<4x16x1xf32> to vector<4x16x16xf32>
    %85 = arith.subf %81, %84 : vector<4x16x16xf32>
    %86 = math.exp %85 : vector<4x16x16xf32>
    %cst_36 = arith.constant dense<0.000000e+00> : vector<4x16xf32>
    %87 = vector.multi_reduction <add>, %86, %cst_36 [2] : vector<4x16x16xf32> to vector<4x16xf32>
    %88 = vector.shape_cast %87 : vector<4x16xf32> to vector<4x16x1xf32>
    %89 = tpu.reciprocal %88 {approx = true} : vector<4x16x1xf32> -> vector<4x16x1xf32>
    %90 = vector.broadcast %89 : vector<4x16x1xf32> to vector<4x16x16xf32>
    %91 = arith.mulf %86, %90 : vector<4x16x16xf32>
    %92 = arith.truncf %91 : vector<4x16x16xf32> to vector<4x16x16xbf16>
    %93 = arith.truncf %72 : vector<4x16x16xf32> to vector<4x16x16xbf16>
    "tpu.trace_start"() <{level = 10 : i32, message = "wnm,wmd->wnd"}> : () -> ()
    %cst_37 = arith.constant dense<0.000000e+00> : vector<4x16x16xf32>
    %94 = tpu.matmul %92, %93, %cst_37 {dimension_numbers = #tpu.dot_dimension_numbers<[2], [1], [1], [2], [0, 0, 0, 1, 1, 2], [0], [0]>} : vector<4x16x16xbf16>, vector<4x16x16xbf16>, vector<4x16x16xf32> -> vector<4x16x16xf32>
    "tpu.trace_stop"() : () -> ()
    %95 = vector.shape_cast %94 : vector<4x16x16xf32> to vector<64x16xf32>
    %96 = arith.truncf %95 : vector<64x16xf32> to vector<64x16xbf16>
    %c1_38 = arith.constant 1 : index
    %c0_39 = arith.constant 0 : index
    %c0_40 = arith.constant 0 : index
    %97 = vector.load %arg6[%c1_38, %c0_39, %c0_40] : memref<2x16x32xbf16, #tpu.memory_space<vmem>>, vector<1x16x32xbf16>
    %98 = vector.shape_cast %97 : vector<1x16x32xbf16> to vector<16x32xbf16>
    %cst_41 = arith.constant dense<0.000000e+00> : vector<64x32xf32>
    %99 = tpu.matmul %96, %98, %cst_41 {dimension_numbers = #tpu.dot_dimension_numbers<[1], [0], [0], [1], [0, 0, 1, 1], [], []>} : vector<64x16xbf16>, vector<16x32xbf16>, vector<64x32xf32> -> vector<64x32xf32>
    %100 = arith.addf %67, %99 : vector<64x32xf32>
    %101 = arith.addf %1, %100 : vector<64x32xf32>
    %c0_42 = arith.constant 0 : index
    %c0_43 = arith.constant 0 : index
    %102 = vector.load %arg7[%c0_42, %c0_43] : memref<1x32xf32, #tpu.memory_space<vmem>>, vector<1x32xf32>
    %103 = vector.broadcast %102 : vector<1x32xf32> to vector<64x32xf32>
    %104 = arith.addf %101, %103 : vector<64x32xf32>
    %c0_44 = arith.constant 0 : index
    %c0_45 = arith.constant 0 : index
    %105 = vector.load %arg10[%c0_44, %c0_45] : memref<1x32xf32, #tpu.memory_space<vmem>>, vector<1x32xf32>
    %c0_46 = arith.constant 0 : index
    %c0_47 = arith.constant 0 : index
    %106 = vector.load %arg11[%c0_46, %c0_47] : memref<1x32xf32, #tpu.memory_space<vmem>>, vector<1x32xf32>
    %cst_48 = arith.constant dense<0.000000e+00> : vector<64xf32>
    %107 = vector.multi_reduction <add>, %104, %cst_48 [1] : vector<64x32xf32> to vector<64xf32>
    %108 = vector.shape_cast %107 : vector<64xf32> to vector<64x1xf32>
    %cst_49 = arith.constant 3.200000e+01 : f32
    %109 = vector.broadcast %cst_49 : f32 to vector<64x1xf32>
    %110 = arith.divf %108, %109 : vector<64x1xf32>
    %111 = vector.broadcast %110 : vector<64x1xf32> to vector<64x32xf32>
    %112 = arith.subf %104, %111 : vector<64x32xf32>
    %113 = arith.mulf %112, %112 : vector<64x32xf32>
    %cst_50 = arith.constant dense<0.000000e+00> : vector<64xf32>
    %114 = vector.multi_reduction <add>, %113, %cst_50 [1] : vector<64x32xf32> to vector<64xf32>
    %115 = vector.shape_cast %114 : vector<64xf32> to vector<64x1xf32>
    %cst_51 = arith.constant 3.200000e+01 : f32
    %116 = vector.broadcast %cst_51 : f32 to vector<64x1xf32>
    %117 = arith.divf %115, %116 : vector<64x1xf32>
    %118 = vector.broadcast %110 : vector<64x1xf32> to vector<64x32xf32>
    %119 = arith.subf %104, %118 : vector<64x32xf32>
    %cst_52 = arith.constant 9.99999974E-6 : f32
    %120 = vector.broadcast %cst_52 : f32 to vector<64x1xf32>
    %121 = arith.addf %117, %120 : vector<64x1xf32>
    %122 = math.rsqrt %121 : vector<64x1xf32>
    %123 = vector.broadcast %122 : vector<64x1xf32> to vector<64x32xf32>
    %124 = arith.mulf %119, %123 : vector<64x32xf32>
    %125 = vector.broadcast %105 : vector<1x32xf32> to vector<64x32xf32>
    %126 = arith.mulf %124, %125 : vector<64x32xf32>
    %127 = vector.broadcast %106 : vector<1x32xf32> to vector<64x32xf32>
    %128 = arith.addf %126, %127 : vector<64x32xf32>
    %129 = arith.truncf %128 : vector<64x32xf32> to vector<64x32xbf16>
    %c0_53 = arith.constant 0 : index
    %c0_54 = arith.constant 0 : index
    %130 = vector.load %arg12[%c0_53, %c0_54] : memref<32x128xbf16, #tpu.memory_space<vmem>>, vector<32x128xbf16>
    %cst_55 = arith.constant dense<0.000000e+00> : vector<64x128xf32>
    %131 = tpu.matmul %129, %130, %cst_55 {dimension_numbers = #tpu.dot_dimension_numbers<[1], [0], [0], [1], [0, 0, 1, 1], [], []>} : vector<64x32xbf16>, vector<32x128xbf16>, vector<64x128xf32> -> vector<64x128xf32>
    %c0_56 = arith.constant 0 : index
    %c0_57 = arith.constant 0 : index
    %132 = vector.load %arg13[%c0_56, %c0_57] : memref<1x128xf32, #tpu.memory_space<vmem>>, vector<1x128xf32>
    %133 = vector.broadcast %132 : vector<1x128xf32> to vector<64x128xf32>
    %134 = arith.addf %131, %133 : vector<64x128xf32>
    %cst_58 = arith.constant 5.000000e-01 : f32
    %135 = vector.broadcast %cst_58 : f32 to vector<64x128xf32>
    %136 = arith.mulf %135, %134 : vector<64x128xf32>
    %cst_59 = arith.constant 0.707106769 : f32
    %137 = vector.broadcast %cst_59 : f32 to vector<64x128xf32>
    %138 = arith.mulf %134, %137 : vector<64x128xf32>
    %139 = math.absf %138 : vector<64x128xf32>
    %cst_60 = arith.constant 0.327591091 : f32
    %140 = vector.broadcast %cst_60 : f32 to vector<64x128xf32>
    %141 = arith.mulf %140, %139 : vector<64x128xf32>
    %cst_61 = arith.constant 1.000000e+00 : f32
    %142 = vector.broadcast %cst_61 : f32 to vector<64x128xf32>
    %143 = arith.addf %142, %141 : vector<64x128xf32>
    %cst_62 = arith.constant 1.000000e+00 : f32
    %144 = vector.broadcast %cst_62 : f32 to vector<64x128xf32>
    %145 = arith.divf %144, %143 : vector<64x128xf32>
    %cst_63 = arith.constant 1.06140542 : f32
    %146 = vector.broadcast %cst_63 : f32 to vector<64x128xf32>
    %147 = arith.mulf %146, %145 : vector<64x128xf32>
    %cst_64 = arith.constant -1.45315206 : f32
    %148 = vector.broadcast %cst_64 : f32 to vector<64x128xf32>
    %149 = arith.addf %147, %148 : vector<64x128xf32>
    %150 = arith.mulf %149, %145 : vector<64x128xf32>
    %cst_65 = arith.constant 1.42141378 : f32
    %151 = vector.broadcast %cst_65 : f32 to vector<64x128xf32>
    %152 = arith.addf %150, %151 : vector<64x128xf32>
    %153 = arith.mulf %152, %145 : vector<64x128xf32>
    %cst_66 = arith.constant -0.284496725 : f32
    %154 = vector.broadcast %cst_66 : f32 to vector<64x128xf32>
    %155 = arith.addf %153, %154 : vector<64x128xf32>
    %156 = arith.mulf %155, %145 : vector<64x128xf32>
    %cst_67 = arith.constant 0.254829586 : f32
    %157 = vector.broadcast %cst_67 : f32 to vector<64x128xf32>
    %158 = arith.addf %156, %157 : vector<64x128xf32>
    %159 = arith.mulf %158, %145 : vector<64x128xf32>
    %cst_68 = arith.constant 0.000000e+00 : f32
    %160 = vector.broadcast %cst_68 : f32 to vector<64x128xf32>
    %161 = arith.subf %160, %139 : vector<64x128xf32>
    %162 = arith.mulf %161, %139 : vector<64x128xf32>
    %163 = math.exp %162 : vector<64x128xf32>
    %164 = arith.mulf %159, %163 : vector<64x128xf32>
    %cst_69 = arith.constant 1.000000e+00 : f32
    %165 = vector.broadcast %cst_69 : f32 to vector<64x128xf32>
    %166 = arith.subf %165, %164 : vector<64x128xf32>
    %cst_70 = arith.constant 0.000000e+00 : f32
    %167 = vector.broadcast %cst_70 : f32 to vector<64x128xf32>
    %168 = arith.cmpf oge, %138, %167 : vector<64x128xf32>
    %cst_71 = arith.constant 0.000000e+00 : f32
    %169 = vector.broadcast %cst_71 : f32 to vector<64x128xf32>
    %170 = arith.subf %169, %166 : vector<64x128xf32>
    %171 = arith.select %168, %166, %170 : vector<64x128xi1>, vector<64x128xf32>
    %cst_72 = arith.constant 1.000000e+00 : f32
    %172 = vector.broadcast %cst_72 : f32 to vector<64x128xf32>
    %173 = arith.addf %172, %171 : vector<64x128xf32>
    %174 = arith.mulf %136, %173 : vector<64x128xf32>
    %175 = arith.truncf %174 : vector<64x128xf32> to vector<64x128xbf16>
    %c0_73 = arith.constant 0 : index
    %c0_74 = arith.constant 0 : index
    %176 = vector.load %arg14[%c0_73, %c0_74] : memref<128x32xbf16, #tpu.memory_space<vmem>>, vector<128x32xbf16>
    %cst_75 = arith.constant dense<0.000000e+00> : vector<64x32xf32>
    %177 = tpu.matmul %175, %176, %cst_75 {dimension_numbers = #tpu.dot_dimension_numbers<[1], [0], [0], [1], [0, 0, 1, 1], [], []>} : vector<64x128xbf16>, vector<128x32xbf16>, vector<64x32xf32> -> vector<64x32xf32>
    %c0_76 = arith.constant 0 : index
    %c0_77 = arith.constant 0 : index
    %178 = vector.load %arg15[%c0_76, %c0_77] : memref<1x32xf32, #tpu.memory_space<vmem>>, vector<1x32xf32>
    %179 = vector.broadcast %178 : vector<1x32xf32> to vector<64x32xf32>
    %180 = arith.addf %177, %179 : vector<64x32xf32>
    %181 = arith.addf %104, %180 : vector<64x32xf32>
    %c0_78 = arith.constant 0 : index
    %c0_79 = arith.constant 0 : index
    %c0_80 = arith.constant 0 : index
    %182 = vector.load %arg16[%c0_78, %c0_79, %c0_80] : memref<1x64x32xf32, #tpu.memory_space<vmem>>, vector<1x64x32xf32>
    %183 = vector.shape_cast %182 : vector<1x64x32xf32> to vector<64x32xf32>
    %184 = vector.shape_cast %181 : vector<64x32xf32> to vector<1x64x32xf32>
    tpu.vector_store %arg16[%c0_78, %c0_79, %c0_80], %184 {strides = array<i32>} : memref<1x64x32xf32, #tpu.memory_space<vmem>>, vector<1x64x32xf32>,
    return
  }
  func.func @transform_0(%arg0: i32) -> (i32, i32, i32) {
    %c0_i32 = arith.constant 0 : i32
    %c0_i32_0 = arith.constant 0 : i32
    %c0_i32_1 = arith.constant 0 : i32
    return %arg0, %c0_i32, %c0_i32_0 : i32, i32, i32
  }
  func.func @transform_1(%arg0: i32) -> (i32, i32) {
    %c0_i32 = arith.constant 0 : i32
    %c0_i32_0 = arith.constant 0 : i32
    %c0_i32_1 = arith.constant 0 : i32
    return %c0_i32, %c0_i32_0 : i32, i32
  }
  func.func @transform_2(%arg0: i32) -> (i32, i32) {
    %c0_i32 = arith.constant 0 : i32
    %c0_i32_0 = arith.constant 0 : i32
    %c0_i32_1 = arith.constant 0 : i32
    return %c0_i32, %c0_i32_0 : i32, i32
  }
  func.func @transform_3(%arg0: i32) -> (i32, i32) {
    %c0_i32 = arith.constant 0 : i32
    %c0_i32_0 = arith.constant 0 : i32
    %c0_i32_1 = arith.constant 0 : i32
    return %c0_i32, %c0_i32_0 : i32, i32
  }
  func.func @transform_4(%arg0: i32) -> (i32, i32) {
    %c0_i32 = arith.constant 0 : i32
    %c0_i32_0 = arith.constant 0 : i32
    %c0_i32_1 = arith.constant 0 : i32
    return %c0_i32, %c0_i32_0 : i32, i32
  }
  func.func @transform_5(%arg0: i32) -> (i32, i32, i32) {
    %c0_i32 = arith.constant 0 : i32
    %c0_i32_0 = arith.constant 0 : i32
    %c0_i32_1 = arith.constant 0 : i32
    %c0_i32_2 = arith.constant 0 : i32
    return %c0_i32, %c0_i32_0, %c0_i32_1 : i32, i32, i32
  }
  func.func @transform_6(%arg0: i32) -> (i32, i32) {
    %c0_i32 = arith.constant 0 : i32
    %c0_i32_0 = arith.constant 0 : i32
    %c0_i32_1 = arith.constant 0 : i32
    return %c0_i32, %c0_i32_0 : i32, i32
  }
  func.func @transform_7(%arg0: i32) -> (i32, i32, i32) {
    %c0_i32 = arith.constant 0 : i32
    %c0_i32_0 = arith.constant 0 : i32
    %c0_i32_1 = arith.constant 0 : i32
    %c0_i32_2 = arith.constant 0 : i32
    return %c0_i32, %c0_i32_0, %c0_i32_1 : i32, i32, i32
  }
  func.func @transform_8(%arg0: i32) -> (i32, i32, i32) {
    %c0_i32 = arith.constant 0 : i32
    %c0_i32_0 = arith.constant 0 : i32
    %c0_i32_1 = arith.constant 0 : i32
    %c0_i32_2 = arith.constant 0 : i32
    return %c0_i32, %c0_i32_0, %c0_i32_1 : i32, i32, i32
  }
  func.func @transform_9(%arg0: i32) -> (i32, i32) {
    %c0_i32 = arith.constant 0 : i32
    %c0_i32_0 = arith.constant 0 : i32
    %c0_i32_1 = arith.constant 0 : i32
    return %c0_i32, %c0_i32_0 : i32, i32
  }
  func.func @transform_10(%arg0: i32) -> (i32, i32) {
    %c0_i32 = arith.constant 0 : i32
    %c0_i32_0 = arith.constant 0 : i32
    %c0_i32_1 = arith.constant 0 : i32
    return %c0_i32, %c0_i32_0 : i32, i32
  }
  func.func @transform_11(%arg0: i32) -> (i32, i32) {
    %c0_i32 = arith.constant 0 : i32
    %c0_i32_0 = arith.constant 0 : i32
    %c0_i32_1 = arith.constant 0 : i32
    return %c0_i32, %c0_i32_0 : i32, i32
  }
  func.func @transform_12(%arg0: i32) -> (i32, i32) {
    %c0_i32 = arith.constant 0 : i32
    %c0_i32_0 = arith.constant 0 : i32
    %c0_i32_1 = arith.constant 0 : i32
    return %c0_i32, %c0_i32_0 : i32, i32
  }
  func.func @transform_13(%arg0: i32) -> (i32, i32) {
    %c0_i32 = arith.constant 0 : i32
    %c0_i32_0 = arith.constant 0 : i32
    %c0_i32_1 = arith.constant 0 : i32
    return %c0_i32, %c0_i32_0 : i32, i32
  }
  func.func @transform_14(%arg0: i32) -> (i32, i32) {
    %c0_i32 = arith.constant 0 : i32
    %c0_i32_0 = arith.constant 0 : i32
    %c0_i32_1 = arith.constant 0 : i32
    return %c0_i32, %c0_i32_0 : i32, i32
  }
  func.func @transform_15(%arg0: i32) -> (i32, i32, i32) {
    %c0_i32 = arith.constant 0 : i32
    %c0_i32_0 = arith.constant 0 : i32
    %c0_i32_1 = arith.constant 0 : i32
    return %arg0, %c0_i32, %c0_i32_0 : i32, i32, i32
  }
}

module attributes {stable_mosaic.version = 11 : i64} {
  func.func @_conv3x3_kernel(%arg0: i32, %arg1: memref<1x80x96xf32, #tpu.memory_space<vmem>>, %arg2: memref<1x64x32xf32, #tpu.memory_space<vmem>>, %arg3: memref<3x96x32xbf16, #tpu.memory_space<vmem>>, %arg4: memref<1x32xf32, #tpu.memory_space<vmem>>, %arg5: memref<1x64x32xf32, #tpu.memory_space<vmem>>) attributes {dimension_semantics = [#tpu.dimension_semantics<parallel>], iteration_bounds = array<i64: 2>, scalar_prefetch = 0 : i64, scratch_operands = 0 : i64, tpu.core_type = #tpu.core_type<tc>, window_params = [{transform_indices = @transform_0, window_bounds = array<i64: 1, 80, 96>}, {transform_indices = @transform_1, window_bounds = array<i64: 1, 64, 32>}, {pipeline_mode = #tpu.pipeline_mode<synchronous>, transform_indices = @transform_2, window_bounds = array<i64: 3, 96, 32>}, {pipeline_mode = #tpu.pipeline_mode<synchronous>, transform_indices = @transform_3, window_bounds = array<i64: 1, 32>}, {transform_indices = @transform_4, window_bounds = array<i64: 1, 64, 32>}]} {
    %c0 = arith.constant 0 : index
    %c0_0 = arith.constant 0 : index
    %c0_1 = arith.constant 0 : index
    %0 = vector.load %arg1[%c0, %c0_0, %c0_1] : memref<1x80x96xf32, #tpu.memory_space<vmem>>, vector<1x80x96xf32>
    %1 = vector.shape_cast %0 : vector<1x80x96xf32> to vector<80x96xf32>
    %cst = arith.constant 0.000000e+00 : f32
    %2 = vector.broadcast %cst : f32 to vector<64x32xf32>
    %3 = vector.extract_strided_slice %1 {offsets = [0, 0], sizes = [64, 96], strides = [1, 1]} : vector<80x96xf32> to vector<64x96xf32>
    %4 = arith.truncf %3 : vector<64x96xf32> to vector<64x96xbf16>
    %c0_2 = arith.constant 0 : index
    %c0_3 = arith.constant 0 : index
    %c0_4 = arith.constant 0 : index
    %5 = vector.load %arg3[%c0_2, %c0_3, %c0_4] : memref<3x96x32xbf16, #tpu.memory_space<vmem>>, vector<1x96x32xbf16>
    %6 = vector.shape_cast %5 : vector<1x96x32xbf16> to vector<96x32xbf16>
    %cst_5 = arith.constant dense<0.000000e+00> : vector<64x32xf32>
    %7 = tpu.matmul %4, %6, %cst_5 {dimension_numbers = #tpu.dot_dimension_numbers<[1], [0], [0], [1], [0, 0, 1, 1], [], []>} : vector<64x96xbf16>, vector<96x32xbf16>, vector<64x32xf32> -> vector<64x32xf32>
    %8 = arith.addf %2, %7 : vector<64x32xf32>
    %9 = vector.extract_strided_slice %1 {offsets = [8, 0], sizes = [64, 96], strides = [1, 1]} : vector<80x96xf32> to vector<64x96xf32>
    %10 = arith.truncf %9 : vector<64x96xf32> to vector<64x96xbf16>
    %c1 = arith.constant 1 : index
    %c0_6 = arith.constant 0 : index
    %c0_7 = arith.constant 0 : index
    %11 = vector.load %arg3[%c1, %c0_6, %c0_7] : memref<3x96x32xbf16, #tpu.memory_space<vmem>>, vector<1x96x32xbf16>
    %12 = vector.shape_cast %11 : vector<1x96x32xbf16> to vector<96x32xbf16>
    %cst_8 = arith.constant dense<0.000000e+00> : vector<64x32xf32>
    %13 = tpu.matmul %10, %12, %cst_8 {dimension_numbers = #tpu.dot_dimension_numbers<[1], [0], [0], [1], [0, 0, 1, 1], [], []>} : vector<64x96xbf16>, vector<96x32xbf16>, vector<64x32xf32> -> vector<64x32xf32>
    %14 = arith.addf %8, %13 : vector<64x32xf32>
    %15 = vector.extract_strided_slice %1 {offsets = [16, 0], sizes = [64, 96], strides = [1, 1]} : vector<80x96xf32> to vector<64x96xf32>
    %16 = arith.truncf %15 : vector<64x96xf32> to vector<64x96xbf16>
    %c2 = arith.constant 2 : index
    %c0_9 = arith.constant 0 : index
    %c0_10 = arith.constant 0 : index
    %17 = vector.load %arg3[%c2, %c0_9, %c0_10] : memref<3x96x32xbf16, #tpu.memory_space<vmem>>, vector<1x96x32xbf16>
    %18 = vector.shape_cast %17 : vector<1x96x32xbf16> to vector<96x32xbf16>
    %cst_11 = arith.constant dense<0.000000e+00> : vector<64x32xf32>
    %19 = tpu.matmul %16, %18, %cst_11 {dimension_numbers = #tpu.dot_dimension_numbers<[1], [0], [0], [1], [0, 0, 1, 1], [], []>} : vector<64x96xbf16>, vector<96x32xbf16>, vector<64x32xf32> -> vector<64x32xf32>
    %20 = arith.addf %14, %19 : vector<64x32xf32>
    %c0_12 = arith.constant 0 : index
    %c0_13 = arith.constant 0 : index
    %21 = vector.load %arg4[%c0_12, %c0_13] : memref<1x32xf32, #tpu.memory_space<vmem>>, vector<1x32xf32>
    %22 = vector.broadcast %21 : vector<1x32xf32> to vector<64x32xf32>
    %23 = arith.addf %20, %22 : vector<64x32xf32>
    %c0_14 = arith.constant 0 : index
    %c0_15 = arith.constant 0 : index
    %c0_16 = arith.constant 0 : index
    %24 = vector.load %arg2[%c0_14, %c0_15, %c0_16] : memref<1x64x32xf32, #tpu.memory_space<vmem>>, vector<1x64x32xf32>
    %25 = vector.shape_cast %24 : vector<1x64x32xf32> to vector<64x32xf32>
    %26 = arith.addf %23, %25 : vector<64x32xf32>
    %c0_17 = arith.constant 0 : index
    %c0_18 = arith.constant 0 : index
    %c0_19 = arith.constant 0 : index
    %27 = vector.load %arg5[%c0_17, %c0_18, %c0_19] : memref<1x64x32xf32, #tpu.memory_space<vmem>>, vector<1x64x32xf32>
    %28 = vector.shape_cast %27 : vector<1x64x32xf32> to vector<64x32xf32>
    %29 = vector.shape_cast %26 : vector<64x32xf32> to vector<1x64x32xf32>
    tpu.vector_store %arg5[%c0_17, %c0_18, %c0_19], %29 {strides = array<i32>} : memref<1x64x32xf32, #tpu.memory_space<vmem>>, vector<1x64x32xf32>,
    return
  }
  func.func @transform_0(%arg0: i32) -> (i32, i32, i32) {
    %c0_i32 = arith.constant 0 : i32
    %c0_i32_0 = arith.constant 0 : i32
    %c0_i32_1 = arith.constant 0 : i32
    return %arg0, %c0_i32, %c0_i32_0 : i32, i32, i32
  }
  func.func @transform_1(%arg0: i32) -> (i32, i32, i32) {
    %c0_i32 = arith.constant 0 : i32
    %c0_i32_0 = arith.constant 0 : i32
    %c0_i32_1 = arith.constant 0 : i32
    return %arg0, %c0_i32, %c0_i32_0 : i32, i32, i32
  }
  func.func @transform_2(%arg0: i32) -> (i32, i32, i32) {
    %c0_i32 = arith.constant 0 : i32
    %c0_i32_0 = arith.constant 0 : i32
    %c0_i32_1 = arith.constant 0 : i32
    %c0_i32_2 = arith.constant 0 : i32
    return %c0_i32, %c0_i32_0, %c0_i32_1 : i32, i32, i32
  }
  func.func @transform_3(%arg0: i32) -> (i32, i32) {
    %c0_i32 = arith.constant 0 : i32
    %c0_i32_0 = arith.constant 0 : i32
    %c0_i32_1 = arith.constant 0 : i32
    return %c0_i32, %c0_i32_0 : i32, i32
  }
  func.func @transform_4(%arg0: i32) -> (i32, i32, i32) {
    %c0_i32 = arith.constant 0 : i32
    %c0_i32_0 = arith.constant 0 : i32
    %c0_i32_1 = arith.constant 0 : i32
    return %arg0, %c0_i32, %c0_i32_0 : i32, i32, i32
  }
}

module attributes {stable_mosaic.version = 11 : i64} {
  func.func @_conv3x3_kernel(%arg0: i32, %arg1: memref<1x80x96xf32, #tpu.memory_space<vmem>>, %arg2: memref<1x64x32xf32, #tpu.memory_space<vmem>>, %arg3: memref<3x96x32xbf16, #tpu.memory_space<vmem>>, %arg4: memref<1x32xf32, #tpu.memory_space<vmem>>, %arg5: memref<1x64x32xf32, #tpu.memory_space<vmem>>) attributes {dimension_semantics = [#tpu.dimension_semantics<parallel>], iteration_bounds = array<i64: 2>, scalar_prefetch = 0 : i64, scratch_operands = 0 : i64, tpu.core_type = #tpu.core_type<tc>, window_params = [{transform_indices = @transform_0, window_bounds = array<i64: 1, 80, 96>}, {transform_indices = @transform_1, window_bounds = array<i64: 1, 64, 32>}, {pipeline_mode = #tpu.pipeline_mode<synchronous>, transform_indices = @transform_2, window_bounds = array<i64: 3, 96, 32>}, {pipeline_mode = #tpu.pipeline_mode<synchronous>, transform_indices = @transform_3, window_bounds = array<i64: 1, 32>}, {transform_indices = @transform_4, window_bounds = array<i64: 1, 64, 32>}]} {
    %c0 = arith.constant 0 : index
    %c0_0 = arith.constant 0 : index
    %c0_1 = arith.constant 0 : index
    %0 = vector.load %arg1[%c0, %c0_0, %c0_1] : memref<1x80x96xf32, #tpu.memory_space<vmem>>, vector<1x80x96xf32>
    %1 = vector.shape_cast %0 : vector<1x80x96xf32> to vector<80x96xf32>
    %cst = arith.constant 0.000000e+00 : f32
    %2 = vector.broadcast %cst : f32 to vector<64x32xf32>
    %3 = vector.extract_strided_slice %1 {offsets = [0, 0], sizes = [64, 96], strides = [1, 1]} : vector<80x96xf32> to vector<64x96xf32>
    %4 = arith.truncf %3 : vector<64x96xf32> to vector<64x96xbf16>
    %c0_2 = arith.constant 0 : index
    %c0_3 = arith.constant 0 : index
    %c0_4 = arith.constant 0 : index
    %5 = vector.load %arg3[%c0_2, %c0_3, %c0_4] : memref<3x96x32xbf16, #tpu.memory_space<vmem>>, vector<1x96x32xbf16>
    %6 = vector.shape_cast %5 : vector<1x96x32xbf16> to vector<96x32xbf16>
    %cst_5 = arith.constant dense<0.000000e+00> : vector<64x32xf32>
    %7 = tpu.matmul %4, %6, %cst_5 {dimension_numbers = #tpu.dot_dimension_numbers<[1], [0], [0], [1], [0, 0, 1, 1], [], []>} : vector<64x96xbf16>, vector<96x32xbf16>, vector<64x32xf32> -> vector<64x32xf32>
    %8 = arith.addf %2, %7 : vector<64x32xf32>
    %9 = vector.extract_strided_slice %1 {offsets = [8, 0], sizes = [64, 96], strides = [1, 1]} : vector<80x96xf32> to vector<64x96xf32>
    %10 = arith.truncf %9 : vector<64x96xf32> to vector<64x96xbf16>
    %c1 = arith.constant 1 : index
    %c0_6 = arith.constant 0 : index
    %c0_7 = arith.constant 0 : index
    %11 = vector.load %arg3[%c1, %c0_6, %c0_7] : memref<3x96x32xbf16, #tpu.memory_space<vmem>>, vector<1x96x32xbf16>
    %12 = vector.shape_cast %11 : vector<1x96x32xbf16> to vector<96x32xbf16>
    %cst_8 = arith.constant dense<0.000000e+00> : vector<64x32xf32>
    %13 = tpu.matmul %10, %12, %cst_8 {dimension_numbers = #tpu.dot_dimension_numbers<[1], [0], [0], [1], [0, 0, 1, 1], [], []>} : vector<64x96xbf16>, vector<96x32xbf16>, vector<64x32xf32> -> vector<64x32xf32>
    %14 = arith.addf %8, %13 : vector<64x32xf32>
    %15 = vector.extract_strided_slice %1 {offsets = [16, 0], sizes = [64, 96], strides = [1, 1]} : vector<80x96xf32> to vector<64x96xf32>
    %16 = arith.truncf %15 : vector<64x96xf32> to vector<64x96xbf16>
    %c2 = arith.constant 2 : index
    %c0_9 = arith.constant 0 : index
    %c0_10 = arith.constant 0 : index
    %17 = vector.load %arg3[%c2, %c0_9, %c0_10] : memref<3x96x32xbf16, #tpu.memory_space<vmem>>, vector<1x96x32xbf16>
    %18 = vector.shape_cast %17 : vector<1x96x32xbf16> to vector<96x32xbf16>
    %cst_11 = arith.constant dense<0.000000e+00> : vector<64x32xf32>
    %19 = tpu.matmul %16, %18, %cst_11 {dimension_numbers = #tpu.dot_dimension_numbers<[1], [0], [0], [1], [0, 0, 1, 1], [], []>} : vector<64x96xbf16>, vector<96x32xbf16>, vector<64x32xf32> -> vector<64x32xf32>
    %20 = arith.addf %14, %19 : vector<64x32xf32>
    %c0_12 = arith.constant 0 : index
    %c0_13 = arith.constant 0 : index
    %21 = vector.load %arg4[%c0_12, %c0_13] : memref<1x32xf32, #tpu.memory_space<vmem>>, vector<1x32xf32>
    %22 = vector.broadcast %21 : vector<1x32xf32> to vector<64x32xf32>
    %23 = arith.addf %20, %22 : vector<64x32xf32>
    %c0_14 = arith.constant 0 : index
    %c0_15 = arith.constant 0 : index
    %c0_16 = arith.constant 0 : index
    %24 = vector.load %arg2[%c0_14, %c0_15, %c0_16] : memref<1x64x32xf32, #tpu.memory_space<vmem>>, vector<1x64x32xf32>
    %25 = vector.shape_cast %24 : vector<1x64x32xf32> to vector<64x32xf32>
    %26 = arith.addf %23, %25 : vector<64x32xf32>
    %c0_17 = arith.constant 0 : index
    %c0_18 = arith.constant 0 : index
    %c0_19 = arith.constant 0 : index
    %27 = vector.load %arg5[%c0_17, %c0_18, %c0_19] : memref<1x64x32xf32, #tpu.memory_space<vmem>>, vector<1x64x32xf32>
    %28 = vector.shape_cast %27 : vector<1x64x32xf32> to vector<64x32xf32>
    %29 = vector.shape_cast %26 : vector<64x32xf32> to vector<1x64x32xf32>
    tpu.vector_store %arg5[%c0_17, %c0_18, %c0_19], %29 {strides = array<i32>} : memref<1x64x32xf32, #tpu.memory_space<vmem>>, vector<1x64x32xf32>,
    return
  }
  func.func @transform_0(%arg0: i32) -> (i32, i32, i32) {
    %c0_i32 = arith.constant 0 : i32
    %c0_i32_0 = arith.constant 0 : i32
    %c0_i32_1 = arith.constant 0 : i32
    return %arg0, %c0_i32, %c0_i32_0 : i32, i32, i32
  }
  func.func @transform_1(%arg0: i32) -> (i32, i32, i32) {
    %c0_i32 = arith.constant 0 : i32
    %c0_i32_0 = arith.constant 0 : i32
    %c0_i32_1 = arith.constant 0 : i32
    return %arg0, %c0_i32, %c0_i32_0 : i32, i32, i32
  }
  func.func @transform_2(%arg0: i32) -> (i32, i32, i32) {
    %c0_i32 = arith.constant 0 : i32
    %c0_i32_0 = arith.constant 0 : i32
    %c0_i32_1 = arith.constant 0 : i32
    %c0_i32_2 = arith.constant 0 : i32
    return %c0_i32, %c0_i32_0, %c0_i32_1 : i32, i32, i32
  }
  func.func @transform_3(%arg0: i32) -> (i32, i32) {
    %c0_i32 = arith.constant 0 : i32
    %c0_i32_0 = arith.constant 0 : i32
    %c0_i32_1 = arith.constant 0 : i32
    return %c0_i32, %c0_i32_0 : i32, i32
  }
  func.func @transform_4(%arg0: i32) -> (i32, i32, i32) {
    %c0_i32 = arith.constant 0 : i32
    %c0_i32_0 = arith.constant 0 : i32
    %c0_i32_1 = arith.constant 0 : i32
    return %arg0, %c0_i32, %c0_i32_0 : i32, i32, i32
  }
}

</mosaic_0001>

<bundles_post_ra>
// kernel: swin_layers_forward.23
= control target key start
LH: loop header
LB: loop body
LE: loop exit
PB: predicated region body
PF: predicated region fallthrough
CT: control target
= control target key end

     0   :  { %9 = vsyncpa [#allocation3], 0  ;;  %s1297_s0 = inlined_call_operand.vmem [shape: f32[2,80,96], index: 0, kind: input, shape index: {}]   ;;  %s1298_s1 = inlined_call_operand.vmem [shape: f32[2,64,32], index: 1, kind: input, shape index: {}]   ;;  %s1299_s2 = inlined_call_operand.vmem [shape: bf16[3,96,32], index: 2, kind: input, shape index: {}]   ;;  %s1300_s3 = inlined_call_operand.vmem [shape: f32[1,32], index: 3, kind: input, shape index: {}]   ;;  %s1301_s4 = inlined_call_operand.hbm [shape: f32[2,64,32], index: 4, kind: output, shape index: {}]  }
   0x1   :  { %11 = vsyncpa [#allocation3 + $0x1], 0  ;;  %s1081_s15 = smov 0   ;;  %s1083_s16 = smov 0  }
   0x2   :  { %s1085_s17 = smov 0   ;;  %s1087_s18 = smov 0  }
   0x3 LB: > { %s1102_s19 = sadd.s32 4294967295, %s1051_s18   ;;  %s741_s20 = sadd.s32 4294967294, %s1051_s18   ;;  %s1051_s18 = sphi %s1087_s18, %s1307_s18   ;;  %s1047_s17 = sphi %s1085_s17, %s1306_s17   ;;  %s1043_s16 = sphi %s1083_s16, %s1305_s16   ;;  %s1039_s15 = sphi %s1081_s15, %s1304_s15  }
   0x4   : > { %s1106_s21 = sadd.s32 1, %s1051_s18   ;;  %s118_s22 = sadd.s32 1, %s1047_s17 }
   0x5   : > { %s115_s23 = ssub.s32 %s1051_s18, %s1106_s21  ;;  %p128_p0 = scmp.ne.s32.totalorder %s1047_s17, %s1043_s16 }
   0x6   : > { %p116_p1 = scmp.eq.s32.totalorder %s115_s23, 0  ;;  %p129_p2 = scmp.eq.s32.totalorder %s1102_s19, 1 }
   0x7   : > { %p134_p3 = scmp.ne.s32.totalorder %s1043_s16, %s1039_s15  ;;  %p135_p4 = scmp.eq.s32.totalorder %s741_s20, 1 }
   0x8   : > { %s1117_s24 = scalar_select %p116_p1, %s1047_s17, %s118_s22  }
   0x9   : > { %p1119_p5 = por %p129_p2, %p128_p0  ;;  %p1123_p6 = por %p135_p4, %p134_p3 }
   0xa   : > { %p744_p7 = scmp.ge.s32.totalorder %s1051_s18, 1  ;;  %p175_p8 = scmp.lt.s32.totalorder %s1051_s18, 3 }
   0xc   : > { %p176_p9 = pnand %p744_p7, %p175_p8 }
   0xd   : > { %v971_v0 = vld [vmem:[%s1299_s2 + $0x30] sm:$0xff] (!%p176_p9)   ;;  %p206_p10 = scmp.lt.s32.totalorder (!%p176_p9), %s1102_s19, 1  ;;  %v972_v1 = vld [vmem:[%s1299_s2] sm:$0xff] (!%p176_p9)   ;;  %v973_v2 = vld [vmem:[%s1299_s2 + $0x38] sm:$0xff] (!%p176_p9)   ;;  %vm296_vm0 = vcmask (!%p176_p9), 785408   ;;  %s203_s11 = sand.u32 (!%p176_p9), 1, %s1043_s16  }
   0xe   : > { %179 = sbr.rel (%p176_p9) target bundleno = 298 (0x12a), region = 36  ;;  %841 = vmatprep.subr.bf16.mxu1 (!%p176_p9), %v971_v0  ;;  %861 = vmatprep.subr.bf16.mxu0 (!%p176_p9), %v972_v1  ;;  %v974_v3 = vld [vmem:[%s1299_s2 + $0x8] sm:$0xff] (!%p176_p9)   ;;  %v975_v4 = vld [vmem:[%s1299_s2 + $0x40] sm:$0xff] (!%p176_p9)   ;;  %v976_v5 = vld [vmem:[%s1299_s2 + $0x10] sm:$0xff] (!%p176_p9)   ;;  %s1227_s23 = sshll.u32 (!%p176_p9), %s203_s11, 6  ;;  %vm644_vm1 = vcmask (!%p176_p9), 261120  }
   0xf   : > { %842 = vmatpush3.bf16.msra.mxu1 (!%p176_p9), %v971_v0  ;;  %862 = vmatpush3.bf16.msra.mxu0 (!%p176_p9), %v972_v1  ;;  %v977_v6 = vld [vmem:[%s1299_s2 + $0x48] sm:$0xff] (!%p176_p9)   ;;  %v978_v7 = vld [vmem:[%s1299_s2 + $0x18] sm:$0xff] (!%p176_p9)   ;;  %v979_v8 = vld [vmem:[%s1299_s2 + $0x50] sm:$0xff] (!%p176_p9)   ;;  %s205_s27 = scalar_lea.vmem (!%p176_p9), [#allocation2], %s1227_s23  ;;  %s1256_s6 = scalar_lea.sflag (!%p176_p9), [#allocation3], %s203_s11 }
  0x10   : > { %843 = vmatprep.subr.bf16.mxu1 (!%p176_p9), %v973_v2  ;;  %863 = vmatprep.subr.bf16.mxu0 (!%p176_p9), %v974_v3  ;;  %v980_v11 = vld [vmem:[%s1299_s2 + $0x20] sm:$0xff] (!%p176_p9)   ;;  %v981_v15 = vld [vmem:[%s1299_s2 + $0x58] sm:$0xff] (!%p176_p9)   ;;  %v982_v16 = vld [vmem:[%s1299_s2 + $0x28] sm:$0xff] (!%p176_p9)   ;;  %s667_s28 = sshll.u32 (!%p176_p9), %s205_s27, 4  ;;  %s1053_s9 = smov (!%p176_p9), [#allocation2]   ;;  %s1247_s28 = int_to_ptr.vmem [resolvable:$true] %s667_s28 }
  0x11   : > { %v983_v19 = vld [vmem:[%s1299_s2 + $0x60] sm:$0xff] (!%p176_p9)   ;;  %v984_v24 = vld [vmem:[%s1299_s2 + $0x68] sm:$0xff] (!%p176_p9)   ;;  %v985_v29 = vld [vmem:[%s1299_s2 + $0x70] sm:$0xff] (!%p176_p9)   ;;  %s989_s8 = scalar_lea.vmem (!%p176_p9), %s1247_s28, 1024  ;;  %s993_s10 = sshll.u32 (!%p176_p9), %s1053_s9, 4  ;;  %s994_s10 = int_to_ptr.vmem [resolvable:$false] %s993_s10 }
  0x12   : > { %v986_v32 = vld [vmem:[%s1299_s2 + $0x78] sm:$0xff] (!%p176_p9)   ;;  %v987_v33 = vld [vmem:[%s1299_s2 + $0x80] sm:$0xff] (!%p176_p9)   ;;  %v988_v34 = vld [vmem:[%s1299_s2 + $0x88] sm:$0xff] (!%p176_p9)   ;;  %p990_p11 = scmp.ne.s32.totalorder (!%p176_p9), %s1247_s28, %s989_s8  ;;  %p996_p0 = scmp.lt.s32.totalorder (!%p176_p9), %s1247_s28, %s994_s10 }
  0x13   : > { %844 = vmatpush3.bf16.msra.mxu1 (!%p176_p9), %v973_v2  ;;  %864 = vmatpush3.bf16.msra.mxu0 (!%p176_p9), %v974_v3  ;;  %v803_v53 = vld [vmem:[%s1300_s3] ss:$0 sm:$0xff] (!%p176_p9) }
  0x14   : > { %845 = vmatprep.subr.bf16.mxu1 (!%p176_p9), %v975_v4  ;;  %865 = vmatprep.subr.bf16.mxu0 (!%p176_p9), %v976_v5  ;;  %p991_p12 = pnand (!%p176_p9), %p990_p11, %p1119_p5 }
  0x15   : > { %s1140_s7 = scalar_select %p206_p10, %s1102_s19, 1 }
  0x16   : > { %p992_p13 = pneg %p991_p12 }
  0x17   : > { %s929_s14 = smul.u32 80, %s1140_s7  ;;  %846 = vmatpush3.bf16.msra.mxu1 %v975_v4  ;;  %866 = vmatpush3.bf16.msra.mxu0 %v976_v5 }
  0x18   : > { %847 = vmatprep.subr.bf16.mxu1 %v977_v6  ;;  %867 = vmatprep.subr.bf16.mxu0 %v978_v7 }
  0x19   : > { %s1161_s30 = scalar_lea.vmem %s1297_s0, %s929_s14 }
  0x1a   : > { %v218_v9 = vld [vmem:[%s1161_s30 + $0x8] sm:$0xff]  ;;  %v219_v10 = vld [vmem:[%s1161_s30 + $0x10] sm:$0xff]  ;;  %v217_v13 = vld [vmem:[%s1161_s30] sm:$0xff] }
  0x1b   : > { %v243_v12 = vpack.c.bf16 %v219_v10, %v218_v9  ;;  %v227_v14 = vpack.c.bf16 %v218_v9, %v217_v13  ;;  %848 = vmatpush3.bf16.msra.mxu1 %v977_v6  ;;  %868 = vmatpush3.bf16.msra.mxu0 %v978_v7  ;;  %v220_v17 = vld [vmem:[%s1161_s30 + $0x18] sm:$0xff]  ;;  %v221_v18 = vld [vmem:[%s1161_s30 + $0x20] sm:$0xff]  ;;  %v222_v21 = vld [vmem:[%s1161_s30 + $0x28] sm:$0xff] }
  0x1c   : > { %849 = vmatprep.subr.bf16.mxu1 %v979_v8  ;;  %869 = vmatprep.subr.bf16.mxu0 %v980_v11  ;;  %v244_v20 = vpack.c.bf16 %v221_v18, %v220_v17  ;;  %v223_v22 = vld [vmem:[%s1161_s30 + $0x30] sm:$0xff]  ;;  %v228_v23 = vpack.c.bf16 %v220_v17, %v219_v10  ;;  %v229_v26 = vpack.c.bf16 %v222_v21, %v221_v18  ;;  %v224_v27 = vld [vmem:[%s1161_s30 + $0x38] sm:$0xff]  ;;  %v225_v28 = vld [vmem:[%s1161_s30 + $0x40] sm:$0xff] }
  0x1d   : > { %853 = vmatprep.mubr.msk.bf16.mxu1 %vm296_vm0, %v243_v12  ;;  %873 = vmatprep.mubr.msk.bf16.mxu0 %vm296_vm0, %v227_v14  ;;  %v245_v25 = vpack.c.bf16 %v223_v22, %v222_v21  ;;  %v246_v30 = vpack.c.bf16 %v225_v28, %v224_v27  ;;  %v230_v31 = vpack.c.bf16 %v224_v27, %v223_v22  ;;  %v226_v35 = vld [vmem:[%s1161_s30 + $0x48] sm:$0xff]  ;;  %s809_s30 = sshll.u32 %s1140_s7, 6  ;;  %s810_s7 = sshll.u32 %s1102_s19, 10 }
  0x1e   : > { %v487_v36 = vpack.c.bf16 %v226_v35, %v225_v28  ;;  %s1220_s14 = scalar_lea.vmem %s1298_s1, %s809_s30  ;;  %s1245_s5 = scalar_lea.hbm %s1301_s4, %s810_s7 }
  0x1f   : > { %850 = vmatpush3.bf16.msra.mxu1 %v979_v8  ;;  %870 = vmatpush3.bf16.msra.mxu0 %v980_v11  ;;  %v634_v59 = vld [vmem:[%s1220_s14 + $0x30] sm:$0xff]  ;;  %v632_v2 = vld [vmem:[%s1220_s14 + $0x20] sm:$0xff]  ;;  %v635_v10 = vld [vmem:[%s1220_s14 + $0x38] sm:$0xff]  ;;  %s995_s30 = scalar_lea.vmem %s994_s10, 2048 }
  0x20   : > { %851 = vmatprep.subr.bf16.mxu1 %v981_v15  ;;  %871 = vmatprep.subr.bf16.mxu0 %v982_v16  ;;  %v630_v63 = vld [vmem:[%s1220_s14 + $0x10] sm:$0xff]  ;;  %v628_v7 = vld [vmem:[%s1220_s14] sm:$0xff]  ;;  %v633_v18 = vld [vmem:[%s1220_s14 + $0x28] sm:$0xff]  ;;  %p997_p1 = scmp.lt.s32.totalorder %s995_s30, %s989_s8 }
  0x21   : > { %v629_v22 = vld [vmem:[%s1220_s14 + $0x8] sm:$0xff] }
  0x22   : > { %p998_p2 = por %p997_p1, %p996_p0 }
  0x23   : > { %852 = vmatpush3.bf16.msra.mxu1 %v981_v15  ;;  %872 = vmatpush3.bf16.msra.mxu0 %v982_v16  ;;  %v631_v15 = vld [vmem:[%s1220_s14 + $0x18] sm:$0xff] }
  0x24   : > { %901 = vmatprep.subr.bf16.mxu1 %v983_v19  ;;  %881 = vmatprep.subr.bf16.mxu0 %v983_v19  ;;  %p999_p3 = pnand %p998_p2, %p992_p13 }
  0x26   : > { %854 = vmatmul.mubr.msk.bf16.vlgmr.msra.gmra.mrb[0].mxu1 %vm296_vm0, %v244_v20  ;;  %874 = vmatmul.mubr.msk.bf16.vlgmr.msra.gmra.mrb[0].mxu0 %vm296_vm0, %v228_v23 }
  0x27   : > { %907 = vmatpush3.bf16.msra.mxu1 %v983_v19  ;;  %882 = vmatpush3.bf16.msra.mxu0 %v983_v19 }
  0x28   : > { %902 = vmatprep.subr.bf16.mxu1 %v984_v24  ;;  %883 = vmatprep.subr.bf16.mxu0 %v984_v24 }
  0x29   : > { %857 = vmatprep.mubr.msk.bf16.mxu1 %vm296_vm0, %v245_v25  ;;  %877 = vmatprep.mubr.msk.bf16.mxu0 %vm296_vm0, %v229_v26 }
  0x2b   : > { %908 = vmatpush3.bf16.msra.mxu1 %v984_v24  ;;  %884 = vmatpush3.bf16.msra.mxu0 %v984_v24 }
  0x2c   : > { %903 = vmatprep.subr.bf16.mxu1 %v985_v29  ;;  %885 = vmatprep.subr.bf16.mxu0 %v985_v29 }
  0x2e   : > { %858 = vmatmul.mubr.msk.bf16.gmra.mrb[4].mxu1 %vm296_vm0, %v246_v30  ;;  %878 = vmatmul.mubr.msk.bf16.gmra.mrb[4].mxu0 %vm296_vm0, %v230_v31 }
  0x2f   : > { %909 = vmatpush3.bf16.msra.mxu1 %v985_v29  ;;  %886 = vmatpush3.bf16.msra.mxu0 %v985_v29 }
  0x30   : > { %904 = vmatprep.subr.bf16.mxu1 %v986_v32  ;;  %887 = vmatprep.subr.bf16.mxu0 %v986_v32 }
  0x31   : > { %893 = vmatprep.mubr.msk.bf16.mxu0 %vm296_vm0, %v228_v23  ;;  %897 = vmatprep.mubr.msk.bf16.mxu1 %vm296_vm0, %v230_v31 }
  0x33   : > { %910 = vmatpush3.bf16.msra.mxu1 %v986_v32  ;;  %888 = vmatpush3.bf16.msra.mxu0 %v986_v32 }
  0x34   : > { %905 = vmatprep.subr.bf16.mxu1 %v987_v33  ;;  %889 = vmatprep.subr.bf16.mxu0 %v987_v33 }
  0x37   : > { %911 = vmatpush3.bf16.msra.mxu1 %v987_v33  ;;  %890 = vmatpush3.bf16.msra.mxu0 %v987_v33 }
  0x38   : > { %906 = vmatprep.subr.bf16.mxu1 %v988_v34  ;;  %891 = vmatprep.subr.bf16.mxu0 %v988_v34 }
  0x3b   : > { %912 = vmatpush3.bf16.msra.mxu1 %v988_v34  ;;  %892 = vmatpush3.bf16.msra.mxu0 %v988_v34 }
  0x3e   : > { %898 = vmatmul.mubr.msk.bf16.vlgmr.msra.gmra.mrb[8].mxu1 %vm296_vm0, %v487_v36  ;;  %894 = vmatmul.mubr.msk.bf16.vlgmr.msra.gmra.mrb[0].mxu0 %vm296_vm0, %v229_v26 }
  0xf9   : > { %v855_v37 = vpop.f32.mrb[0].mxu1 }
  0xfa   : > { %v343_v38 = vpop.f32.mrb[1].mxu1 }
  0xfb   : > { %v856_v39 = vpop.f32.mrb[2].mxu1 }
  0xfc   : > { %v346_v40 = vpop.f32.mrb[3].mxu1 }
 0x101   : > { %v859_v41 = vpop.f32.mrb[4].mxu1  ;;  %v879_v42 = vpop.f32.mrb[4].mxu0 }
 0x102   : > { %v359_v43 = vpop.f32.mrb[5].mxu1  ;;  %v481_v44 = vadd.f32 %v879_v42, %v859_v41  ;;  %v472_v45 = vpop.f32.mrb[5].mxu0 }
 0x103   : > { %v860_v46 = vpop.f32.mrb[6].mxu1  ;;  %v473_v47 = vadd.f32 %v472_v45, %v359_v43  ;;  %v880_v48 = vpop.f32.mrb[6].mxu0 }
 0x104   : > { %v362_v49 = vpop.f32.mrb[7].mxu1  ;;  %v484_v50 = vadd.f32 %v880_v48, %v860_v46  ;;  %v475_v51 = vpop.f32.mrb[7].mxu0 }
 0x105   : > { %v476_v52 = vadd.f32 %v475_v51, %v362_v49 }
 0x111   : > { %v899_v54 = vpop.f32.mrb[8].mxu1  ;;  %v895_v55 = vpop.f32.mrb[0].mxu0 }
 0x112   : > { %v611_v56 = vadd.f32 %v899_v54, %v481_v44  ;;  %v590_v57 = vpop.f32.mrb[9].mxu1  ;;  %v913_v58 = vadd.f32 %v895_v55, %v855_v37  ;;  %v574_v60 = vpop.f32.mrb[1].mxu0 }
 0x113   : > { %v609_v61 = vadd.f32 %v590_v57, %v473_v47  ;;  %v900_v62 = vpop.f32.mrb[10].mxu1  ;;  %v914_v1 = vadd.f32 %v574_v60, %v343_v38  ;;  %v896_v3 = vpop.f32.mrb[2].mxu0 }
 0x114   : > { %v626_v0 = vadd.f32 %v803_v53, %v611_v56  ;;  %v612_v4 = vadd.f32 %v900_v62, %v484_v50  ;;  %v593_v5 = vpop.f32.mrb[11].mxu1  ;;  %v622_v6 = vadd.f32 %v913_v58, %v803_v53  ;;  %v915_v9 = vadd.f32 %v896_v3, %v856_v39  ;;  %v577_v11 = vpop.f32.mrb[3].mxu0 }
 0x115   : > { %v624_v8 = vadd.f32 %v803_v53, %v609_v61  ;;  %v610_v12 = vadd.f32 %v593_v5, %v476_v52  ;;  %v620_v14 = vadd.f32 %v914_v1, %v803_v53  ;;  %v916_v17 = vadd.f32 %v577_v11, %v346_v40 }
 0x116   : > { %v642_v13 = vadd.f32 %v634_v59, %v626_v0  ;;  %v627_v16 = vadd.f32 %v803_v53, %v612_v4  ;;  %v638_v19 = vadd.f32 %v630_v63, %v622_v6  ;;  %v623_v21 = vadd.f32 %v915_v9, %v803_v53 }
 0x117   : > { %v640_v20 = vadd.f32 %v632_v2, %v624_v8  ;;  %v625_v23 = vadd.f32 %v803_v53, %v610_v12  ;;  %v636_v24 = vadd.f32 %v628_v7, %v620_v14  ;;  %v621_v26 = vadd.f32 %v916_v17, %v803_v53 }
 0x118   : > { %651 = vst.msk [vmem:[%s205_s27 + $0x30] sm:$0xff] %vm644_vm1, %v642_v13  ;;  %v643_v25 = vadd.f32 %v635_v10, %v627_v16  ;;  %647 = vst.msk [vmem:[%s205_s27 + $0x10] sm:$0xff] %vm644_vm1, %v638_v19  ;;  %v639_v27 = vadd.f32 %v631_v15, %v623_v21 }
 0x119   : > { %649 = vst.msk [vmem:[%s205_s27 + $0x20] sm:$0xff] %vm644_vm1, %v640_v20  ;;  %v641_v28 = vadd.f32 %v633_v18, %v625_v23  ;;  %645 = vst.msk [vmem:[%s205_s27] sm:$0xff] %vm644_vm1, %v636_v24  ;;  %v637_v29 = vadd.f32 %v629_v22, %v621_v26 }
 0x11a   : > { %652 = vst.msk [vmem:[%s205_s27 + $0x38] sm:$0xff] %vm644_vm1, %v643_v25  ;;  %648 = vst.msk [vmem:[%s205_s27 + $0x18] sm:$0xff] %vm644_vm1, %v639_v27 }
 0x11b   : > { %650 = vst.msk [vmem:[%s205_s27 + $0x28] sm:$0xff] %vm644_vm1, %v641_v28  ;;  %646 = vst.msk [vmem:[%s205_s27 + $0x8] sm:$0xff] %vm644_vm1, %v637_v29 }
 0x11c   : > { %1002 = shalt.err (!%p999_p3)
}
 0x11d   : > { %s1003_s11 = scalar_lea.hbm %s1245_s5, 1024  ;;  %s1007_s14 = scalar_lea.hbm %s1301_s4, 2048 }
 0x11e   : > { %p1004_p4 = scmp.ne.s32.totalorder %s1245_s5, %s1003_s11  ;;  %p1008_p9 = scmp.lt.u32.totalorder %s1245_s5, %s1301_s4 }
 0x11f   : > { %p1009_p10 = scmp.lt.u32.totalorder %s1007_s14, %s1003_s11  ;;  %p1011_p12 = scmp.lt.u32.totalorder %s1003_s11, %s1245_s5 }
 0x120   : > { %p1005_p7 = pnand %p1004_p4, %p1119_p5 }
 0x121   : > { %p1010_p11 = por %p1009_p10, %p1008_p9 }
 0x122   : > { %p1006_p8 = pneg %p1005_p7 }
 0x123   : > { %p1012_p13 = por %p1011_p12, %p1010_p11 }
 0x125   : > { %p1013_p0 = pnand %p1012_p13, %p1006_p8 }
 0x127   : > { %1016 = shalt.err (!%p1013_p0)
}
 0x128   : > { %s1054_s23 = smov 128   ;;  %s1055_s7 = smov 8  }
 0x129   : > { %930 = dma.vmem_to_hbm [thread:$0]  (%p1119_p5), %s1247_s28, 1024, %s1245_s5, %s1256_s6, %s1054_s23, %s1054_s23, %s1055_s7  }
 0x12a PF: > { %p936_p1 = scmp.ge.s32.totalorder %s1051_s18, 2  ;;  %s682_s27 = sand.u32 1, %s1039_s15  }
 0x12b   : > { %s683_s19 = scalar_lea.sflag [#allocation3], %s682_s27 }
 0x12c   : > { %p933_p2 = pnand %p936_p1, %p1123_p6 }
 0x12e   : > { %1034 = dma.done.wait (!%p933_p2), %s683_s19, 1024  }
 0x12f   : > { %1036 = vsyncadd (!%p933_p2), %s683_s19, 4294966272  ;;  %p14_p3 = scmp.ge.s32.totalorder %s1106_s21, 4   ;;  %s1304_s15 = smov %s1043_s16 }
 0x130   : > { %s1305_s16 = smov %s1047_s17  ;;  %s1306_s17 = smov %s1117_s24 }
 0x131   : > { %s1307_s18 = smov %s1106_s21  ;;  %16 = sbr.rel (!%p14_p3) target bundleno = 3 (0x3), region = 76 }
 0x138   :  { %688 = vsyncpa [#allocation3], 1 }
 0x139   :  { %690 = vsyncpa [#allocation3 + $0x1], 1 }

// kernel: swin_layers_forward.14
= control target key start
LH: loop header
LB: loop body
LE: loop exit
PB: predicated region body
PF: predicated region fallthrough
CT: control target
= control target key end

     0   :  { %s969_s15 = smov 0   ;;  %s1102_s0 = inlined_call_operand.vmem [shape: f32[2,80,96], index: 0, kind: input, shape index: {}]   ;;  %s1103_s1 = inlined_call_operand.vmem [shape: f32[2,64,32], index: 1, kind: input, shape index: {}]   ;;  %s1104_s2 = inlined_call_operand.vmem [shape: bf16[3,96,32], index: 2, kind: input, shape index: {}]   ;;  %s1105_s3 = inlined_call_operand.vmem [shape: f32[1,32], index: 3, kind: input, shape index: {}]   ;;  %s1106_s4 = inlined_call_operand.vmem [shape: f32[2,64,32], index: 4, kind: output, shape index: {}]  }
   0x1 LB: > { %s722_s16 = sadd.s32 4294967295, %s942_s15   ;;  %p726_p0 = scmp.ge.s32.totalorder %s942_s15, 1  ;;  %s942_s15 = sphi %s969_s15, %s14_s15  }
   0x2   : > { %p172_p1 = scmp.lt.s32.totalorder %s942_s15, 3 }
   0x4   : > { %p173_p2 = pnand %p726_p0, %p172_p1 }
   0x5   : > { %v918_v0 = vld [vmem:[%s1104_s2 + $0x30] sm:$0xff] (!%p173_p2)   ;;  %p203_p3 = scmp.lt.s32.totalorder (!%p173_p2), %s722_s16, 1  ;;  %v919_v1 = vld [vmem:[%s1104_s2] sm:$0xff] (!%p173_p2)   ;;  %v920_v2 = vld [vmem:[%s1104_s2 + $0x38] sm:$0xff] (!%p173_p2)   ;;  %vm298_vm0 = vcmask (!%p173_p2), 785408   ;;  %vm646_vm1 = vcmask (!%p173_p2), 261120  }
   0x6   : > { %176 = sbr.rel (%p173_p2) target bundleno = 276 (0x114), region = 36  ;;  %821 = vmatprep.subr.bf16.mxu1 (!%p173_p2), %v918_v0  ;;  %841 = vmatprep.subr.bf16.mxu0 (!%p173_p2), %v919_v1  ;;  %v921_v3 = vld [vmem:[%s1104_s2 + $0x8] sm:$0xff] (!%p173_p2)   ;;  %v922_v4 = vld [vmem:[%s1104_s2 + $0x40] sm:$0xff] (!%p173_p2)   ;;  %v923_v5 = vld [vmem:[%s1104_s2 + $0x10] sm:$0xff] (!%p173_p2)  }
   0x7   : > { %822 = vmatpush3.bf16.msra.mxu1 (!%p173_p2), %v918_v0  ;;  %842 = vmatpush3.bf16.msra.mxu0 (!%p173_p2), %v919_v1  ;;  %v924_v6 = vld [vmem:[%s1104_s2 + $0x48] sm:$0xff] (!%p173_p2)   ;;  %v925_v7 = vld [vmem:[%s1104_s2 + $0x18] sm:$0xff] (!%p173_p2)   ;;  %v926_v8 = vld [vmem:[%s1104_s2 + $0x50] sm:$0xff] (!%p173_p2)  }
   0x8   : > { %823 = vmatprep.subr.bf16.mxu1 (!%p173_p2), %v920_v2  ;;  %843 = vmatprep.subr.bf16.mxu0 (!%p173_p2), %v921_v3  ;;  %v927_v11 = vld [vmem:[%s1104_s2 + $0x20] sm:$0xff] (!%p173_p2)   ;;  %v928_v15 = vld [vmem:[%s1104_s2 + $0x58] sm:$0xff] (!%p173_p2)   ;;  %v929_v16 = vld [vmem:[%s1104_s2 + $0x28] sm:$0xff] (!%p173_p2)  }
   0x9   : > { %v930_v19 = vld [vmem:[%s1104_s2 + $0x60] sm:$0xff] (!%p173_p2)   ;;  %v931_v24 = vld [vmem:[%s1104_s2 + $0x68] sm:$0xff] (!%p173_p2)   ;;  %v932_v29 = vld [vmem:[%s1104_s2 + $0x70] sm:$0xff] (!%p173_p2)  }
   0xa   : > { %v933_v32 = vld [vmem:[%s1104_s2 + $0x78] sm:$0xff] (!%p173_p2)   ;;  %v934_v33 = vld [vmem:[%s1104_s2 + $0x80] sm:$0xff] (!%p173_p2)   ;;  %v935_v34 = vld [vmem:[%s1104_s2 + $0x88] sm:$0xff] (!%p173_p2)  }
   0xb   : > { %824 = vmatpush3.bf16.msra.mxu1 (!%p173_p2), %v920_v2  ;;  %844 = vmatpush3.bf16.msra.mxu0 (!%p173_p2), %v921_v3  ;;  %v786_v53 = vld [vmem:[%s1105_s3] ss:$0 sm:$0xff] (!%p173_p2) }
   0xc   : > { %825 = vmatprep.subr.bf16.mxu1 (!%p173_p2), %v922_v4  ;;  %845 = vmatprep.subr.bf16.mxu0 (!%p173_p2), %v923_v5 }
   0xd   : > { %s1108_s16 = smov (!%p203_p3, %s722_s16), 1 }
   0xe   : > { %s909_s29 = smul.u32 80, %s1108_s16  ;;  %s789_s7 = sshll.u32 %s1108_s16, 6 }
   0xf   : > { %826 = vmatpush3.bf16.msra.mxu1 %v922_v4  ;;  %846 = vmatpush3.bf16.msra.mxu0 %v923_v5  ;;  %s1076_s14 = scalar_lea.vmem %s1106_s4, %s789_s7 }
  0x10   : > { %s1007_s10 = scalar_lea.vmem %s1102_s0, %s909_s29  ;;  %827 = vmatprep.subr.bf16.mxu1 %v924_v6  ;;  %847 = vmatprep.subr.bf16.mxu0 %v925_v7 }
  0x11   : > { %v220_v9 = vld [vmem:[%s1007_s10 + $0x8] sm:$0xff]  ;;  %v221_v10 = vld [vmem:[%s1007_s10 + $0x10] sm:$0xff]  ;;  %v219_v13 = vld [vmem:[%s1007_s10] sm:$0xff] }
  0x12   : > { %v245_v12 = vpack.c.bf16 %v221_v10, %v220_v9  ;;  %v229_v14 = vpack.c.bf16 %v220_v9, %v219_v13  ;;  %v222_v17 = vld [vmem:[%s1007_s10 + $0x18] sm:$0xff]  ;;  %v223_v18 = vld [vmem:[%s1007_s10 + $0x20] sm:$0xff]  ;;  %v224_v21 = vld [vmem:[%s1007_s10 + $0x28] sm:$0xff] }
  0x13   : > { %828 = vmatpush3.bf16.msra.mxu1 %v924_v6  ;;  %848 = vmatpush3.bf16.msra.mxu0 %v925_v7  ;;  %v246_v20 = vpack.c.bf16 %v223_v18, %v222_v17  ;;  %v225_v22 = vld [vmem:[%s1007_s10 + $0x30] sm:$0xff]  ;;  %v230_v23 = vpack.c.bf16 %v222_v17, %v221_v10  ;;  %v231_v26 = vpack.c.bf16 %v224_v21, %v223_v18  ;;  %v226_v27 = vld [vmem:[%s1007_s10 + $0x38] sm:$0xff]  ;;  %v227_v28 = vld [vmem:[%s1007_s10 + $0x40] sm:$0xff] }
  0x14   : > { %833 = vmatprep.mubr.msk.bf16.mxu1 %vm298_vm0, %v245_v12  ;;  %829 = vmatprep.subr.bf16.mxu1 %v926_v8  ;;  %v247_v25 = vpack.c.bf16 %v225_v22, %v224_v21  ;;  %v248_v30 = vpack.c.bf16 %v227_v28, %v226_v27  ;;  %v232_v31 = vpack.c.bf16 %v226_v27, %v225_v22  ;;  %v228_v35 = vld [vmem:[%s1007_s10 + $0x48] sm:$0xff]  ;;  %s1065_s10 = scalar_lea.vmem %s1103_s1, %s789_s7 }
  0x15   : > { %849 = vmatprep.subr.bf16.mxu0 %v927_v11  ;;  %853 = vmatprep.mubr.msk.bf16.mxu0 %vm298_vm0, %v229_v14  ;;  %v489_v36 = vpack.c.bf16 %v228_v35, %v227_v28  ;;  %v636_v59 = vld [vmem:[%s1065_s10 + $0x30] sm:$0xff]  ;;  %v634_v2 = vld [vmem:[%s1065_s10 + $0x20] sm:$0xff]  ;;  %v637_v10 = vld [vmem:[%s1065_s10 + $0x38] sm:$0xff] }
  0x16   : > { %v632_v63 = vld [vmem:[%s1065_s10 + $0x10] sm:$0xff]  ;;  %v630_v7 = vld [vmem:[%s1065_s10] sm:$0xff]  ;;  %v635_v18 = vld [vmem:[%s1065_s10 + $0x28] sm:$0xff] }
  0x17   : > { %830 = vmatpush3.bf16.msra.mxu1 %v926_v8  ;;  %850 = vmatpush3.bf16.msra.mxu0 %v927_v11  ;;  %v631_v22 = vld [vmem:[%s1065_s10 + $0x8] sm:$0xff] }
  0x18   : > { %831 = vmatprep.subr.bf16.mxu1 %v928_v15  ;;  %851 = vmatprep.subr.bf16.mxu0 %v929_v16 }
  0x1b   : > { %832 = vmatpush3.bf16.msra.mxu1 %v928_v15  ;;  %852 = vmatpush3.bf16.msra.mxu0 %v929_v16  ;;  %v633_v15 = vld [vmem:[%s1065_s10 + $0x18] sm:$0xff] }
  0x1c   : > { %881 = vmatprep.subr.bf16.mxu1 %v930_v19  ;;  %861 = vmatprep.subr.bf16.mxu0 %v930_v19 }
  0x1e   : > { %834 = vmatmul.mubr.msk.bf16.vlgmr.msra.gmra.mrb[0].mxu1 %vm298_vm0, %v246_v20  ;;  %854 = vmatmul.mubr.msk.bf16.vlgmr.msra.gmra.mrb[0].mxu0 %vm298_vm0, %v230_v23 }
  0x1f   : > { %887 = vmatpush3.bf16.msra.mxu1 %v930_v19  ;;  %862 = vmatpush3.bf16.msra.mxu0 %v930_v19 }
  0x20   : > { %882 = vmatprep.subr.bf16.mxu1 %v931_v24  ;;  %863 = vmatprep.subr.bf16.mxu0 %v931_v24 }
  0x21   : > { %837 = vmatprep.mubr.msk.bf16.mxu1 %vm298_vm0, %v247_v25  ;;  %857 = vmatprep.mubr.msk.bf16.mxu0 %vm298_vm0, %v231_v26 }
  0x23   : > { %888 = vmatpush3.bf16.msra.mxu1 %v931_v24  ;;  %864 = vmatpush3.bf16.msra.mxu0 %v931_v24 }
  0x24   : > { %883 = vmatprep.subr.bf16.mxu1 %v932_v29  ;;  %865 = vmatprep.subr.bf16.mxu0 %v932_v29 }
  0x26   : > { %838 = vmatmul.mubr.msk.bf16.gmra.mrb[4].mxu1 %vm298_vm0, %v248_v30  ;;  %858 = vmatmul.mubr.msk.bf16.gmra.mrb[4].mxu0 %vm298_vm0, %v232_v31 }
  0x27   : > { %889 = vmatpush3.bf16.msra.mxu1 %v932_v29  ;;  %866 = vmatpush3.bf16.msra.mxu0 %v932_v29 }
  0x28   : > { %884 = vmatprep.subr.bf16.mxu1 %v933_v32  ;;  %867 = vmatprep.subr.bf16.mxu0 %v933_v32 }
  0x29   : > { %873 = vmatprep.mubr.msk.bf16.mxu0 %vm298_vm0, %v230_v23  ;;  %877 = vmatprep.mubr.msk.bf16.mxu1 %vm298_vm0, %v232_v31 }
  0x2b   : > { %890 = vmatpush3.bf16.msra.mxu1 %v933_v32  ;;  %868 = vmatpush3.bf16.msra.mxu0 %v933_v32 }
  0x2c   : > { %885 = vmatprep.subr.bf16.mxu1 %v934_v33  ;;  %869 = vmatprep.subr.bf16.mxu0 %v934_v33 }
  0x2f   : > { %891 = vmatpush3.bf16.msra.mxu1 %v934_v33  ;;  %870 = vmatpush3.bf16.msra.mxu0 %v934_v33 }
  0x30   : > { %886 = vmatprep.subr.bf16.mxu1 %v935_v34  ;;  %871 = vmatprep.subr.bf16.mxu0 %v935_v34 }
  0x33   : > { %892 = vmatpush3.bf16.msra.mxu1 %v935_v34  ;;  %872 = vmatpush3.bf16.msra.mxu0 %v935_v34 }
  0x36   : > { %878 = vmatmul.mubr.msk.bf16.vlgmr.msra.gmra.mrb[8].mxu1 %vm298_vm0, %v489_v36  ;;  %874 = vmatmul.mubr.msk.bf16.vlgmr.msra.gmra.mrb[0].mxu0 %vm298_vm0, %v231_v26 }
  0xf1   : > { %v835_v37 = vpop.f32.mrb[0].mxu1 }
  0xf2   : > { %v345_v38 = vpop.f32.mrb[1].mxu1 }
  0xf3   : > { %v836_v39 = vpop.f32.mrb[2].mxu1 }
  0xf4   : > { %v348_v40 = vpop.f32.mrb[3].mxu1 }
  0xf9   : > { %v839_v41 = vpop.f32.mrb[4].mxu1  ;;  %v859_v42 = vpop.f32.mrb[4].mxu0 }
  0xfa   : > { %v361_v43 = vpop.f32.mrb[5].mxu1  ;;  %v483_v44 = vadd.f32 %v859_v42, %v839_v41  ;;  %v474_v45 = vpop.f32.mrb[5].mxu0 }
  0xfb   : > { %v840_v46 = vpop.f32.mrb[6].mxu1  ;;  %v475_v47 = vadd.f32 %v474_v45, %v361_v43  ;;  %v860_v48 = vpop.f32.mrb[6].mxu0 }
  0xfc   : > { %v364_v49 = vpop.f32.mrb[7].mxu1  ;;  %v486_v50 = vadd.f32 %v860_v48, %v840_v46  ;;  %v477_v51 = vpop.f32.mrb[7].mxu0 }
  0xfd   : > { %v478_v52 = vadd.f32 %v477_v51, %v364_v49 }
 0x109   : > { %v879_v54 = vpop.f32.mrb[8].mxu1  ;;  %v875_v55 = vpop.f32.mrb[0].mxu0 }
 0x10a   : > { %v613_v56 = vadd.f32 %v879_v54, %v483_v44  ;;  %v592_v57 = vpop.f32.mrb[9].mxu1  ;;  %v893_v58 = vadd.f32 %v875_v55, %v835_v37  ;;  %v576_v60 = vpop.f32.mrb[1].mxu0 }
 0x10b   : > { %v611_v61 = vadd.f32 %v592_v57, %v475_v47  ;;  %v880_v62 = vpop.f32.mrb[10].mxu1  ;;  %v894_v1 = vadd.f32 %v576_v60, %v345_v38  ;;  %v876_v3 = vpop.f32.mrb[2].mxu0 }
 0x10c   : > { %v628_v0 = vadd.f32 %v786_v53, %v613_v56  ;;  %v614_v4 = vadd.f32 %v880_v62, %v486_v50  ;;  %v595_v5 = vpop.f32.mrb[11].mxu1  ;;  %v624_v6 = vadd.f32 %v893_v58, %v786_v53  ;;  %v895_v9 = vadd.f32 %v876_v3, %v836_v39  ;;  %v579_v11 = vpop.f32.mrb[3].mxu0 }
 0x10d   : > { %v626_v8 = vadd.f32 %v786_v53, %v611_v61  ;;  %v612_v12 = vadd.f32 %v595_v5, %v478_v52  ;;  %v622_v14 = vadd.f32 %v894_v1, %v786_v53  ;;  %v896_v17 = vadd.f32 %v579_v11, %v348_v40 }
 0x10e   : > { %v644_v13 = vadd.f32 %v636_v59, %v628_v0  ;;  %v629_v16 = vadd.f32 %v786_v53, %v614_v4  ;;  %v640_v19 = vadd.f32 %v632_v63, %v624_v6  ;;  %v625_v21 = vadd.f32 %v895_v9, %v786_v53 }
 0x10f   : > { %v642_v20 = vadd.f32 %v634_v2, %v626_v8  ;;  %v627_v23 = vadd.f32 %v786_v53, %v612_v12  ;;  %v638_v24 = vadd.f32 %v630_v7, %v622_v14  ;;  %v623_v26 = vadd.f32 %v896_v17, %v786_v53 }
 0x110   : > { %653 = vst.msk [vmem:[%s1076_s14 + $0x30] sm:$0xff] %vm646_vm1, %v644_v13  ;;  %v645_v25 = vadd.f32 %v637_v10, %v629_v16  ;;  %649 = vst.msk [vmem:[%s1076_s14 + $0x10] sm:$0xff] %vm646_vm1, %v640_v19  ;;  %v641_v27 = vadd.f32 %v633_v15, %v625_v21 }
 0x111   : > { %651 = vst.msk [vmem:[%s1076_s14 + $0x20] sm:$0xff] %vm646_vm1, %v642_v20  ;;  %v643_v28 = vadd.f32 %v635_v18, %v627_v23  ;;  %647 = vst.msk [vmem:[%s1076_s14] sm:$0xff] %vm646_vm1, %v638_v24  ;;  %v639_v29 = vadd.f32 %v631_v22, %v623_v26 }
 0x112   : > { %654 = vst.msk [vmem:[%s1076_s14 + $0x38] sm:$0xff] %vm646_vm1, %v645_v25  ;;  %650 = vst.msk [vmem:[%s1076_s14 + $0x18] sm:$0xff] %vm646_vm1, %v641_v27 }
 0x113   : > { %652 = vst.msk [vmem:[%s1076_s14 + $0x28] sm:$0xff] %vm646_vm1, %v643_v28  ;;  %648 = vst.msk [vmem:[%s1076_s14 + $0x8] sm:$0xff] %vm646_vm1, %v639_v29 }
 0x114 PF: > { %s14_s15 = sadd.s32 1, %s942_s15  }
 0x115   : > { %p11_p4 = scmp.ge.s32.totalorder %s14_s15, 4  }
 0x117   :  { %13 = sbr.rel (!%p11_p4) target bundleno = 1 (0x1), region = 71 }

// kernel: swin_layers_forward.12
= control target key start
LH: loop header
LB: loop body
LE: loop exit
PB: predicated region body
PF: predicated region fallthrough
CT: control target
= control target key end

     0   :  { %s3194_s18 = smov 0   ;;  %s3895_s0 = inlined_call_operand.vmem [shape: f32[2,64,32], index: 0, kind: input, shape index: {}]   ;;  %s3896_s1 = inlined_call_operand.vmem [shape: f32[1,32], index: 1, kind: input, shape index: {}]   ;;  %s3897_s2 = inlined_call_operand.vmem [shape: f32[1,32], index: 2, kind: input, shape index: {}]   ;;  %s3898_s3 = inlined_call_operand.vmem [shape: bf16[32,96], index: 3, kind: input, shape index: {}]   ;;  %s3899_s4 = inlined_call_operand.vmem [shape: f32[1,96], index: 4, kind: input, shape index: {}]   ;;  %s3900_s5 = inlined_call_operand.vmem [shape: bf16[2,16,32], index: 5, kind: input, shape index: {}]   ;;  %s3901_s6 = inlined_call_operand.vmem [shape: f32[1,32], index: 6, kind: input, shape index: {}]   ;;  %s3902_s7 = inlined_call_operand.vmem [shape: f32[2,16,16], index: 7, kind: input, shape index: {}]   ;;  %s3903_s8 = inlined_call_operand.vmem [shape: f32[4,16,16], index: 8, kind: input, shape index: {}]   ;;  %s3904_s9 = inlined_call_operand.vmem [shape: f32[1,32], index: 9, kind: input, shape index: {}]   ;;  %s3905_s10 = inlined_call_operand.vmem [shape: f32[1,32], index: 10, kind: input, shape index: {}]   ;;  %s3906_s11 = inlined_call_operand.vmem [shape: bf16[32,128], index: 11, kind: input, shape index: {}]   ;;  %s3907_s12 = inlined_call_operand.vmem [shape: f32[1,128], index: 12, kind: input, shape index: {}]   ;;  %s3908_s13 = inlined_call_operand.vmem [shape: bf16[128,32], index: 13, kind: input, shape index: {}]   ;;  %s3909_s14 = inlined_call_operand.vmem [shape: f32[1,32], index: 14, kind: input, shape index: {}]   ;;  %s3910_s15 = inlined_call_operand.vmem [shape: f32[2,64,32], index: 15, kind: output, shape index: {}]  }
   0x1 LB: > { %s2625_s19 = sadd.s32 4294967295, %s3105_s18   ;;  %p2629_p0 = scmp.ge.s32.totalorder %s3105_s18, 1  ;;  %s3105_s18 = sphi %s3194_s18, %s25_s18  }
   0x2   : > { %p437_p1 = scmp.lt.s32.totalorder %s3105_s18, 3 }
   0x4   : > { %p438_p2 = pnand %p2629_p0, %p437_p1 }
   0x5   : > { %p485_p3 = scmp.lt.s32.totalorder (!%p438_p2), %s2625_s19, 1  ;;  %vm506_vm0 = vcmask (!%p438_p2), 261120   ;;  %v2949_v56 = vld [vmem:[%s3898_s3] sm:$0xff] (!%p438_p2)   ;;  %v2950_v57 = vld [vmem:[%s3898_s3 + $0x8] sm:$0xff] (!%p438_p2)   ;;  %vm3108_vm1 = vmmov (!%p438_p2), 0   ;;  %s3109_s22 = smov (!%p438_p2), 96  }
   0x6   : > { %441 = sbr.rel (%p438_p2) target bundleno = 3163 (0xc5b), region = 80  ;;  %2762 = vmatprep.subr.bf16.mxu0 (!%p438_p2), %v2949_v56  ;;  %vm773_vm2 = vcmask (!%p438_p2), 130048   ;;  %s3110_s29 = smov (!%p438_p2), 64  }
   0x7   : > { %2763 = vmatpush3.bf16.msra.mxu0 (!%p438_p2), %v2949_v56  ;;  %s3112_s24 = smov (!%p438_p2), 112  }
   0x8   : > { %2764 = vmatprep.subr.bf16.mxu0 (!%p438_p2), %v2950_v57 }
   0xb   : > { %2765 = vmatpush3.bf16.msra.mxu0 (!%p438_p2), %v2950_v57 }
   0xd   : > { %s3912_s19 = smov (!%p485_p3, %s2625_s19), 1 }
   0xe   : > { %s2694_s20 = sshll.u32 %s3912_s19, 6 }
   0xf   : > { %s3210_s23 = scalar_lea.vmem %s3895_s0, %s2694_s20  ;;  %s494_s30 = scalar_lea.vmem %s3910_s15, %s2694_s20 }
  0x10   : > { %v496_v0 = vld [vmem:[%s3210_s23] sm:$0xff]  ;;  %v498_v1 = vld [vmem:[%s3210_s23 + $0x10] sm:$0xff]  ;;  %v497_v2 = vld [vmem:[%s3210_s23 + $0x8] sm:$0xff] }
  0x11   : > { %v507_v3 = vsel %vm506_vm0, %v496_v0, 0.0  ;;  %v513_v4 = vsel %vm506_vm0, %v498_v1, 0.0  ;;  %v499_v5 = vld [vmem:[%s3210_s23 + $0x18] sm:$0xff]  ;;  %v510_v6 = vsel %vm506_vm0, %v497_v2, 0.0  ;;  %v500_v7 = vld [vmem:[%s3210_s23 + $0x20] sm:$0xff]  ;;  %v501_v9 = vld [vmem:[%s3210_s23 + $0x28] sm:$0xff] }
  0x12   : > { %508 = vadd.xlane.f32.xlu0 %v507_v3  ;;  %514 = vadd.xlane.f32.xlu1 %v513_v4  ;;  %v516_v8 = vsel %vm506_vm0, %v499_v5, 0.0  ;;  %v519_v10 = vsel %vm506_vm0, %v500_v7, 0.0  ;;  %v522_v11 = vsel %vm506_vm0, %v501_v9, 0.0  ;;  %v502_v12 = vld [vmem:[%s3210_s23 + $0x30] sm:$0xff]  ;;  %v503_v13 = vld [vmem:[%s3210_s23 + $0x38] sm:$0xff] }
  0x13   : > { %v525_v14 = vsel %vm506_vm0, %v502_v12, 0.0  ;;  %v528_v15 = vsel %vm506_vm0, %v503_v13, 0.0 }
  0x16   : > { %511 = vadd.xlane.f32.xlu0 %v510_v6  ;;  %517 = vadd.xlane.f32.xlu1 %v516_v8 }
  0x1a   : > { %520 = vadd.xlane.f32.xlu0 %v519_v10  ;;  %523 = vadd.xlane.f32.xlu1 %v522_v11 }
  0x1e   : > { %526 = vadd.xlane.f32.xlu0 %v525_v14  ;;  %529 = vadd.xlane.f32.xlu1 %v528_v15 }
  0x9f   : > { %v509_v16 = vpop.xlane.xlu0 %508  ;;  %v515_v17 = vpop.xlane.xlu1 %514 }
  0xa0   : > { %v532_v18 = vmul.f32 0.03125, %v509_v16  ;;  %v534_v19 = vmul.f32 0.03125, %v515_v17 }
  0xa2   : > { %v3228_v20 = vsub.f32 %v496_v0, %v532_v18  ;;  %v3230_v21 = vsub.f32 %v498_v1, %v534_v19  ;;  %v2634_v19 = vld [vmem:[%s3896_s1] ss:$0 sm:$0xff] }
  0xa3   : > { %v512_v22 = vpop.xlane.xlu0 %511  ;;  %v518_v23 = vpop.xlane.xlu1 %517 }
  0xa4   : > { %v533_v24 = vmul.f32 0.03125, %v512_v22  ;;  %v535_v25 = vmul.f32 0.03125, %v518_v23  ;;  %v548_v26 = vmul.f32 %v3228_v20, %v3228_v20  ;;  %v550_v27 = vmul.f32 %v3230_v21, %v3230_v21 }
  0xa6   : > { %v3236_v28 = vsub.f32 %v497_v2, %v533_v24  ;;  %v3238_v29 = vsub.f32 %v499_v5, %v535_v25  ;;  %v556_v30 = vsel %vm506_vm0, %v548_v26, 0.0  ;;  %v562_v33 = vsel %vm506_vm0, %v550_v27, 0.0 }
  0xa7   : > { %557 = vadd.xlane.f32.xlu0 %v556_v30  ;;  %v521_v31 = vpop.xlane.xlu0 %520  ;;  %v524_v32 = vpop.xlane.xlu1 %523 }
  0xa8   : > { %v536_v34 = vmul.f32 0.03125, %v521_v31  ;;  %v537_v35 = vmul.f32 0.03125, %v524_v32  ;;  %v549_v36 = vmul.f32 %v3236_v28, %v3236_v28  ;;  %v551_v37 = vmul.f32 %v3238_v29, %v3238_v29 }
  0xaa   : > { %v3246_v38 = vsub.f32 %v500_v7, %v536_v34  ;;  %v3248_v39 = vsub.f32 %v501_v9, %v537_v35  ;;  %v559_v40 = vsel %vm506_vm0, %v549_v36, 0.0  ;;  %v565_v43 = vsel %vm506_vm0, %v551_v37, 0.0 }
  0xab   : > { %563 = vadd.xlane.f32.xlu0 %v562_v33  ;;  %560 = vadd.xlane.f32.xlu1 %v559_v40  ;;  %v527_v41 = vpop.xlane.xlu0 %526  ;;  %v530_v42 = vpop.xlane.xlu1 %529 }
  0xac   : > { %v538_v44 = vmul.f32 0.03125, %v527_v41  ;;  %v539_v45 = vmul.f32 0.03125, %v530_v42  ;;  %v552_v46 = vmul.f32 %v3246_v38, %v3246_v38  ;;  %v553_v47 = vmul.f32 %v3248_v39, %v3248_v39 }
  0xae   : > { %v3256_v48 = vsub.f32 %v502_v12, %v538_v44  ;;  %v3258_v49 = vsub.f32 %v503_v13, %v539_v45  ;;  %v568_v50 = vsel %vm506_vm0, %v552_v46, 0.0  ;;  %v571_v51 = vsel %vm506_vm0, %v553_v47, 0.0 }
  0xaf   : > { %566 = vadd.xlane.f32.xlu1 %v565_v43  ;;  %569 = vadd.xlane.f32.xlu0 %v568_v50 }
  0xb0   : > { %v554_v52 = vmul.f32 %v3256_v48, %v3256_v48  ;;  %v555_v53 = vmul.f32 %v3258_v49, %v3258_v49 }
  0xb2   : > { %v574_v54 = vsel %vm506_vm0, %v554_v52, 0.0  ;;  %v577_v55 = vsel %vm506_vm0, %v555_v53, 0.0 }
  0xb3   : > { %572 = vadd.xlane.f32.xlu1 %v571_v51  ;;  %575 = vadd.xlane.f32.xlu0 %v574_v54 }
  0xb7   : > { %578 = vadd.xlane.f32.xlu1 %v577_v55 }
 0x134   : > { %v558_v58 = vpop.xlane.xlu0 %557 }
 0x135   : > { %v580_v59 = vmul.f32 0.03125, %v558_v58 }
 0x137   : > { %v588_v60 = vadd.f32 1e-05, %v580_v59 }
 0x138   : > { %v561_v61 = vpop.xlane.xlu1 %560  ;;  %v564_v62 = vpop.xlane.xlu0 %563 }
 0x139   : > { %2963 = vrsqrt.f32 %v588_v60  ;;  %v581_v63 = vmul.f32 0.03125, %v561_v61  ;;  %v582_v0 = vmul.f32 0.03125, %v564_v62 }
 0x13b   : > { %v589_v1 = vadd.f32 1e-05, %v581_v63  ;;  %v590_v2 = vadd.f32 1e-05, %v582_v0 }
 0x13c   : > { %v567_v3 = vpop.xlane.xlu1 %566  ;;  %v570_v4 = vpop.xlane.xlu0 %569 }
 0x13d   : > { %2965 = vrsqrt.f32 %v589_v1  ;;  %v583_v5 = vmul.f32 0.03125, %v567_v3  ;;  %v584_v6 = vmul.f32 0.03125, %v570_v4 }
 0x13e   : > { %2967 = vrsqrt.f32 %v590_v2 }
 0x13f   : > { %v591_v7 = vadd.f32 1e-05, %v583_v5  ;;  %v592_v8 = vadd.f32 1e-05, %v584_v6 }
 0x140   : > { %v573_v9 = vpop.xlane.xlu1 %572  ;;  %v576_v10 = vpop.xlane.xlu0 %575 }
 0x141   : > { %2969 = vrsqrt.f32 %v591_v7  ;;  %v585_v11 = vmul.f32 0.03125, %v573_v9  ;;  %v586_v12 = vmul.f32 0.03125, %v576_v10 }
 0x142   : > { %2971 = vrsqrt.f32 %v592_v8 }
 0x143   : > { %v2964_v13 = vpop.eup %2963  ;;  %v593_v14 = vadd.f32 1e-05, %v585_v11  ;;  %v594_v15 = vadd.f32 1e-05, %v586_v12 }
 0x144   : > { %v579_v16 = vpop.xlane.xlu1 %578  ;;  %v604_v17 = vmul.f32 %v2964_v13, %v3228_v20  ;;  %v2635_v20 = vld [vmem:[%s3897_s2] ss:$0 sm:$0xff] }
 0x145   : > { %2973 = vrsqrt.f32 %v593_v14  ;;  %v587_v18 = vmul.f32 0.03125, %v579_v16 }
 0x146   : > { %2975 = vrsqrt.f32 %v594_v15  ;;  %v618_v26 = vmul.f32 %v2634_v19, %v604_v17 }
 0x147   : > { %v2966_v22 = vpop.eup %2965  ;;  %v595_v23 = vadd.f32 1e-05, %v587_v18 }
 0x148   : > { %v2968_v24 = vpop.eup %2967  ;;  %v605_v25 = vmul.f32 %v2966_v22, %v3236_v28  ;;  %v632_v34 = vadd.f32 %v2635_v20, %v618_v26 }
 0x149   : > { %v606_v27 = vmul.f32 %v2968_v24, %v3230_v21  ;;  %2977 = vrsqrt.f32 %v595_v23 }
 0x14a   : > { %v619_v30 = vmul.f32 %v2634_v19, %v605_v25 }
 0x14b   : > { %v2970_v31 = vpop.eup %2969  ;;  %v620_v36 = vmul.f32 %v2634_v19, %v606_v27 }
 0x14c   : > { %v2972_v32 = vpop.eup %2971  ;;  %v607_v33 = vmul.f32 %v2970_v31, %v3238_v29  ;;  %v633_v35 = vadd.f32 %v2635_v20, %v619_v30 }
 0x14d   : > { %v608_v37 = vmul.f32 %v2972_v32, %v3246_v38  ;;  %v634_v43 = vadd.f32 %v2635_v20, %v620_v36 }
 0x14e   : > { %v640_v40 = vpack.c.bf16 %v633_v35, %v632_v34  ;;  %v621_v28 = vmul.f32 %v2634_v19, %v607_v33 }
 0x14f   : > { %v2974_v41 = vpop.eup %2973  ;;  %v622_v45 = vmul.f32 %v2634_v19, %v608_v37  ;;  %v768_v37 = vld [vmem:[%s3902_s7] sm:$0xff] }
 0x150   : > { %v2976_v42 = vpop.eup %2975  ;;  %v609_v21 = vmul.f32 %v2974_v41, %v3248_v39  ;;  %2766 = vmatprep.mubr.msk.bf16.mxu0 %vm506_vm0, %v640_v40  ;;  %v635_v44 = vadd.f32 %v2635_v20, %v621_v28  ;;  %v3351_v28 = vld [vmem:[%s3903_s8 + $0x10] sm:$0xff] }
 0x151   : > { %v610_v46 = vmul.f32 %v2976_v42, %v3256_v48  ;;  %v636_v38 = vadd.f32 %v2635_v20, %v622_v45  ;;  %v3107_v48 = vmov 0.0  }
 0x152   : > { %v641_v47 = vpack.c.bf16 %v635_v44, %v634_v43  ;;  %v623_v29 = vmul.f32 %v2634_v19, %v609_v21  ;;  %2780 = vmatprep.subr.bf16.mxu1 %v3107_v48  ;;  %2774 = vmatprep.subr.bf16.mxu0 %v3107_v48  ;;  %v769_v43 = vld [vmem:[%s3902_s7 + $0x8] sm:$0xff] }
 0x153   : > { %v2978_v50 = vpop.eup %2977  ;;  %v624_v53 = vmul.f32 %v2634_v19, %v610_v46  ;;  %2782 = vmatprep.mubr.msk.bf16.mxu1 %vm3108_vm1, %v3107_v48 }
 0x154   : > { %v611_v51 = vmul.f32 %v2978_v50, %v3258_v49  ;;  %2767 = vmatmul.mubr.msk.bf16.vlgmr.msra.gmra.mrb[0].mxu0 %vm506_vm0, %v641_v47  ;;  %v637_v52 = vadd.f32 %v2635_v20, %v623_v29  ;;  %v2636_v49 = vld [vmem:[%s3899_s4] ss:$0 sm:$0xff] }
 0x155   : > { %v638_v39 = vadd.f32 %v2635_v20, %v624_v53  ;;  %v3359_v47 = vld [vmem:[%s3903_s8] sm:$0xff] }
 0x156   : > { %v642_v54 = vpack.c.bf16 %v637_v52, %v636_v38  ;;  %v625_v55 = vmul.f32 %v2634_v19, %v611_v51  ;;  %v3365_v38 = vld [vmem:[%s3903_s8 + $0x8] sm:$0xff] }
 0x158   : > { %2770 = vmatprep.mubr.msk.bf16.mxu0 %vm506_vm0, %v642_v54  ;;  %v639_v56 = vadd.f32 %v2635_v20, %v625_v55 }
 0x15a   : > { %v643_v57 = vpack.c.bf16 %v639_v56, %v638_v39 }
 0x15c   : > { %2771 = vmatmul.mubr.msk.bf16.gmra.mrb[4].mxu0 %vm506_vm0, %v643_v57  ;;  %v3373_v57 = vld [vmem:[%s3903_s8 + $0x18] sm:$0xff] }
 0x15d   : > { %2776 = vmatprep.mubr.msk.bf16.mxu0 %vm3108_vm1, %v3107_v48 }
 0x227   : > { %v2768_v58 = vpop.f32.mrb[0].mxu0 }
 0x228   : > { %v722_v59 = vadd.f32 %v2768_v58, %v2636_v49  ;;  %v713_v60 = vpop.f32.mrb[1].mxu0 }
 0x229   : > { %v714_v61 = vadd.f32 %v2636_v49, %v713_v60  ;;  %v2769_v62 = vpop.f32.mrb[2].mxu0 }
 0x22a   : > { %v725_v63 = vadd.f32 %v2769_v62, %v2636_v49  ;;  %v716_v0 = vpop.f32.mrb[3].mxu0  ;;  %v754_v2 = vmul.f32 0.25, %v722_v59 }
 0x22b   : > { %v717_v1 = vadd.f32 %v2636_v49, %v716_v0  ;;  %v752_v5 = vmul.f32 0.25, %v714_v61 }
 0x22c   : > { %v755_v3 = vmul.f32 0.25, %v725_v63  ;;  %v3301_v4 = vpack.c.bf16 %v725_v63, %v722_v59  ;;  %v3381_v63 = vld [vmem:[%s3903_s8 + $0x20] sm:$0xff] }
 0x22d   : > { %v753_v6 = vmul.f32 0.25, %v717_v1  ;;  %v3303_v7 = vpack.c.bf16 %v717_v1, %v714_v61 }
 0x22e   : > { %v3305_v8 = vpack.c.bf16 %v755_v3, %v754_v2  ;;  %822 = vrot.lane.b32.xlu1 %v3301_v4, %s3109_s22 }
 0x22f   : > { %v3308_v9 = vpack.c.bf16 %v753_v6, %v752_v5  ;;  %771 = vrot.lane.b32.xlu0 %v3303_v7, %s3109_s22  ;;  %v2772_v10 = vpop.f32.mrb[4].mxu0 }
 0x230   : > { %v738_v11 = vadd.f32 %v2772_v10, %v2636_v49  ;;  %v729_v12 = vpop.f32.mrb[5].mxu0 }
 0x231   : > { %v730_v13 = vadd.f32 %v2636_v49, %v729_v12  ;;  %v2773_v14 = vpop.f32.mrb[6].mxu0 }
 0x232   : > { %v741_v15 = vadd.f32 %v2773_v14, %v2636_v49  ;;  %v732_v16 = vpop.f32.mrb[7].mxu0  ;;  %v758_v18 = vmul.f32 0.25, %v738_v11 }
 0x233   : > { %v733_v17 = vadd.f32 %v2636_v49, %v732_v16  ;;  %v756_v23 = vmul.f32 0.25, %v730_v13 }
 0x234   : > { %v759_v19 = vmul.f32 0.25, %v741_v15  ;;  %v3311_v22 = vpack.c.bf16 %v741_v15, %v738_v11  ;;  %v3388_v11 = vld [vmem:[%s3903_s8 + $0x30] sm:$0xff] }
 0x235   : > { %v757_v24 = vmul.f32 0.25, %v733_v17  ;;  %v3313_v25 = vpack.c.bf16 %v733_v17, %v730_v13 }
 0x236   : > { %v3315_v26 = vpack.c.bf16 %v759_v19, %v758_v18  ;;  %v3399_v18 = vld [vmem:[%s3903_s8 + $0x38] sm:$0xff] }
 0x237   : > { %v3317_v27 = vpack.c.bf16 %v757_v24, %v756_v23  ;;  %872 = vrot.lane.b32.xlu1 %v3313_v25, %s3109_s22  ;;  %v3407_v24 = vld [vmem:[%s3903_s8 + $0x28] sm:$0xff] }
 0x23b   : > { %922 = vrot.lane.b32.xlu1 %v3311_v22, %s3109_s22  ;;  %s3111_s22 = smov 80  }
 0x2a0   : > { %v823_v20 = vpop.permute.xlu1 %822 }
 0x2a1   : > { %v772_v30 = vpop.permute.xlu0 %771  ;;  %v828_v31 = vsel %vm773_vm2, %v823_v20, 0 }
 0x2a2   : > { %v778_v32 = vsel %vm773_vm2, %v772_v30, 0  ;;  %2781 = vmatpush3.bf16.xpose.msra.mxu1 %v828_v31 }
 0x2a3   : > { %2775 = vmatpush3.bf16.xpose.msra.mxu0 %v778_v32  ;;  %2792 = vmatprep.subr.bf16.mxu1 %v3107_v48 }
 0x2a4   : > { %2786 = vmatprep.subr.bf16.mxu0 %v3107_v48 }
 0x2a9   : > { %2783 = vmatmul.mubr.msk.bf16.vlgmr.msra.gmra.mrb[0].mxu1 %vm773_vm2, %v3305_v8  ;;  %v873_v33 = vpop.permute.xlu1 %872 }
 0x2aa   : > { %v878_v34 = vsel %vm773_vm2, %v873_v33, 0  ;;  %2777 = vmatmul.mubr.msk.bf16.vlgmr.msra.gmra.mrb[8].mxu0 %vm773_vm2, %v3308_v9  ;;  %2794 = vmatprep.mubr.msk.bf16.mxu1 %vm3108_vm1, %v3107_v48 }
 0x2ab   : > { %2787 = vmatpush3.bf16.xpose.msra.mxu0 %v878_v34  ;;  %2788 = vmatprep.mubr.msk.bf16.mxu0 %vm3108_vm1, %v3107_v48 }
 0x2ac   : > { %2798 = vmatprep.subr.bf16.mxu0 %v3107_v48 }
 0x2ad   : > { %v923_v35 = vpop.permute.xlu1 %922 }
 0x2ae   : > { %v928_v36 = vsel %vm773_vm2, %v923_v35, 0 }
 0x2af   : > { %2793 = vmatpush3.bf16.xpose.msra.mxu1 %v928_v36 }
 0x2b0   : > { %2804 = vmatprep.subr.bf16.mxu1 %v3107_v48 }
 0x2b2   : > { %2789 = vmatmul.mubr.msk.bf16.vlgmr.msra.gmra.mrb[12].mxu0 %vm773_vm2, %v3317_v27 }
 0x2b3   : > { %2800 = vmatprep.mubr.msk.bf16.mxu0 %vm3108_vm1, %v3107_v48 }
 0x2b6   : > { %2795 = vmatmul.mubr.msk.bf16.vlgmr.msra.gmra.mrb[4].mxu1 %vm773_vm2, %v3315_v26 }
 0x2b7   : > { %2806 = vmatprep.mubr.msk.bf16.mxu1 %vm3108_vm1, %v3107_v48 }
 0x37c   : > { %v864_v40 = vpop.f32.mrb[0].mxu1 }
 0x37d   : > { %v865_v41 = vadd.f32 %v864_v40, %v768_v37  ;;  %v814_v42 = vpop.f32.mrb[8].mxu0  ;;  %v2784_v21 = vpop.f32.mrb[1].mxu1 }
 0x37e   : > { %v815_v44 = vadd.f32 %v814_v42, %v768_v37  ;;  %v2778_v45 = vpop.f32.mrb[9].mxu0  ;;  %v867_v46 = vpop.f32.mrb[2].mxu1 }
 0x37f   : > { %v817_v29 = vpop.f32.mrb[10].mxu0  ;;  %v2785_v50 = vpop.f32.mrb[3].mxu1  ;;  %v973_v51 = vadd.f32 %v865_v41, %v3351_v28  ;;  %v868_v54 = vadd.f32 %v867_v46, %v769_v43 }
 0x380   : > { %v818_v52 = vadd.f32 %v817_v29, %v769_v43  ;;  %v2779_v53 = vpop.f32.mrb[11].mxu0  ;;  %v971_v39 = vadd.f32 %v815_v44, %v3359_v47 }
 0x381   : > { %v985_v55 = vsel %vm773_vm2, %v973_v51, -inf  ;;  %v974_v60 = vadd.f32 %v868_v54, %v3373_v57 }
 0x382   : > { %986 = vmax.xlane.f32.xlu0 %v985_v55  ;;  %v972_v56 = vadd.f32 %v818_v52, %v3365_v38  ;;  %v979_v59 = vsel %vm773_vm2, %v971_v39, -inf }
 0x383   : > { %v988_v3 = vsel %vm773_vm2, %v974_v60, -inf }
 0x384   : > { %v982_v49 = vsel %vm773_vm2, %v972_v56, -inf }
 0x385   : > { %983 = vmax.xlane.f32.xlu1 %v982_v49  ;;  %v914_v58 = vpop.f32.mrb[12].mxu0 }
 0x386   : > { %v915_v61 = vadd.f32 %v914_v58, %v768_v37  ;;  %980 = vmax.xlane.f32.xlu0 %v979_v59  ;;  %v2790_v62 = vpop.f32.mrb[13].mxu0 }
 0x387   : > { %v917_v0 = vpop.f32.mrb[14].mxu0 }
 0x388   : > { %v2791_v1 = vpop.f32.mrb[15].mxu0  ;;  %v975_v5 = vadd.f32 %v915_v61, %v3381_v63  ;;  %v918_v19 = vadd.f32 %v917_v0, %v769_v43 }
 0x389   : > { %v964_v2 = vpop.f32.mrb[4].mxu1 }
 0x38a   : > { %v965_v6 = vadd.f32 %v964_v2, %v768_v37  ;;  %v2796_v10 = vpop.f32.mrb[5].mxu1  ;;  %989 = vmax.xlane.f32.xlu0 %v988_v3  ;;  %v991_v14 = vsel %vm773_vm2, %v975_v5, -inf  ;;  %v3412_v30 = vadd.f32 %v918_v19, %v3407_v24 }
 0x38b   : > { %v967_v12 = vpop.f32.mrb[6].mxu1 }
 0x38c   : > { %v2797_v13 = vpop.f32.mrb[7].mxu1  ;;  %v977_v15 = vadd.f32 %v965_v6, %v3388_v11  ;;  %v968_v17 = vadd.f32 %v967_v12, %v769_v43  ;;  %v994_v31 = vsel %vm773_vm2, %v3412_v30, -inf }
 0x38e   : > { %992 = vmax.xlane.f32.xlu0 %v991_v14  ;;  %v997_v16 = vsel %vm773_vm2, %v977_v15, -inf  ;;  %v3402_v23 = vadd.f32 %v968_v17, %v3399_v18 }
 0x390   : > { %v1000_v20 = vsel %vm773_vm2, %v3402_v23, -inf }
 0x392   : > { %998 = vmax.xlane.f32.xlu0 %v997_v16 }
 0x396   : > { %1118 = vrot.lane.b32.xlu1 %v3301_v4, %s3110_s29 }
 0x39a   : > { %1165 = vrot.lane.b32.xlu1 %v3313_v25, %s3110_s29 }
 0x3a8   : > { %1071 = vrot.lane.b32.xlu0 %v3303_v7, %s3110_s29 }
 0x3be   : > { %1001 = vmax.xlane.f32.xlu1 %v1000_v20 }
 0x3c2   : > { %995 = vmax.xlane.f32.xlu1 %v994_v31 }
 0x3d3   : > { %1212 = vrot.lane.b32.xlu1 %v3311_v22, %s3110_s29  ;;  %s3113_s29 = smov 48  }
 0x40f   : > { %v987_v32 = vpop.xlane.xlu0 %986 }
 0x410   : > { %v1005_v33 = vsub.f32 %v973_v51, %v987_v32 }
 0x412   : > { %v1015_v34 = vmul.f32 1.442695, %v1005_v33  ;;  %v984_v35 = vpop.xlane.xlu1 %983 }
 0x413   : > { %v981_v36 = vpop.xlane.xlu0 %980  ;;  %v1004_v40 = vsub.f32 %v972_v56, %v984_v35 }
 0x414   : > { %2979 = vpow2.f32 %v1015_v34  ;;  %v1003_v37 = vsub.f32 %v971_v39, %v981_v36 }
 0x415   : > { %v1013_v44 = vmul.f32 1.442695, %v1004_v40 }
 0x416   : > { %v1011_v41 = vmul.f32 1.442695, %v1003_v37  ;;  %v1119_v42 = vpop.permute.xlu1 %1118 }
 0x417   : > { %2805 = vmatpush3.bf16.msra.mxu1 %v1119_v42  ;;  %v990_v21 = vpop.xlane.xlu0 %989 }
 0x418   : > { %2981 = vpow2.f32 %v1011_v41  ;;  %v1006_v43 = vsub.f32 %v974_v60, %v990_v21  ;;  %2816 = vmatprep.subr.bf16.mxu1 %v3107_v48 }
 0x41a   : > { %v1017_v45 = vmul.f32 1.442695, %v1006_v43  ;;  %v1166_v3 = vpop.permute.xlu1 %1165 }
 0x41b   : > { %v993_v46 = vpop.xlane.xlu0 %992 }
 0x41c   : > { %2983 = vpow2.f32 %v1017_v45  ;;  %v1007_v50 = vsub.f32 %v975_v5, %v993_v46 }
 0x41d   : > { %2985 = vpow2.f32 %v1013_v44 }
 0x41e   : > { %v3418_v29 = vpop.eup %2979  ;;  %v1019_v55 = vmul.f32 1.442695, %v1007_v50 }
 0x41f   : > { %v999_v51 = vpop.xlane.xlu0 %998  ;;  %v1033_v52 = vsel %vm773_vm2, %v3418_v29, 0.0 }
 0x420   : > { %v1009_v53 = vsub.f32 %v977_v15, %v999_v51  ;;  %1034 = vadd.xlane.f32.xlu0 %v1033_v52 }
 0x422   : > { %v3422_v54 = vpop.eup %2981  ;;  %v1023_v39 = vmul.f32 1.442695, %v1009_v53 }
 0x423   : > { %v1072_v56 = vpop.permute.xlu0 %1071  ;;  %v1027_v49 = vsel %vm773_vm2, %v3422_v54, 0.0 }
 0x424   : > { %2987 = vpow2.f32 %v1023_v39  ;;  %1028 = vadd.xlane.f32.xlu0 %v1027_v49  ;;  %2799 = vmatpush3.bf16.msra.mxu0 %v1072_v56 }
 0x425   : > { %2810 = vmatprep.subr.bf16.mxu0 %v3107_v48  ;;  %2989 = vpow2.f32 %v1019_v55 }
 0x426   : > { %v2984_v58 = vpop.eup %2983 }
 0x427   : > { %v1036_v59 = vsel %vm773_vm2, %v2984_v58, 0.0  ;;  %v2986_v60 = vpop.eup %2985 }
 0x428   : > { %1037 = vadd.xlane.f32.xlu1 %v1036_v59  ;;  %v1030_v61 = vsel %vm773_vm2, %v2986_v60, 0.0 }
 0x42c   : > { %1031 = vadd.xlane.f32.xlu1 %v1030_v61 }
 0x42e   : > { %v3429_v62 = vpop.eup %2987 }
 0x42f   : > { %v1045_v0 = vsel %vm773_vm2, %v3429_v62, 0.0  ;;  %v3433_v1 = vpop.eup %2989 }
 0x430   : > { %1046 = vadd.xlane.f32.xlu0 %v1045_v0  ;;  %v1039_v2 = vsel %vm773_vm2, %v3433_v1, 0.0 }
 0x434   : > { %1040 = vadd.xlane.f32.xlu0 %v1039_v2 }
 0x43d   : > { %1323 = vrot.lane.b32.xlu1 %v3301_v4, %s3111_s22 }
 0x44a   : > { %1271 = vrot.lane.b32.xlu0 %v3303_v7, %s3111_s22 }
 0x44b   : > { %v1002_v5 = vpop.xlane.xlu1 %1001 }
 0x44c   : > { %v1010_v6 = vsub.f32 %v3402_v23, %v1002_v5 }
 0x44e   : > { %1269 = vrot.lane.b32.xlu0 %v3308_v9, %s3112_s24  ;;  %v1025_v10 = vmul.f32 1.442695, %v1010_v6 }
 0x44f   : > { %v996_v12 = vpop.xlane.xlu1 %995 }
 0x450   : > { %v1008_v13 = vsub.f32 %v3412_v30, %v996_v12  ;;  %2991 = vpow2.f32 %v1025_v10 }
 0x452   : > { %1321 = vrot.lane.b32.xlu0 %v3305_v8, %s3112_s24  ;;  %v1021_v14 = vmul.f32 1.442695, %v1008_v13 }
 0x453   : > { %v1213_v9 = vpop.permute.xlu1 %1212 }
 0x454   : > { %2993 = vpow2.f32 %v1021_v14 }
 0x456   : > { %1373 = vrot.lane.b32.xlu0 %v3317_v27, %s3112_s24 }
 0x45a   : > { %v2992_v15 = vpop.eup %2991 }
 0x45b   : > { %v1048_v16 = vsel %vm773_vm2, %v2992_v15, 0.0 }
 0x45e   : > { %v2994_v17 = vpop.eup %2993 }
 0x45f   : > { %v1042_v19 = vsel %vm773_vm2, %v2994_v17, 0.0 }
 0x461   : > { %1049 = vadd.xlane.f32.xlu1 %v1048_v16 }
 0x465   : > { %1043 = vadd.xlane.f32.xlu1 %v1042_v19 }
 0x476   : > { %1375 = vrot.lane.b32.xlu1 %v3313_v25, %s3111_s22 }
 0x47a   : > { %1427 = vrot.lane.b32.xlu1 %v3311_v22, %s3111_s22 }
 0x47e   : > { %1425 = vrot.lane.b32.xlu1 %v3315_v26, %s3112_s24 }
 0x4ad   : > { %v1035_v8 = vpop.xlane.xlu0 %1034 }
 0x4ae   : > { %2995 = vrcp.f32 %v1035_v8 }
 0x4b1   : > { %v1029_v23 = vpop.xlane.xlu0 %1028 }
 0x4b5   : > { %v1038_v27 = vpop.xlane.xlu1 %1037 }
 0x4b6   : > { %2997 = vrcp.f32 %v1038_v27 }
 0x4b7   : > { %2999 = vrcp.f32 %v1029_v23 }
 0x4b8   : > { %v2996_v30 = vpop.eup %2995 }
 0x4b9   : > { %v1032_v20 = vpop.xlane.xlu1 %1031  ;;  %v1061_v32 = vmul.f32 %v2996_v30, %v3418_v29 }
 0x4ba   : > { %3001 = vrcp.f32 %v1032_v20 }
 0x4bd   : > { %v1047_v41 = vpop.xlane.xlu0 %1046  ;;  %v1324_v42 = vpop.permute.xlu1 %1323 }
 0x4be   : > { %3003 = vrcp.f32 %v1047_v41  ;;  %v1329_v39 = vsel %vm773_vm2, %v1324_v42, 0 }
 0x4c0   : > { %v2998_v31 = vpop.eup %2997 }
 0x4c1   : > { %v1062_v33 = vmul.f32 %v2998_v31, %v2984_v58  ;;  %v3000_v34 = vpop.eup %2999  ;;  %v1041_v21 = vpop.xlane.xlu0 %1040 }
 0x4c2   : > { %v1059_v37 = vmul.f32 %v3000_v34, %v3422_v54 }
 0x4c3   : > { %v1068_v35 = vpack.c.bf16 %v1062_v33, %v1061_v32 }
 0x4c4   : > { %v3002_v36 = vpop.eup %3001 }
 0x4c5   : > { %v1060_v26 = vmul.f32 %v3002_v36, %v2986_v60  ;;  %2807 = vmatmul.mubr.msk.bf16.vlgmr.msra.gmra.mrb[8].mxu1 %vm773_vm2, %v1068_v35  ;;  %v1272_v29 = vpop.permute.xlu0 %1271 }
 0x4c6   : > { %2817 = vmatpush3.bf16.msra.mxu1 %v1213_v9  ;;  %2818 = vmatprep.mubr.msk.bf16.mxu1 %vm3108_vm1, %v3107_v48  ;;  %v1277_v60 = vsel %vm773_vm2, %v1272_v29, 0 }
 0x4c7   : > { %v1067_v40 = vpack.c.bf16 %v1060_v26, %v1059_v37  ;;  %2828 = vmatprep.subr.bf16.mxu1 %v3107_v48  ;;  %v2651_v37 = vld [vmem:[%s3902_s7 + $0x10] sm:$0xff] }
 0x4c8   : > { %v3004_v45 = vpop.eup %3003 }
 0x4c9   : > { %2801 = vmatmul.mubr.msk.bf16.vlgmr.msra.gmra.mrb[16].mxu0 %vm773_vm2, %v1067_v40  ;;  %v1065_v50 = vmul.f32 %v3004_v45, %v3429_v62  ;;  %v1270_v58 = vpop.permute.xlu0 %1269 }
 0x4ca   : > { %2811 = vmatpush3.bf16.msra.mxu0 %v1166_v3  ;;  %2812 = vmatprep.mubr.msk.bf16.mxu0 %vm3108_vm1, %v3107_v48 }
 0x4cb   : > { %2822 = vmatprep.subr.bf16.mxu0 %v3107_v48 }
 0x4cd   : > { %v1322_v62 = vpop.permute.xlu0 %1321 }
 0x4d1   : > { %v1374_v3 = vpop.permute.xlu0 %1373 }
 0x4ee   : > { %v1050_v43 = vpop.xlane.xlu1 %1049 }
 0x4ef   : > { %3005 = vrcp.f32 %v1050_v43 }
 0x4f0   : > { %3007 = vrcp.f32 %v1041_v21 }
 0x4f2   : > { %v1044_v44 = vpop.xlane.xlu1 %1043 }
 0x4f3   : > { %3009 = vrcp.f32 %v1044_v44  ;;  %v2652_v44 = vld [vmem:[%s3902_s7 + $0x18] sm:$0xff] }
 0x4f6   : > { %v1376_v55 = vpop.permute.xlu1 %1375 }
 0x4f9   : > { %v3006_v46 = vpop.eup %3005 }
 0x4fa   : > { %v1066_v51 = vmul.f32 %v3006_v46, %v2992_v15  ;;  %v3008_v52 = vpop.eup %3007  ;;  %v1428_v61 = vpop.permute.xlu1 %1427 }
 0x4fb   : > { %v1063_v56 = vmul.f32 %v3008_v52, %v3433_v1  ;;  %v1433_v0 = vsel %vm773_vm2, %v1428_v61, 0  ;;  %v1381_v1 = vsel %vm773_vm2, %v1376_v55, 0 }
 0x4fc   : > { %v1070_v53 = vpack.c.bf16 %v1066_v51, %v1065_v50 }
 0x4fd   : > { %v3010_v54 = vpop.eup %3009 }
 0x4fe   : > { %v1064_v49 = vmul.f32 %v3010_v54, %v2994_v17  ;;  %2819 = vmatmul.mubr.msk.bf16.vlgmr.msra.gmra.mrb[12].mxu1 %vm773_vm2, %v1070_v53  ;;  %v1426_v2 = vpop.permute.xlu1 %1425 }
 0x4ff   : > { %2829 = vmatpush3.bf16.xpose.msra.mxu1 %v1329_v39  ;;  %2830 = vmatprep.mubr.msk.bf16.mxu1 %vm3108_vm1, %v3107_v48 }
 0x500   : > { %v1069_v59 = vpack.c.bf16 %v1064_v49, %v1063_v56  ;;  %2840 = vmatprep.subr.bf16.mxu1 %v3107_v48 }
 0x502   : > { %2813 = vmatmul.mubr.msk.bf16.vlgmr.msra.gmra.mrb[20].mxu0 %vm773_vm2, %v1069_v59 }
 0x503   : > { %2823 = vmatpush3.bf16.xpose.msra.mxu0 %v1277_v60  ;;  %2824 = vmatprep.mubr.msk.bf16.mxu0 %vm3108_vm1, %v3107_v48 }
 0x504   : > { %2834 = vmatprep.subr.bf16.mxu0 %v3107_v48 }
 0x506   : > { %2831 = vmatmul.mubr.msk.bf16.vlgmr.msra.gmra.mrb[16].mxu1 %vm773_vm2, %v1322_v62 }
 0x507   : > { %2841 = vmatpush3.bf16.xpose.msra.mxu1 %v1433_v0  ;;  %2842 = vmatprep.mubr.msk.bf16.mxu1 %vm3108_vm1, %v3107_v48 }
 0x508   : > { %2852 = vmatprep.subr.bf16.mxu1 %v3107_v48 }
 0x50a   : > { %2825 = vmatmul.mubr.msk.bf16.vlgmr.msra.gmra.mrb[24].mxu0 %vm773_vm2, %v1270_v58 }
 0x50b   : > { %2835 = vmatpush3.bf16.xpose.msra.mxu0 %v1381_v1  ;;  %2836 = vmatprep.mubr.msk.bf16.mxu0 %vm3108_vm1, %v3107_v48 }
 0x50c   : > { %2846 = vmatprep.subr.bf16.mxu0 %v3107_v48 }
 0x50e   : > { %2843 = vmatmul.mubr.msk.bf16.vlgmr.msra.gmra.mrb[20].mxu1 %vm773_vm2, %v1426_v2 }
 0x50f   : > { %2854 = vmatprep.mubr.msk.bf16.mxu1 %vm3108_vm1, %v3107_v48 }
 0x512   : > { %2837 = vmatmul.mubr.msk.bf16.vlgmr.msra.gmra.mrb[28].mxu0 %vm773_vm2, %v1374_v3 }
 0x513   : > { %2848 = vmatprep.mubr.msk.bf16.mxu0 %vm3108_vm1, %v3107_v48 }
 0x598   : > { %v3487_v5 = vpop.f32.mrb[8].mxu1 }
 0x599   : > { %v2808_v6 = vpop.f32.mrb[9].mxu1 }
 0x59a   : > { %v3489_v10 = vpop.f32.mrb[10].mxu1 }
 0x59b   : > { %v1260_v12 = vpack.c.bf16 %v3489_v10, %v3487_v5  ;;  %v2809_v13 = vpop.f32.mrb[11].mxu1  ;;  %v3091_v5 = vld [vmem:[%s3210_s23 + $0x10] sm:$0xff] }
 0x59c   : > { %v3493_v14 = vpop.f32.mrb[16].mxu0 }
 0x59d   : > { %v2802_v15 = vpop.f32.mrb[17].mxu0 }
 0x59e   : > { %v3495_v16 = vpop.f32.mrb[18].mxu0 }
 0x59f   : > { %v1259_v17 = vpack.c.bf16 %v3495_v16, %v3493_v14  ;;  %v2803_v19 = vpop.f32.mrb[19].mxu0  ;;  %v2673_v14 = vld [vmem:[%s3901_s6] ss:$0 sm:$0xff] }
 0x5d1   : > { %v3499_v8 = vpop.f32.mrb[12].mxu1 }
 0x5d2   : > { %v2820_v9 = vpop.f32.mrb[13].mxu1 }
 0x5d3   : > { %v3501_v23 = vpop.f32.mrb[14].mxu1 }
 0x5d4   : > { %v1262_v27 = vpack.c.bf16 %v3501_v23, %v3499_v8  ;;  %v2821_v20 = vpop.f32.mrb[15].mxu1  ;;  %v3094_v23 = vld [vmem:[%s3210_s23 + $0x18] sm:$0xff] }
 0x5d5   : > { %v3505_v30 = vpop.f32.mrb[20].mxu0 }
 0x5d6   : > { %v2814_v31 = vpop.f32.mrb[21].mxu0 }
 0x5d7   : > { %v3507_v32 = vpop.f32.mrb[22].mxu0 }
 0x5d8   : > { %v1261_v33 = vpack.c.bf16 %v3507_v32, %v3505_v30  ;;  %v2815_v34 = vpop.f32.mrb[23].mxu0 }
 0x5d9   : > { %v1365_v35 = vpop.f32.mrb[16].mxu1 }
 0x5da   : > { %v2832_v36 = vpop.f32.mrb[17].mxu1  ;;  %v1366_v42 = vadd.f32 %v2651_v37, %v1365_v35 }
 0x5db   : > { %v1368_v26 = vpop.f32.mrb[18].mxu1 }
 0x5dc   : > { %v2833_v40 = vpop.f32.mrb[19].mxu1  ;;  %v1369_v52 = vadd.f32 %v2652_v44, %v1368_v26  ;;  %v1478_v39 = vadd.f32 %v1366_v42, %v3351_v28 }
 0x5dd   : > { %v1313_v41 = vpop.f32.mrb[24].mxu0 }
 0x5de   : > { %v1314_v21 = vadd.f32 %v2651_v37, %v1313_v41  ;;  %v2826_v43 = vpop.f32.mrb[25].mxu0  ;;  %v1479_v62 = vadd.f32 %v1369_v52, %v3373_v57 }
 0x5df   : > { %v1316_v45 = vpop.f32.mrb[26].mxu0 }
 0x5e0   : > { %v1317_v46 = vadd.f32 %v2652_v44, %v1316_v45  ;;  %v2827_v29 = vpop.f32.mrb[27].mxu0  ;;  %v1476_v50 = vadd.f32 %v1314_v21, %v3359_v47  ;;  %v1490_v47 = vsel %vm773_vm2, %v1478_v39, -inf  ;;  %v1493_v28 = vsel %vm773_vm2, %v1479_v62, -inf }
 0x5e1   : > { %v1469_v51 = vpop.f32.mrb[20].mxu1 }
 0x5e2   : > { %v2844_v53 = vpop.f32.mrb[21].mxu1  ;;  %v1484_v54 = vsel %vm773_vm2, %v1476_v50, -inf  ;;  %v1477_v55 = vadd.f32 %v1317_v46, %v3365_v38  ;;  %v1470_v3 = vadd.f32 %v2651_v37, %v1469_v51 }
 0x5e3   : > { %1485 = vmax.xlane.f32.xlu0 %v1484_v54  ;;  %v1472_v56 = vpop.f32.mrb[22].mxu1 }
 0x5e4   : > { %v2845_v49 = vpop.f32.mrb[23].mxu1  ;;  %v1487_v58 = vsel %vm773_vm2, %v1477_v55, -inf  ;;  %v1473_v1 = vadd.f32 %v2652_v44, %v1472_v56  ;;  %v1482_v9 = vadd.f32 %v1470_v3, %v3388_v11 }
 0x5e5   : > { %1488 = vmax.xlane.f32.xlu1 %v1487_v58  ;;  %v1417_v59 = vpop.f32.mrb[28].mxu0 }
 0x5e6   : > { %v1418_v60 = vadd.f32 %v2651_v37, %v1417_v59  ;;  %v2838_v61 = vpop.f32.mrb[29].mxu0  ;;  %v1483_v19 = vadd.f32 %v1473_v1, %v3399_v18 }
 0x5e7   : > { %1491 = vmax.xlane.f32.xlu0 %v1490_v47  ;;  %v1420_v0 = vpop.f32.mrb[30].mxu0 }
 0x5e8   : > { %v1421_v2 = vadd.f32 %v2652_v44, %v1420_v0  ;;  %v2839_v38 = vpop.f32.mrb[31].mxu0  ;;  %v1480_v13 = vadd.f32 %v1418_v60, %v3381_v63  ;;  %v1505_v20 = vsel %vm773_vm2, %v1483_v19, -inf }
 0x5ea   : > { %v3526_v6 = vadd.f32 %v1421_v2, %v3407_v24  ;;  %v1496_v57 = vsel %vm773_vm2, %v1480_v13, -inf  ;;  %v1502_v24 = vsel %vm773_vm2, %v1482_v9, -inf }
 0x5eb   : > { %1494 = vmax.xlane.f32.xlu0 %v1493_v28 }
 0x5ec   : > { %v1499_v15 = vsel %vm773_vm2, %v3526_v6, -inf }
 0x5ed   : > { %1500 = vmax.xlane.f32.xlu1 %v1499_v15 }
 0x5ef   : > { %1497 = vmax.xlane.f32.xlu0 %v1496_v57 }
 0x5f1   : > { %1506 = vmax.xlane.f32.xlu1 %v1505_v20 }
 0x5f3   : > { %1503 = vmax.xlane.f32.xlu0 %v1502_v24 }
 0x670   : > { %v1486_v31 = vpop.xlane.xlu0 %1485 }
 0x671   : > { %v1508_v63 = vsub.f32 %v1476_v50, %v1486_v31 }
 0x672   : > { %v1489_v34 = vpop.xlane.xlu1 %1488 }
 0x673   : > { %v1516_v37 = vmul.f32 1.442695, %v1508_v63  ;;  %v1509_v26 = vsub.f32 %v1477_v55, %v1489_v34 }
 0x674   : > { %v1492_v35 = vpop.xlane.xlu0 %1491 }
 0x675   : > { %v1510_v36 = vsub.f32 %v1478_v39, %v1492_v35  ;;  %v1518_v11 = vmul.f32 1.442695, %v1509_v26 }
 0x677   : > { %v1520_v18 = vmul.f32 1.442695, %v1510_v36 }
 0x678   : > { %v1495_v40 = vpop.xlane.xlu0 %1494 }
 0x679   : > { %3011 = vpow2.f32 %v1520_v18  ;;  %v1511_v41 = vsub.f32 %v1479_v62, %v1495_v40 }
 0x67a   : > { %3013 = vpow2.f32 %v1516_v37  ;;  %v1501_v61 = vpop.xlane.xlu1 %1500 }
 0x67b   : > { %v1522_v42 = vmul.f32 1.442695, %v1511_v41  ;;  %v1513_v0 = vsub.f32 %v3526_v6, %v1501_v61 }
 0x67c   : > { %v1498_v21 = vpop.xlane.xlu0 %1497 }
 0x67d   : > { %3015 = vpow2.f32 %v1522_v42  ;;  %v1512_v43 = vsub.f32 %v1480_v13, %v1498_v21  ;;  %v1526_v2 = vmul.f32 1.442695, %v1513_v0 }
 0x67e   : > { %3017 = vpow2.f32 %v1518_v11  ;;  %v1507_v47 = vpop.xlane.xlu1 %1506 }
 0x67f   : > { %v1524_v29 = vmul.f32 1.442695, %v1512_v43  ;;  %v1515_v62 = vsub.f32 %v1483_v19, %v1507_v47 }
 0x680   : > { %v1504_v44 = vpop.xlane.xlu0 %1503 }
 0x681   : > { %v1514_v45 = vsub.f32 %v1482_v9, %v1504_v44  ;;  %v1530_v1 = vmul.f32 1.442695, %v1515_v62 }
 0x683   : > { %v3012_v46 = vpop.eup %3011  ;;  %v1528_v50 = vmul.f32 1.442695, %v1514_v45 }
 0x684   : > { %v1538_v51 = vsel %vm773_vm2, %v3012_v46, 0.0  ;;  %v3014_v52 = vpop.eup %3013 }
 0x685   : > { %3019 = vpow2.f32 %v1528_v50  ;;  %1539 = vadd.xlane.f32.xlu0 %v1538_v51  ;;  %v1532_v54 = vsel %vm773_vm2, %v3014_v52, 0.0 }
 0x686   : > { %3021 = vpow2.f32 %v1524_v29 }
 0x687   : > { %v3016_v53 = vpop.eup %3015  ;;  %3023 = vpow2.f32 %v1530_v1 }
 0x688   : > { %v1541_v55 = vsel %vm773_vm2, %v3016_v53, 0.0  ;;  %v3018_v39 = vpop.eup %3017  ;;  %3025 = vpow2.f32 %v1526_v2 }
 0x689   : > { %1533 = vadd.xlane.f32.xlu0 %v1532_v54  ;;  %1542 = vadd.xlane.f32.xlu1 %v1541_v55  ;;  %v1535_v56 = vsel %vm773_vm2, %v3018_v39, 0.0 }
 0x68d   : > { %1536 = vadd.xlane.f32.xlu1 %v1535_v56 }
 0x68f   : > { %v3540_v49 = vpop.eup %3019 }
 0x690   : > { %v1550_v58 = vsel %vm773_vm2, %v3540_v49, 0.0  ;;  %v3544_v59 = vpop.eup %3021 }
 0x691   : > { %1551 = vadd.xlane.f32.xlu0 %v1550_v58  ;;  %v1544_v60 = vsel %vm773_vm2, %v3544_v59, 0.0  ;;  %v3024_v38 = vpop.eup %3023 }
 0x692   : > { %v1553_v3 = vsel %vm773_vm2, %v3024_v38, 0.0  ;;  %v3026_v28 = vpop.eup %3025 }
 0x695   : > { %1545 = vadd.xlane.f32.xlu0 %v1544_v60 }
 0x69e   : > { %1623 = vrot.lane.b32.xlu1 %v3301_v4, %s3113_s29  ;;  %v1547_v4 = vsel %vm773_vm2, %v3026_v28, 0.0 }
 0x6a2   : > { %1670 = vrot.lane.b32.xlu1 %v3313_v25, %s3113_s29 }
 0x6ab   : > { %1576 = vrot.lane.b32.xlu0 %v3303_v7, %s3113_s29 }
 0x6c6   : > { %1554 = vadd.xlane.f32.xlu1 %v1553_v3 }
 0x6ca   : > { %1548 = vadd.xlane.f32.xlu1 %v1547_v4 }
 0x6db   : > { %1717 = vrot.lane.b32.xlu1 %v3311_v22, %s3113_s29 }
 0x712   : > { %v1540_v25 = vpop.xlane.xlu0 %1539 }
 0x713   : > { %3027 = vrcp.f32 %v1540_v25 }
 0x716   : > { %v1543_v7 = vpop.xlane.xlu1 %1542  ;;  %v1534_v13 = vpop.xlane.xlu0 %1533 }
 0x717   : > { %3029 = vrcp.f32 %v1543_v7 }
 0x718   : > { %3031 = vrcp.f32 %v1534_v13 }
 0x71a   : > { %v1537_v6 = vpop.xlane.xlu1 %1536 }
 0x71b   : > { %3033 = vrcp.f32 %v1537_v6 }
 0x71d   : > { %v3028_v57 = vpop.eup %3027 }
 0x71e   : > { %v1624_v15 = vpop.permute.xlu1 %1623  ;;  %v1552_v19 = vpop.xlane.xlu0 %1551  ;;  %v1566_v20 = vmul.f32 %v3028_v57, %v3012_v46 }
 0x71f   : > { %2853 = vmatpush3.bf16.msra.mxu1 %v1624_v15  ;;  %3035 = vrcp.f32 %v1552_v19 }
 0x720   : > { %2864 = vmatprep.subr.bf16.mxu1 %v3107_v48 }
 0x721   : > { %v3030_v9 = vpop.eup %3029 }
 0x722   : > { %v1567_v24 = vmul.f32 %v3030_v9, %v3016_v53  ;;  %v1546_v31 = vpop.xlane.xlu0 %1545  ;;  %v3032_v63 = vpop.eup %3031  ;;  %v2952_v53 = vld [vmem:[%s3900_s5] sm:$0xff]  }
 0x723   : > { %v1564_v35 = vmul.f32 %v3032_v63, %v3014_v52  ;;  %v1671_v18 = vpop.permute.xlu1 %1670  ;;  %v2951_v52 = vld [vmem:[%s3900_s5 + $0x8] sm:$0xff]   ;;  %v3095_v63 = vld [vmem:[%s3210_s23 + $0x20] sm:$0xff] }
 0x724   : > { %v1573_v22 = vpack.c.bf16 %v1567_v24, %v1566_v20 }
 0x725   : > { %v3034_v34 = vpop.eup %3033 }
 0x726   : > { %v1565_v36 = vmul.f32 %v3034_v34, %v3018_v39  ;;  %2855 = vmatmul.mubr.msk.bf16.vlgmr.msra.gmra.mrb[24].mxu1 %vm773_vm2, %v1573_v22  ;;  %v1577_v37 = vpop.permute.xlu0 %1576 }
 0x727   : > { %2847 = vmatpush3.bf16.msra.mxu0 %v1577_v37  ;;  %2866 = vmatprep.mubr.msk.bf16.mxu1 %vm3108_vm1, %v3107_v48  ;;  %v3096_v37 = vld [vmem:[%s3210_s23 + $0x38] sm:$0xff] }
 0x728   : > { %v1572_v26 = vpack.c.bf16 %v1565_v36, %v1564_v35  ;;  %2858 = vmatprep.subr.bf16.mxu0 %v3107_v48 }
 0x729   : > { %v3036_v42 = vpop.eup %3035 }
 0x72a   : > { %2849 = vmatmul.mubr.msk.bf16.vlgmr.msra.gmra.mrb[32].mxu0 %vm773_vm2, %v1572_v26  ;;  %v1570_v43 = vmul.f32 %v3036_v42, %v3540_v49 }
 0x72b   : > { %2859 = vmatpush3.bf16.msra.mxu0 %v1671_v18  ;;  %2860 = vmatprep.mubr.msk.bf16.mxu0 %vm3108_vm1, %v3107_v48  ;;  %v3097_v18 = vld [vmem:[%s3210_s23 + $0x28] sm:$0xff] }
 0x72c   : > { %2870 = vmatprep.subr.bf16.mxu0 %v2951_v52 }
 0x753   : > { %v1555_v40 = vpop.xlane.xlu1 %1554 }
 0x754   : > { %3037 = vrcp.f32 %v1555_v40 }
 0x755   : > { %3039 = vrcp.f32 %v1546_v31 }
 0x757   : > { %v1549_v41 = vpop.xlane.xlu1 %1548 }
 0x758   : > { %3041 = vrcp.f32 %v1549_v41  ;;  %v3098_v41 = vld [vmem:[%s3210_s23 + $0x30] sm:$0xff] }
 0x75b   : > { %v1718_v11 = vpop.permute.xlu1 %1717 }
 0x75c   : > { %2865 = vmatpush3.bf16.msra.mxu1 %v1718_v11 }
 0x75e   : > { %v3038_v21 = vpop.eup %3037 }
 0x75f   : > { %v1571_v44 = vmul.f32 %v3038_v21, %v3024_v38  ;;  %v3040_v45 = vpop.eup %3039 }
 0x760   : > { %v1568_v50 = vmul.f32 %v3040_v45, %v3544_v59 }
 0x761   : > { %v1575_v46 = vpack.c.bf16 %v1571_v44, %v1570_v43 }
 0x762   : > { %v3042_v29 = vpop.eup %3041 }
 0x763   : > { %v1569_v51 = vmul.f32 %v3042_v29, %v3026_v28  ;;  %2867 = vmatmul.mubr.msk.bf16.vlgmr.msra.gmra.mrb[28].mxu1 %vm773_vm2, %v1575_v46 }
 0x765   : > { %v1574_v48 = vpack.c.bf16 %v1569_v51, %v1568_v50 }
 0x767   : > { %2861 = vmatmul.mubr.msk.bf16.vlgmr.msra.gmra.mrb[36].mxu0 %vm773_vm2, %v1574_v48 }
 0x768   : > { %2871 = vmatpush3.bf16.msra.mxu0 %v2951_v52 }
 0x769   : > { %2880 = vmatprep.subr.bf16.mxu0 %v2952_v53 }
 0x7f9   : > { %v1663_v54 = vpop.f32.mrb[24].mxu1 }
 0x7fa   : > { %v2856_v55 = vpop.f32.mrb[25].mxu1 }
 0x7fb   : > { %v1666_v39 = vpop.f32.mrb[26].mxu1 }
 0x7fc   : > { %v1765_v56 = vpack.c.bf16 %v1666_v39, %v1663_v54  ;;  %v2857_v49 = vpop.f32.mrb[27].mxu1 }
 0x7fd   : > { %v1616_v58 = vpop.f32.mrb[32].mxu0 }
 0x7fe   : > { %v2850_v59 = vpop.f32.mrb[33].mxu0 }
 0x7ff   : > { %v1619_v60 = vpop.f32.mrb[34].mxu0 }
 0x800   : > { %v1764_v61 = vpack.c.bf16 %v1619_v60, %v1616_v58  ;;  %v2851_v47 = vpop.f32.mrb[35].mxu0 }
 0x802   : > { %2872 = vmatprep.mubr.msk.bf16.mxu0 %vm773_vm2, %v1764_v61 }
 0x803   : > { %2873 = vmatmul.mubr.msk.bf16.vlgmr.msra.gmra.mrb[40].mxu0 %vm773_vm2, %v1765_v56 }
 0x804   : > { %2881 = vmatpush3.bf16.msra.mxu0 %v2952_v53 }
 0x836   : > { %v1757_v62 = vpop.f32.mrb[28].mxu1 }
 0x837   : > { %v2868_v0 = vpop.f32.mrb[29].mxu1 }
 0x838   : > { %v1760_v1 = vpop.f32.mrb[30].mxu1 }
 0x839   : > { %v1767_v2 = vpack.c.bf16 %v1760_v1, %v1757_v62  ;;  %v2869_v38 = vpop.f32.mrb[31].mxu1 }
 0x83a   : > { %v1710_v3 = vpop.f32.mrb[36].mxu0 }
 0x83b   : > { %v2862_v28 = vpop.f32.mrb[37].mxu0 }
 0x83c   : > { %v1713_v4 = vpop.f32.mrb[38].mxu0 }
 0x83d   : > { %v1766_v25 = vpack.c.bf16 %v1713_v4, %v1710_v3  ;;  %v2863_v7 = vpop.f32.mrb[39].mxu0 }
 0x83f   : > { %2876 = vmatprep.mubr.msk.bf16.mxu0 %vm773_vm2, %v1766_v25 }
 0x840   : > { %2877 = vmatmul.mubr.msk.bf16.gmra.mrb[44].mxu0 %vm773_vm2, %v1767_v2 }
 0x841   : > { %2882 = vmatprep.mubr.msk.bf16.mxu0 %vm773_vm2, %v1259_v17 }
 0x848   : > { %2883 = vmatmul.mubr.msk.bf16.vlgmr.msra.gmra.mrb[40].mxu0 %vm773_vm2, %v1260_v12  ;;  %v3092_v12 = vld [vmem:[%s3210_s23] sm:$0xff] }
 0x849   : > { %2886 = vmatprep.mubr.msk.bf16.mxu0 %vm773_vm2, %v1261_v33  ;;  %v3093_v33 = vld [vmem:[%s3210_s23 + $0x8] sm:$0xff] }
 0x850   : > { %2887 = vmatmul.mubr.msk.bf16.gmra.mrb[44].mxu0 %vm773_vm2, %v1262_v27 }
 0x91b   : > { %v2884_v13 = vpop.f32.mrb[40].mxu0 }
 0x91c   : > { %v1906_v16 = vpop.f32.mrb[41].mxu0  ;;  %v1939_v10 = vadd.f32 %v3091_v5, %v2884_v13 }
 0x91d   : > { %v1937_v17 = vadd.f32 %v3092_v12, %v1906_v16  ;;  %v2885_v6 = vpop.f32.mrb[42].mxu0 }
 0x91e   : > { %v1909_v30 = vpop.f32.mrb[43].mxu0  ;;  %v3601_v8 = vadd.f32 %v2673_v14, %v1939_v10  ;;  %v1940_v27 = vadd.f32 %v3094_v23, %v2885_v6 }
 0x91f   : > { %v3598_v32 = vadd.f32 %v2673_v14, %v1937_v17  ;;  %v1938_v15 = vadd.f32 %v3093_v33, %v1909_v30 }
 0x920   : > { %v3610_v31 = vadd.f32 %v2673_v14, %v1940_v27  ;;  %v1968_v35 = vsel %vm506_vm0, %v3601_v8, 0.0 }
 0x921   : > { %v3604_v19 = vadd.f32 %v2673_v14, %v1938_v15  ;;  %v1962_v57 = vsel %vm506_vm0, %v3598_v32, 0.0 }
 0x922   : > { %1963 = vadd.xlane.f32.xlu0 %v1962_v57  ;;  %v1971_v43 = vsel %vm506_vm0, %v3610_v31, 0.0 }
 0x923   : > { %v2888_v9 = vpop.f32.mrb[44].mxu0  ;;  %v1965_v20 = vsel %vm506_vm0, %v3604_v19, 0.0 }
 0x924   : > { %1966 = vadd.xlane.f32.xlu1 %v1965_v20  ;;  %v1922_v24 = vpop.f32.mrb[45].mxu0  ;;  %v1943_v11 = vadd.f32 %v3098_v41, %v2888_v9 }
 0x925   : > { %v1941_v22 = vadd.f32 %v3095_v63, %v1922_v24  ;;  %v2889_v34 = vpop.f32.mrb[46].mxu0  ;;  %v2953_v63 = vld [vmem:[%s3906_s11] sm:$0xff]  }
 0x926   : > { %1969 = vadd.xlane.f32.xlu0 %v1968_v35  ;;  %v1925_v36 = vpop.f32.mrb[47].mxu0  ;;  %v1944_v26 = vadd.f32 %v3096_v37, %v2889_v34  ;;  %v3628_v46 = vadd.f32 %v2673_v14, %v1943_v11  ;;  %2890 = vmatprep.subr.bf16.mxu1 %v2953_v63 }
 0x927   : > { %v1942_v40 = vadd.f32 %v3097_v18, %v1925_v36  ;;  %v3618_v42 = vadd.f32 %v2673_v14, %v1941_v22  ;;  %2891 = vmatpush3.bf16.msra.mxu1 %v2953_v63  ;;  %v2954_v22 = vld [vmem:[%s3906_s11 + $0x8] sm:$0xff]  }
 0x928   : > { %v3624_v44 = vadd.f32 %v2673_v14, %v1944_v26  ;;  %v1980_v51 = vsel %vm506_vm0, %v3628_v46, 0.0  ;;  %2892 = vmatprep.subr.bf16.mxu1 %v2954_v22 }
 0x929   : > { %v3620_v21 = vadd.f32 %v2673_v14, %v1942_v40  ;;  %v1974_v29 = vsel %vm506_vm0, %v3618_v42, 0.0 }
 0x92a   : > { %1972 = vadd.xlane.f32.xlu0 %v1971_v43  ;;  %v1983_v50 = vsel %vm506_vm0, %v3624_v44, 0.0 }
 0x92b   : > { %v1977_v45 = vsel %vm506_vm0, %v3620_v21, 0.0  ;;  %2893 = vmatpush3.bf16.msra.mxu1 %v2954_v22 }
 0x92c   : > { %1978 = vadd.xlane.f32.xlu1 %v1977_v45 }
 0x92e   : > { %1975 = vadd.xlane.f32.xlu0 %v1974_v29 }
 0x930   : > { %1984 = vadd.xlane.f32.xlu1 %v1983_v50 }
 0x932   : > { %1981 = vadd.xlane.f32.xlu0 %v1980_v51 }
 0x9af   : > { %v1964_v48 = vpop.xlane.xlu0 %1963 }
 0x9b0   : > { %v1986_v52 = vmul.f32 0.03125, %v1964_v48 }
 0x9b1   : > { %v1967_v53 = vpop.xlane.xlu1 %1966 }
 0x9b2   : > { %v3637_v54 = vsub.f32 %v3598_v32, %v1986_v52  ;;  %v1987_v55 = vmul.f32 0.03125, %v1967_v53 }
 0x9b3   : > { %v1970_v39 = vpop.xlane.xlu0 %1969 }
 0x9b4   : > { %v3640_v56 = vsub.f32 %v3604_v19, %v1987_v55  ;;  %v1988_v49 = vmul.f32 0.03125, %v1970_v39  ;;  %v2002_v58 = vmul.f32 %v3637_v54, %v3637_v54  ;;  %v2674_v55 = vld [vmem:[%s3904_s9] ss:$0 sm:$0xff] }
 0x9b6   : > { %v3645_v59 = vsub.f32 %v3601_v8, %v1988_v49  ;;  %v2010_v60 = vsel %vm506_vm0, %v2002_v58, 0.0  ;;  %v2003_v61 = vmul.f32 %v3640_v56, %v3640_v56 }
 0x9b7   : > { %v1973_v47 = vpop.xlane.xlu0 %1972  ;;  %2011 = vadd.xlane.f32.xlu0 %v2010_v60 }
 0x9b8   : > { %v1989_v62 = vmul.f32 0.03125, %v1973_v47  ;;  %v2013_v0 = vsel %vm506_vm0, %v2003_v61, 0.0  ;;  %v2004_v1 = vmul.f32 %v3645_v59, %v3645_v59 }
 0x9b9   : > { %2014 = vadd.xlane.f32.xlu1 %v2013_v0  ;;  %v1979_v2 = vpop.xlane.xlu1 %1978 }
 0x9ba   : > { %v3654_v38 = vsub.f32 %v3610_v31, %v1989_v62  ;;  %v1991_v3 = vmul.f32 0.03125, %v1979_v2  ;;  %v2016_v28 = vsel %vm506_vm0, %v2004_v1, 0.0 }
 0x9bb   : > { %2017 = vadd.xlane.f32.xlu0 %v2016_v28  ;;  %v1976_v4 = vpop.xlane.xlu0 %1975 }
 0x9bc   : > { %v3658_v25 = vsub.f32 %v3620_v21, %v1991_v3  ;;  %v1990_v7 = vmul.f32 0.03125, %v1976_v4  ;;  %v2005_v13 = vmul.f32 %v3654_v38, %v3654_v38 }
 0x9bd   : > { %v1985_v14 = vpop.xlane.xlu1 %1984 }
 0x9be   : > { %v3663_v16 = vsub.f32 %v3618_v42, %v1990_v7  ;;  %v1993_v5 = vmul.f32 0.03125, %v1985_v14  ;;  %v2019_v10 = vsel %vm506_vm0, %v2005_v13, 0.0  ;;  %v2007_v12 = vmul.f32 %v3658_v25, %v3658_v25  ;;  %v2675_v7 = vld [vmem:[%s3905_s10] ss:$0 sm:$0xff] }
 0x9bf   : > { %v1982_v17 = vpop.xlane.xlu0 %1981  ;;  %2020 = vadd.xlane.f32.xlu1 %v2019_v10 }
 0x9c0   : > { %v3669_v6 = vsub.f32 %v3624_v44, %v1993_v5  ;;  %v1992_v30 = vmul.f32 0.03125, %v1982_v17  ;;  %v2006_v33 = vmul.f32 %v3663_v16, %v3663_v16  ;;  %v2025_v27 = vsel %vm506_vm0, %v2007_v12, 0.0 }
 0x9c2   : > { %v3674_v15 = vsub.f32 %v3628_v46, %v1992_v30  ;;  %v2022_v23 = vsel %vm506_vm0, %v2006_v33, 0.0  ;;  %v2009_v57 = vmul.f32 %v3669_v6, %v3669_v6 }
 0x9c3   : > { %2023 = vadd.xlane.f32.xlu0 %v2022_v23  ;;  %2026 = vadd.xlane.f32.xlu1 %v2025_v27 }
 0x9c4   : > { %v2008_v9 = vmul.f32 %v3674_v15, %v3674_v15  ;;  %v2031_v24 = vsel %vm506_vm0, %v2009_v57, 0.0 }
 0x9c6   : > { %v2028_v20 = vsel %vm506_vm0, %v2008_v9, 0.0 }
 0x9c7   : > { %2029 = vadd.xlane.f32.xlu0 %v2028_v20  ;;  %2032 = vadd.xlane.f32.xlu1 %v2031_v24 }
 0xa44   : > { %v2012_v34 = vpop.xlane.xlu0 %2011 }
 0xa45   : > { %v2034_v35 = vmul.f32 0.03125, %v2012_v34 }
 0xa46   : > { %v2015_v36 = vpop.xlane.xlu1 %2014 }
 0xa47   : > { %v2042_v37 = vadd.f32 1e-05, %v2034_v35  ;;  %v2035_v26 = vmul.f32 0.03125, %v2015_v36 }
 0xa48   : > { %v2018_v18 = vpop.xlane.xlu0 %2017 }
 0xa49   : > { %3043 = vrsqrt.f32 %v2042_v37  ;;  %v2043_v40 = vadd.f32 1e-05, %v2035_v26  ;;  %v2036_v41 = vmul.f32 0.03125, %v2018_v18 }
 0xa4b   : > { %3045 = vrsqrt.f32 %v2043_v40  ;;  %v2044_v11 = vadd.f32 1e-05, %v2036_v41 }
 0xa4c   : > { %v2021_v43 = vpop.xlane.xlu1 %2020 }
 0xa4d   : > { %3047 = vrsqrt.f32 %v2044_v11  ;;  %v2037_v45 = vmul.f32 0.03125, %v2021_v43  ;;  %v2957_v11 = vld [vmem:[%s3908_s13 + $0x10] sm:$0xff]   ;;  %v2958_v43 = vld [vmem:[%s3908_s13 + $0x18] sm:$0xff]  }
 0xa4f   : > { %v2045_v29 = vadd.f32 1e-05, %v2037_v45  ;;  %v2959_v45 = vld [vmem:[%s3908_s13 + $0x20] sm:$0xff]  }
 0xa50   : > { %v2024_v50 = vpop.xlane.xlu0 %2023  ;;  %v2027_v51 = vpop.xlane.xlu1 %2026 }
 0xa51   : > { %3049 = vrsqrt.f32 %v2045_v29  ;;  %v2038_v48 = vmul.f32 0.03125, %v2024_v50  ;;  %v2039_v52 = vmul.f32 0.03125, %v2027_v51  ;;  %v2960_v29 = vld [vmem:[%s3908_s13 + $0x28] sm:$0xff]   ;;  %v2961_v50 = vld [vmem:[%s3908_s13 + $0x30] sm:$0xff]   ;;  %v2962_v51 = vld [vmem:[%s3908_s13 + $0x38] sm:$0xff]  }
 0xa53   : > { %v3044_v53 = vpop.eup %3043  ;;  %v2046_v39 = vadd.f32 1e-05, %v2038_v48  ;;  %v2047_v49 = vadd.f32 1e-05, %v2039_v52  ;;  %v2676_v48 = vld [vmem:[%s3907_s12] ss:$0 sm:$0xff] }
 0xa54   : > { %v2058_v58 = vmul.f32 %v3044_v53, %v3637_v54  ;;  %v2030_v60 = vpop.xlane.xlu0 %2029  ;;  %v2033_v61 = vpop.xlane.xlu1 %2032 }
 0xa55   : > { %v3046_v47 = vpop.eup %3045  ;;  %3051 = vrsqrt.f32 %v2046_v39  ;;  %v2040_v62 = vmul.f32 0.03125, %v2030_v60  ;;  %v2041_v0 = vmul.f32 0.03125, %v2033_v61 }
 0xa56   : > { %v2059_v1 = vmul.f32 %v3046_v47, %v3640_v56  ;;  %3053 = vrsqrt.f32 %v2047_v49  ;;  %v2072_v2 = vmul.f32 %v2674_v55, %v2058_v58 }
 0xa57   : > { %v3048_v3 = vpop.eup %3047  ;;  %v2048_v28 = vadd.f32 1e-05, %v2040_v62  ;;  %v2049_v4 = vadd.f32 1e-05, %v2041_v0 }
 0xa58   : > { %v2060_v13 = vmul.f32 %v3048_v3, %v3645_v59  ;;  %v2073_v54 = vmul.f32 %v2674_v55, %v2059_v1  ;;  %v2086_v14 = vadd.f32 %v2675_v7, %v2072_v2 }
 0xa59   : > { %3055 = vrsqrt.f32 %v2048_v28 }
 0xa5a   : > { %3057 = vrsqrt.f32 %v2049_v4  ;;  %v2087_v5 = vadd.f32 %v2675_v7, %v2073_v54  ;;  %v2074_v12 = vmul.f32 %v2674_v55, %v2060_v13 }
 0xa5b   : > { %v3050_v10 = vpop.eup %3049 }
 0xa5c   : > { %v2061_v56 = vmul.f32 %v3050_v10, %v3654_v38  ;;  %v2094_v17 = vpack.c.bf16 %v2087_v5, %v2086_v14  ;;  %v2088_v57 = vadd.f32 %v2675_v7, %v2074_v12 }
 0xa5e   : > { %v2075_v30 = vmul.f32 %v2674_v55, %v2061_v56  ;;  %2894 = vmatprep.mubr.msk.bf16.mxu1 %vm506_vm0, %v2094_v17 }
 0xa5f   : > { %v3052_v33 = vpop.eup %3051 }
 0xa60   : > { %v3054_v23 = vpop.eup %3053  ;;  %v2062_v27 = vmul.f32 %v3052_v33, %v3663_v16  ;;  %v2089_v9 = vadd.f32 %v2675_v7, %v2075_v30 }
 0xa61   : > { %v2063_v59 = vmul.f32 %v3054_v23, %v3658_v25 }
 0xa62   : > { %v2095_v20 = vpack.c.bf16 %v2089_v9, %v2088_v57  ;;  %v2076_v24 = vmul.f32 %v2674_v55, %v2062_v27 }
 0xa63   : > { %v3056_v63 = vpop.eup %3055  ;;  %v2077_v22 = vmul.f32 %v2674_v55, %v2063_v59 }
 0xa64   : > { %v3058_v34 = vpop.eup %3057  ;;  %v2064_v35 = vmul.f32 %v3056_v63, %v3674_v15  ;;  %2895 = vmatmul.mubr.msk.bf16.vlgmr.msra.gmra.mrb[32].mxu1 %vm506_vm0, %v2095_v20  ;;  %v2090_v38 = vadd.f32 %v2675_v7, %v2076_v24  ;;  %v2955_v15 = vld [vmem:[%s3908_s13] sm:$0xff]  }
 0xa65   : > { %v2065_v36 = vmul.f32 %v3058_v34, %v3669_v6  ;;  %v2091_v37 = vadd.f32 %v2675_v7, %v2077_v22  ;;  %2902 = vmatprep.subr.bf16.mxu1 %v2955_v15  ;;  %v2956_v6 = vld [vmem:[%s3908_s13 + $0x8] sm:$0xff]  }
 0xa66   : > { %v2078_v26 = vmul.f32 %v2674_v55, %v2064_v35  ;;  %2903 = vmatpush3.bf16.msra.mxu1 %v2955_v15 }
 0xa67   : > { %v2096_v18 = vpack.c.bf16 %v2091_v37, %v2090_v38  ;;  %v2079_v16 = vmul.f32 %v2674_v55, %v2065_v36  ;;  %2904 = vmatprep.subr.bf16.mxu1 %v2956_v6 }
 0xa68   : > { %v2092_v40 = vadd.f32 %v2675_v7, %v2078_v26 }
 0xa69   : > { %2898 = vmatprep.mubr.msk.bf16.mxu1 %vm506_vm0, %v2096_v18  ;;  %v2093_v25 = vadd.f32 %v2675_v7, %v2079_v16 }
 0xa6a   : > { %2905 = vmatpush3.bf16.msra.mxu1 %v2956_v6 }
 0xa6b   : > { %v2097_v41 = vpack.c.bf16 %v2093_v25, %v2092_v40  ;;  %2906 = vmatprep.subr.bf16.mxu1 %v2957_v11 }
 0xa6d   : > { %2899 = vmatmul.mubr.msk.bf16.gmra.mrb[36].mxu1 %vm506_vm0, %v2097_v41 }
 0xa6e   : > { %2907 = vmatpush3.bf16.msra.mxu1 %v2957_v11 }
 0xa6f   : > { %2908 = vmatprep.subr.bf16.mxu1 %v2958_v43 }
 0xa72   : > { %2909 = vmatpush3.bf16.msra.mxu1 %v2958_v43 }
 0xa73   : > { %2910 = vmatprep.subr.bf16.mxu1 %v2959_v45 }
 0xa76   : > { %2911 = vmatpush3.bf16.msra.mxu1 %v2959_v45 }
 0xa77   : > { %2912 = vmatprep.subr.bf16.mxu1 %v2960_v29 }
 0xa7a   : > { %2913 = vmatpush3.bf16.msra.mxu1 %v2960_v29 }
 0xa7b   : > { %2914 = vmatprep.subr.bf16.mxu1 %v2961_v50 }
 0xa7e   : > { %2915 = vmatpush3.bf16.msra.mxu1 %v2961_v50 }
 0xa7f   : > { %2916 = vmatprep.subr.bf16.mxu1 %v2962_v51 }
 0xa82   : > { %2917 = vmatpush3.bf16.msra.mxu1 %v2962_v51 }
 0xb37   : > { %v2896_v52 = vpop.f32.mrb[32].mxu1 }
 0xb38   : > { %v2176_v53 = vadd.f32 %v2896_v52, %v2676_v48  ;;  %v2167_v55 = vpop.f32.mrb[33].mxu1 }
 0xb39   : > { %v3735_v39 = vadd.f32 %v2676_v48, %v2167_v55  ;;  %v2897_v49 = vpop.f32.mrb[34].mxu1 }
 0xb3a   : > { %v3737_v58 = vmul.f32 0.70710677, %v2176_v53  ;;  %v3739_v60 = vadd.f32 %v2897_v49, %v2676_v48  ;;  %v2170_v61 = vpop.f32.mrb[35].mxu1  ;;  %v3779_v40 = vmul.f32 0.5, %v2176_v53 }
 0xb3b   : > { %v3742_v47 = vmul.f32 0.70710677, %v3735_v39  ;;  %v3744_v62 = vadd.f32 %v2676_v48, %v2170_v61 }
 0xb3c   : > { %v2216_v0 = vand.u32 2147483647, %v3737_v58  ;;  %v3748_v1 = vmul.f32 0.70710677, %v3739_v60  ;;  %vm2376_vm3 = vcmp.ge.f32.partialorder %v3737_v58, 0.0 }
 0xb3d   : > { %v2214_v2 = vand.u32 2147483647, %v3742_v47  ;;  %v3752_v3 = vmul.f32 0.70710677, %v3744_v62  ;;  %vm2374_vm4 = vcmp.ge.f32.partialorder %v3742_v47, 0.0 }
 0xb3e   : > { %v2224_v28 = vmul.f32 0.3275911, %v2216_v0  ;;  %v2217_v4 = vand.u32 2147483647, %v3748_v1  ;;  %v2328_v24 = vsub.f32 0.0, %v2216_v0  ;;  %vm2377_vm5 = vcmp.ge.f32.partialorder %v3748_v1, 0.0 }
 0xb3f   : > { %v2222_v7 = vmul.f32 0.3275911, %v2214_v2  ;;  %v2215_v13 = vand.u32 2147483647, %v3752_v3  ;;  %v2326_v34 = vsub.f32 0.0, %v2214_v2  ;;  %vm2375_vm6 = vcmp.ge.f32.partialorder %v3752_v3, 0.0 }
 0xb40   : > { %v2232_v54 = vadd.f32 1.0, %v2224_v28  ;;  %v2225_v14 = vmul.f32 0.3275911, %v2217_v4  ;;  %v2900_v5 = vpop.f32.mrb[36].mxu1  ;;  %v2329_v38 = vsub.f32 0.0, %v2217_v4  ;;  %v2336_v25 = vmul.f32 %v2328_v24, %v2216_v0 }
 0xb41   : > { %v2230_v10 = vadd.f32 1.0, %v2222_v7  ;;  %v2223_v12 = vmul.f32 0.3275911, %v2215_v13  ;;  %v2183_v56 = vpop.f32.mrb[37].mxu1  ;;  %v3756_v27 = vadd.f32 %v2900_v5, %v2676_v48  ;;  %v2327_v36 = vsub.f32 0.0, %v2215_v13 }
 0xb42   : > { %3059 = vrcp.f32 %v2232_v54  ;;  %v2233_v17 = vadd.f32 1.0, %v2225_v14  ;;  %v2901_v30 = vpop.f32.mrb[38].mxu1  ;;  %v3758_v57 = vadd.f32 %v2676_v48, %v2183_v56  ;;  %v2334_v11 = vmul.f32 %v2326_v34, %v2214_v2 }
 0xb43   : > { %3061 = vrcp.f32 %v2230_v10  ;;  %v2186_v33 = vpop.f32.mrb[39].mxu1  ;;  %v2231_v23 = vadd.f32 1.0, %v2223_v12  ;;  %v3760_v9 = vadd.f32 %v2901_v30, %v2676_v48  ;;  %v3763_v59 = vmul.f32 0.70710677, %v3756_v27 }
 0xb44   : > { %3063 = vrcp.f32 %v2233_v17  ;;  %v3765_v20 = vadd.f32 %v2676_v48, %v2186_v33  ;;  %v3768_v63 = vmul.f32 0.70710677, %v3758_v57  ;;  %v2337_v48 = vmul.f32 %v2329_v38, %v2217_v4 }
 0xb45   : > { %v3771_v22 = vmul.f32 0.70710677, %v3760_v9  ;;  %3065 = vrcp.f32 %v2231_v23  ;;  %v2220_v35 = vand.u32 2147483647, %v3763_v59  ;;  %v2335_v52 = vmul.f32 %v2327_v36, %v2215_v13 }
 0xb46   : > { %v2218_v37 = vand.u32 2147483647, %v3768_v63  ;;  %v3777_v16 = vmul.f32 0.70710677, %v3765_v20  ;;  %v2346_v28 = vmul.f32 1.442695, %v2336_v25 }
 0xb47   : > { %v2221_v26 = vand.u32 2147483647, %v3771_v22  ;;  %v2228_v18 = vmul.f32 0.3275911, %v2220_v35  ;;  %v2332_v45 = vsub.f32 0.0, %v2220_v35  ;;  %vm2380_vm7 = vcmp.ge.f32.partialorder %v3763_v59, 0.0 }
 0xb48   : > { %v2226_v41 = vmul.f32 0.3275911, %v2218_v37  ;;  %v2219_v29 = vand.u32 2147483647, %v3777_v16  ;;  %v2330_v49 = vsub.f32 0.0, %v2218_v37  ;;  %vm2381_vm8 = vcmp.ge.f32.partialorder %v3771_v22, 0.0 }
 0xb49   : > { %v2229_v15 = vmul.f32 0.3275911, %v2221_v26  ;;  %v2236_v43 = vadd.f32 1.0, %v2228_v18  ;;  %v2342_v14 = vmul.f32 1.442695, %v2334_v11  ;;  %v2340_v5 = vmul.f32 %v2332_v45, %v2220_v35 }
 0xb4a   : > { %v2234_v55 = vadd.f32 1.0, %v2226_v41  ;;  %v2227_v2 = vmul.f32 0.3275911, %v2219_v29  ;;  %v2333_v10 = vsub.f32 0.0, %v2221_v26  ;;  %v2348_v13 = vmul.f32 1.442695, %v2337_v48 }
 0xb4b   : > { %3067 = vrcp.f32 %v2236_v43  ;;  %v2237_v61 = vadd.f32 1.0, %v2229_v15  ;;  %v2344_v33 = vmul.f32 1.442695, %v2335_v52  ;;  %v2338_v23 = vmul.f32 %v2330_v49, %v2218_v37 }
 0xb4c   : > { %v3781_v6 = vpop.eup %3059  ;;  %3069 = vrcp.f32 %v2234_v55  ;;  %v2235_v56 = vadd.f32 1.0, %v2227_v2  ;;  %v2354_v36 = vmul.f32 1.442695, %v2340_v5  ;;  %v2341_v18 = vmul.f32 %v2333_v10, %v2221_v26 }
 0xb4d   : > { %v3784_v50 = vpop.eup %3061  ;;  %v2256_v51 = vmul.f32 1.0614054, %v3781_v6  ;;  %3071 = vrcp.f32 %v2237_v61  ;;  %v2350_v37 = vmul.f32 1.442695, %v2338_v23  ;;  %v2331_v43 = vsub.f32 0.0, %v2219_v29 }
 0xb4e   : > { %v2254_v53 = vmul.f32 1.0614054, %v3784_v50  ;;  %v3788_v7 = vpop.eup %3063  ;;  %3073 = vpow2.f32 %v2346_v28  ;;  %v3803_v26 = vmul.f32 0.5, %v3735_v39  ;;  %vm2378_vm9 = vcmp.ge.f32.partialorder %v3768_v63, 0.0 }
 0xb4f   : > { %v2264_v0 = vadd.f32 -1.4531521, %v2256_v51  ;;  %v2257_v4 = vmul.f32 1.0614054, %v3788_v7  ;;  %v3792_v17 = vpop.eup %3065  ;;  %3075 = vrcp.f32 %v2235_v56  ;;  %v2339_v5 = vmul.f32 %v2331_v43, %v2219_v29 }
 0xb50   : > { %v2262_v54 = vadd.f32 -1.4531521, %v2254_v53  ;;  %v2255_v38 = vmul.f32 1.0614054, %v3792_v17  ;;  %3077 = vpow2.f32 %v2342_v14  ;;  %v2356_v53 = vmul.f32 1.442695, %v2341_v18 }
 0xb51   : > { %v2272_v12 = vmul.f32 %v3781_v6, %v2264_v0  ;;  %v2265_v34 = vadd.f32 -1.4531521, %v2257_v4  ;;  %3079 = vpow2.f32 %v2348_v13  ;;  %vm2379_vm10 = vcmp.ge.f32.partialorder %v3777_v16, 0.0 }
 0xb52   : > { %v2270_v30 = vmul.f32 %v3784_v50, %v2262_v54  ;;  %v2263_v15 = vadd.f32 -1.4531521, %v2255_v38  ;;  %3081 = vpow2.f32 %v2344_v33 }
 0xb53   : > { %v2280_v24 = vadd.f32 1.4214138, %v2272_v12  ;;  %v2273_v41 = vmul.f32 %v3788_v7, %v2265_v34  ;;  %3083 = vpow2.f32 %v2354_v36 }
 0xb54   : > { %v2278_v35 = vadd.f32 1.4214138, %v2270_v30  ;;  %v2271_v48 = vmul.f32 %v3792_v17, %v2263_v15  ;;  %3085 = vpow2.f32 %v2350_v37  ;;  %v3817_v30 = vmul.f32 0.5, %v3739_v60 }
 0xb55   : > { %v2288_v25 = vmul.f32 %v3781_v6, %v2280_v24  ;;  %v2281_v51 = vadd.f32 1.4214138, %v2273_v41  ;;  %v3800_v52 = vpop.eup %3067  ;;  %3087 = vpow2.f32 %v2356_v53 }
 0xb56   : > { %v2286_v11 = vmul.f32 %v3784_v50, %v2278_v35  ;;  %v3805_v49 = vpop.eup %3069  ;;  %v2279_v28 = vadd.f32 1.4214138, %v2271_v48  ;;  %v2260_v2 = vmul.f32 1.0614054, %v3800_v52 }
 0xb57   : > { %v2296_v45 = vadd.f32 -0.28449672, %v2288_v25  ;;  %v2289_v0 = vmul.f32 %v3788_v7, %v2281_v51  ;;  %v2258_v14 = vmul.f32 1.0614054, %v3805_v49  ;;  %v3813_v13 = vpop.eup %3071  ;;  %v2352_v25 = vmul.f32 1.442695, %v2339_v5 }
 0xb58   : > { %v2294_v55 = vadd.f32 -0.28449672, %v2286_v11  ;;  %v2287_v12 = vmul.f32 %v3792_v17, %v2279_v28  ;;  %v2268_v4 = vadd.f32 -1.4531521, %v2260_v2  ;;  %v3074_v23 = vpop.eup %3073  ;;  %v2261_v60 = vmul.f32 1.0614054, %v3813_v13 }
 0xb59   : > { %v2304_v61 = vmul.f32 %v3781_v6, %v2296_v45  ;;  %v2297_v10 = vadd.f32 -0.28449672, %v2289_v0  ;;  %v2266_v33 = vadd.f32 -1.4531521, %v2258_v14  ;;  %v3823_v35 = vpop.eup %3075  ;;  %3089 = vpow2.f32 %v2352_v25 }
 0xb5a   : > { %v2302_v54 = vmul.f32 %v3784_v50, %v2294_v55  ;;  %v2295_v34 = vadd.f32 -0.28449672, %v2287_v12  ;;  %v2276_v38 = vmul.f32 %v3800_v52, %v2268_v4  ;;  %v3078_v41 = vpop.eup %3077  ;;  %v2269_v48 = vadd.f32 -1.4531521, %v2261_v60 }
 0xb5b   : > { %v2312_v39 = vadd.f32 0.2548296, %v2304_v61  ;;  %v2305_v29 = vmul.f32 %v3788_v7, %v2297_v10  ;;  %v2274_v18 = vmul.f32 %v3805_v49, %v2266_v33  ;;  %v3080_v43 = vpop.eup %3079  ;;  %v2259_v55 = vmul.f32 1.0614054, %v3823_v35 }
 0xb5c   : > { %v2310_v56 = vadd.f32 0.2548296, %v2302_v54  ;;  %v2284_v37 = vadd.f32 1.4214138, %v2276_v38  ;;  %v2277_v5 = vmul.f32 %v3813_v13, %v2269_v48 }
 0xb5d   : > { %v2320_v24 = vmul.f32 %v3781_v6, %v2312_v39  ;;  %v2313_v11 = vadd.f32 0.2548296, %v2305_v29  ;;  %v2303_v6 = vmul.f32 %v3792_v17, %v2295_v34  ;;  %v2282_v51 = vadd.f32 1.4214138, %v2274_v18 }
 0xb5e   : > { %v2318_v36 = vmul.f32 %v3784_v50, %v2310_v56  ;;  %v3082_v50 = vpop.eup %3081  ;;  %v2292_v28 = vmul.f32 %v3800_v52, %v2284_v37  ;;  %v2267_v39 = vadd.f32 -1.4531521, %v2259_v55  ;;  %v2285_v29 = vadd.f32 1.4214138, %v2277_v5 }
 0xb5f   : > { %v2360_v15 = vmul.f32 %v3074_v23, %v2320_v24  ;;  %v2321_v61 = vmul.f32 %v3788_v7, %v2313_v11  ;;  %v2311_v0 = vadd.f32 0.2548296, %v2303_v6  ;;  %v3084_v2 = vpop.eup %3083  ;;  %v2290_v14 = vmul.f32 %v3805_v49, %v2282_v51 }
 0xb60   : > { %v2358_v45 = vmul.f32 %v3078_v41, %v2318_v36  ;;  %v2300_v56 = vadd.f32 -0.28449672, %v2292_v28  ;;  %v3086_v33 = vpop.eup %3085  ;;  %v2275_v7 = vmul.f32 %v3823_v35, %v2267_v39 }
 0xb61   : > { %v2368_v53 = vsub.f32 1.0, %v2360_v15  ;;  %v2361_v12 = vmul.f32 %v3080_v43, %v2321_v61  ;;  %v2319_v4 = vmul.f32 %v3792_v17, %v2311_v0  ;;  %v2298_v24 = vadd.f32 -0.28449672, %v2290_v14  ;;  %v3088_v60 = vpop.eup %3087 }
 0xb62   : > { %v2366_v54 = vsub.f32 1.0, %v2358_v45  ;;  %v2308_v18 = vmul.f32 %v3800_v52, %v2300_v56  ;;  %v2293_v15 = vmul.f32 %v3813_v13, %v2285_v29  ;;  %v2283_v51 = vadd.f32 1.4214138, %v2275_v7 }
 0xb63   : > { %v2384_v10 = vsub.f32 0.0, %v2368_v53  ;;  %v2369_v38 = vsub.f32 1.0, %v2361_v12  ;;  %v2359_v36 = vmul.f32 %v3082_v50, %v2319_v4  ;;  %v2306_v17 = vmul.f32 %v3805_v49, %v2298_v24 }
 0xb64   : > { %v2382_v23 = vsub.f32 0.0, %v2366_v54  ;;  %v2316_v43 = vadd.f32 0.2548296, %v2308_v18  ;;  %v2301_v45 = vadd.f32 -0.28449672, %v2293_v15  ;;  %v2291_v28 = vmul.f32 %v3823_v35, %v2283_v51 }
 0xb65   : > { %v2392_v34 = vsel %vm2376_vm3, %v2368_v53, %v2384_v10  ;;  %v2385_v6 = vsub.f32 0.0, %v2369_v38  ;;  %v2367_v37 = vsub.f32 1.0, %v2359_v36  ;;  %v2314_v58 = vadd.f32 0.2548296, %v2306_v17 }
 0xb66   : > { %v2390_v41 = vsel %vm2374_vm4, %v2366_v54, %v2382_v23  ;;  %v2400_v11 = vadd.f32 1.0, %v2392_v34  ;;  %v2324_v50 = vmul.f32 %v3800_v52, %v2316_v43  ;;  %v2309_v0 = vmul.f32 %v3813_v13, %v2301_v45 }
 0xb67   : > { %v2398_v48 = vadd.f32 1.0, %v2390_v41  ;;  %v2393_v55 = vsel %vm2377_vm5, %v2369_v38, %v2385_v6  ;;  %v2383_v47 = vsub.f32 0.0, %v2367_v37  ;;  %v2322_v61 = vmul.f32 %v3805_v49, %v2314_v58 }
 0xb68   : > { %v2401_v53 = vadd.f32 1.0, %v2393_v55  ;;  %v2408_v54 = vmul.f32 %v2400_v11, %v3779_v40  ;;  %v2199_v14 = vmul.f32 0.5, %v3744_v62  ;;  %v2364_v5 = vmul.f32 %v3084_v2, %v2324_v50  ;;  %v3090_v2 = vpop.eup %3089 }
 0xb69   : > { %v2391_v25 = vsel %vm2375_vm6, %v2367_v37, %v2383_v47  ;;  %v2362_v10 = vmul.f32 %v3086_v33, %v2322_v61  ;;  %v2317_v52 = vadd.f32 0.2548296, %v2309_v0  ;;  %v2299_v4 = vadd.f32 -0.28449672, %v2291_v28 }
 0xb6a   : > { %v2409_v1 = vmul.f32 %v2401_v53, %v3817_v30  ;;  %v2399_v39 = vadd.f32 1.0, %v2391_v25  ;;  %v2372_v12 = vsub.f32 1.0, %v2364_v5  ;;  %v2406_v49 = vmul.f32 %v2398_v48, %v3803_v26 }
 0xb6b   : > { %v2325_v24 = vmul.f32 %v3813_v13, %v2317_v52  ;;  %v2370_v29 = vsub.f32 1.0, %v2362_v10  ;;  %v2307_v62 = vmul.f32 %v3823_v35, %v2299_v4  ;;  %v2204_v41 = vmul.f32 0.5, %v3756_v27 }
 0xb6c   : > { %v2415_v56 = vpack.c.bf16 %v2409_v1, %v2408_v54  ;;  %v2407_v23 = vmul.f32 %v2399_v39, %v2199_v14  ;;  %v2388_v40 = vsub.f32 0.0, %v2372_v12  ;;  %v2205_v17 = vmul.f32 0.5, %v3760_v9  ;;  %v2683_v9 = vld [vmem:[%s3909_s14] ss:$0 sm:$0xff] }
 0xb6d   : > { %v2365_v3 = vmul.f32 %v3088_v60, %v2325_v24  ;;  %v2315_v30 = vadd.f32 0.2548296, %v2307_v62  ;;  %v2386_v38 = vsub.f32 0.0, %v2370_v29  ;;  %v2202_v45 = vmul.f32 0.5, %v3758_v57 }
 0xb6e   : > { %v2414_v7 = vpack.c.bf16 %v2407_v23, %v2406_v49  ;;  %v2396_v33 = vsel %vm2380_vm7, %v2372_v12, %v2388_v40  ;;  %v2203_v27 = vmul.f32 0.5, %v3765_v20 }
 0xb6f   : > { %v2373_v34 = vsub.f32 1.0, %v2365_v3  ;;  %v2323_v26 = vmul.f32 %v3823_v35, %v2315_v30  ;;  %v2404_v18 = vadd.f32 1.0, %v2396_v33  ;;  %v2394_v59 = vsel %vm2378_vm9, %v2370_v29, %v2386_v38 }
 0xb70   : > { %2918 = vmatprep.mubr.bf16.mxu1 %v2414_v7  ;;  %v2402_v35 = vadd.f32 1.0, %v2394_v59 }
 0xb71   : > { %2919 = vmatmul.mubr.bf16.vlgmr.msra.gmra.mrb[40].mxu1 %v2415_v56  ;;  %v2389_v36 = vsub.f32 0.0, %v2373_v34  ;;  %v2363_v13 = vmul.f32 %v3090_v2, %v2323_v26  ;;  %v2412_v6 = vmul.f32 %v2404_v18, %v2204_v41 }
 0xb72   : > { %v2410_v51 = vmul.f32 %v2402_v35, %v2202_v45 }
 0xb73   : > { %v2397_v60 = vsel %vm2381_vm8, %v2373_v34, %v2389_v36  ;;  %v2371_v11 = vsub.f32 1.0, %v2363_v13 }
 0xb74   : > { %v2405_v15 = vadd.f32 1.0, %v2397_v60 }
 0xb75   : > { %v2387_v43 = vsub.f32 0.0, %v2371_v11 }
 0xb76   : > { %v2413_v37 = vmul.f32 %v2405_v15, %v2205_v17 }
 0xb77   : > { %v2395_v58 = vsel %vm2379_vm10, %v2371_v11, %v2387_v43 }
 0xb78   : > { %v2417_v22 = vpack.c.bf16 %v2413_v37, %v2412_v6  ;;  %v2403_v63 = vadd.f32 1.0, %v2395_v58 }
 0xb7a   : > { %v2411_v48 = vmul.f32 %v2403_v63, %v2203_v27 }
 0xb7c   : > { %v2416_v55 = vpack.c.bf16 %v2411_v48, %v2410_v51 }
 0xb7e   : > { %2922 = vmatprep.mubr.bf16.mxu1 %v2416_v55 }
 0xb7f   : > { %2923 = vmatmul.mubr.bf16.gmra.mrb[44].mxu1 %v2417_v22 }
 0xc44   : > { %v2920_v47 = vpop.f32.mrb[40].mxu1 }
 0xc45   : > { %v2532_v50 = vadd.f32 %v2920_v47, %v2683_v9  ;;  %v2523_v53 = vpop.f32.mrb[41].mxu1 }
 0xc46   : > { %v2524_v57 = vadd.f32 %v2683_v9, %v2523_v53  ;;  %v2921_v20 = vpop.f32.mrb[42].mxu1 }
 0xc47   : > { %v2556_v16 = vadd.f32 %v2532_v50, %v3601_v8  ;;  %v2535_v61 = vadd.f32 %v2921_v20, %v2683_v9  ;;  %v2526_v0 = vpop.f32.mrb[43].mxu1 }
 0xc48   : > { %v2554_v28 = vadd.f32 %v2524_v57, %v3598_v32  ;;  %v2527_v54 = vadd.f32 %v2683_v9, %v2526_v0 }
 0xc49   : > { %2564 = vst.msk [vmem:[%s494_s30 + $0x10] sm:$0xff] %vm506_vm0, %v2556_v16  ;;  %v2557_v14 = vadd.f32 %v2535_v61, %v3610_v31 }
 0xc4a   : > { %2562 = vst.msk [vmem:[%s494_s30] sm:$0xff] %vm506_vm0, %v2554_v28  ;;  %v2555_v25 = vadd.f32 %v2527_v54, %v3604_v19 }
 0xc4b   : > { %2565 = vst.msk [vmem:[%s494_s30 + $0x18] sm:$0xff] %vm506_vm0, %v2557_v14 }
 0xc4c   : > { %2563 = vst.msk [vmem:[%s494_s30 + $0x8] sm:$0xff] %vm506_vm0, %v2555_v25 }
 0xc52   : > { %v2924_v5 = vpop.f32.mrb[44].mxu1 }
 0xc53   : > { %v2548_v1 = vadd.f32 %v2924_v5, %v2683_v9  ;;  %v2539_v8 = vpop.f32.mrb[45].mxu1 }
 0xc54   : > { %v2540_v39 = vadd.f32 %v2683_v9, %v2539_v8  ;;  %v2925_v10 = vpop.f32.mrb[46].mxu1 }
 0xc55   : > { %v2560_v32 = vadd.f32 %v2548_v1, %v3628_v46  ;;  %v2551_v52 = vadd.f32 %v2925_v10, %v2683_v9  ;;  %v2542_v12 = vpop.f32.mrb[47].mxu1 }
 0xc56   : > { %v2558_v4 = vadd.f32 %v2540_v39, %v3618_v42  ;;  %v2543_v31 = vadd.f32 %v2683_v9, %v2542_v12 }
 0xc57   : > { %2568 = vst.msk [vmem:[%s494_s30 + $0x30] sm:$0xff] %vm506_vm0, %v2560_v32  ;;  %v2561_v19 = vadd.f32 %v2551_v52, %v3624_v44 }
 0xc58   : > { %2566 = vst.msk [vmem:[%s494_s30 + $0x20] sm:$0xff] %vm506_vm0, %v2558_v4  ;;  %v2559_v49 = vadd.f32 %v2543_v31, %v3620_v21 }
 0xc59   : > { %2569 = vst.msk [vmem:[%s494_s30 + $0x38] sm:$0xff] %vm506_vm0, %v2561_v19 }
 0xc5a   : > { %2567 = vst.msk [vmem:[%s494_s30 + $0x28] sm:$0xff] %vm506_vm0, %v2559_v49 }
 0xc5b PF: > { %s25_s18 = sadd.s32 1, %s3105_s18  }
 0xc5c   : > { %p22_p4 = scmp.ge.s32.totalorder %s25_s18, 4  }
 0xc5e   :  { %24 = sbr.rel (!%p22_p4) target bundleno = 1 (0x1), region = 112 }

</bundles_post_ra>
